<compile_context>
chip_gen: v5e
topology: v5e:2x2
jax: 0.10.0
libtpu: 0.0.40
codegen_flags: <defaults>
</compile_context>

<pallas_src>
import jax
import jax.numpy as jnp
from jax import lax
from jax.experimental import pallas as pl
from jax.experimental.pallas import tpu as pltpu

N_EMBD = 512       # n_embd from the module
HEAD_SIZE = 64     # head_size constructor arg (n_embd // n_head in the video)
BLOCK_SIZE = 256   # max context; T <= BLOCK_SIZE


def head_kernel(x_ref, wqkv_ref, o_ref, q_ref, k_ref, v_ref):
    # x_ref:    (Bblk, T, C)   bf16 VMEM tile for Bblk batch elements
    # wqkv_ref: (C, 3*hs)      fused [Wq*scale | Wk | Wv], bf16, resident across steps
    # o_ref:    (Bblk, T, hs)  f32 output tile
    # q/k/v_ref:(Bblk, T, hs)  bf16 VMEM scratch (bounds the qkv live range)
    Bblk, T, C = x_ref.shape
    hs = o_ref.shape[-1]

    # ---- fused QKV projection for all Bblk batch elements at once (bf16 MXU, f32 acc) ----
    # The 1/sqrt(C) scale of the reference is already folded into the Wq columns.
    x2d = x_ref[...].reshape(Bblk * T, C)                       # free reshape, already bf16
    qkv = jnp.dot(x2d, wqkv_ref[...],
                  preferred_element_type=jnp.float32)           # (Bblk*T, 3*hs) f32
    qkv = qkv.astype(jnp.bfloat16)                              # drop f32 intermediate now
    q_ref[...] = qkv[:, 0 * hs:1 * hs].reshape(Bblk, T, hs)
    k_ref[...] = qkv[:, 1 * hs:2 * hs].reshape(Bblk, T, hs)
    v_ref[...] = qkv[:, 2 * hs:3 * hs].reshape(Bblk, T, hs)

    # Causal mask shared by every batch element in the block (hoisted out of the loop).
    row = lax.broadcasted_iota(jnp.int32, (T, T), 0)
    col = lax.broadcasted_iota(jnp.int32, (T, T), 1)
    causal = col <= row

    def body(i, carry):
        q = q_ref[i]                                            # (T, hs) bf16
        k = k_ref[i]
        v = v_ref[i]

        # q @ k^T as a last-dim contraction (no explicit transpose before the MXU).
        s = lax.dot_general(q, k,
                            dimension_numbers=(((1,), (1,)), ((), ())),
                            preferred_element_type=jnp.float32)  # (T, T) f32

        # causal mask + numerically stable softmax (f32 VPU/EUP)
        s = jnp.where(causal, s, -jnp.inf)
        m = jnp.max(s, axis=-1, keepdims=True)
        e = jnp.exp(s - m)
        denom = jnp.sum(e, axis=-1, keepdims=True)
        p = e * pl.reciprocal(denom, approx=True)

        # TODO(synk): nn.Dropout(0.2) is identity in eval mode; training-mode
        #             stochastic dropout (pltpu.prng_*) intentionally omitted.

        out = jnp.dot(p.astype(jnp.bfloat16), v,
                      preferred_element_type=jnp.float32)        # (T, hs)
        o_ref[i] = out.astype(o_ref.dtype)
        return carry

    # Short, fixed trip-count loop over the batch elements of this block.
    lax.fori_loop(0, Bblk, body, None, unroll=(Bblk <= 8))


def _pick_block_b(B, T, C, *, target_tile_bytes=2 << 20, min_steps=4):
    """Largest batch tile whose bf16 x slab stays under ~target_tile_bytes while
    leaving >= min_steps grid steps when possible (>= 2 per TensorCore on v7x)."""
    per_batch = T * C * 2  # bf16 bytes per batch element of x
    divisors = [d for d in range(1, B + 1) if B % d == 0]
    for steps in (min_steps, 2, 1):
        cands = [d for d in divisors
                 if B // d >= steps and d * per_batch <= target_tile_bytes]
        if cands:
            return max(cands)
    return 1


def head_forward(x, wk, wq, wv, *, block_b=None):
    """x: (B, T, C) float32; w*: (C, head_size) float32 -> (B, T, head_size) float32."""
    B, T, C = x.shape
    hs = wk.shape[1]

    if block_b is None:
        block_b = _pick_block_b(B, T, C)
    assert B % block_b == 0, "batch must be divisible by block_b"

    # Hoisted weight prep: fuse [q | k | v], fold the reference 1/sqrt(C) scale into
    # the Wq columns, cast once to bf16 (full-rate MXU).
    scale = 1.0 / (C ** 0.5)
    wqkv = jnp.concatenate([wq * scale, wk, wv], axis=1).astype(jnp.bfloat16)  # (C, 3*hs)

    # Feed x to the kernel in bf16: halves the dominant HBM->VMEM traffic.
    x_bf16 = x.astype(jnp.bfloat16)

    grid = (B // block_b,)
    return pl.pallas_call(
        head_kernel,
        out_shape=jax.ShapeDtypeStruct((B, T, hs), jnp.float32),
        grid_spec=pltpu.PrefetchScalarGridSpec(
            num_scalar_prefetch=0,
            grid=grid,
            in_specs=[
                pl.BlockSpec((block_b, T, C), lambda b: (b, 0, 0)),   # x, block_b batches/step
                pl.BlockSpec((C, 3 * hs), lambda b: (0, 0)),          # fused Wqkv (resident)
            ],
            out_specs=pl.BlockSpec((block_b, T, hs), lambda b: (b, 0, 0)),
            scratch_shapes=[
                pltpu.VMEM((block_b, T, hs), jnp.bfloat16),           # q
                pltpu.VMEM((block_b, T, hs), jnp.bfloat16),           # k
                pltpu.VMEM((block_b, T, hs), jnp.bfloat16),           # v
            ],
        ),
        compiler_params=pltpu.CompilerParams(
            dimension_semantics=("parallel",),
            vmem_limit_bytes=32 * 1024 * 1024,   # headroom on v5e (16 MiB scoped default)
        ),
    )(x_bf16, wqkv)


def head_reference(x, wk, wq, wv):
    """Pure-JAX f32 reference mirroring the PyTorch forward (eval mode)."""
    B, T, C = x.shape
    k = x @ wk
    q = x @ wq
    v = x @ wv
    wei = jnp.einsum("btd,bsd->bts", q, k) / (C ** 0.5)
    mask = jnp.tril(jnp.ones((T, T), dtype=bool))
    wei = jnp.where(mask[None, :, :], wei, -jnp.inf)
    wei = jax.nn.softmax(wei, axis=-1)
    return jnp.einsum("bts,bsd->btd", wei, v)


if __name__ == "__main__":
    key = jax.random.PRNGKey(0)
    kx, kk, kq, kv = jax.random.split(key, 4)

    # SMALL shapes consistent with the module: C = n_embd = 512, T <= block_size.
    B, T, C, hs = 8, 128, N_EMBD, HEAD_SIZE   # -> block_b=2, grid of 4 "parallel" steps

    x = jax.random.normal(kx, (B, T, C), dtype=jnp.float32)
    # nn.Linear(bias=False) default init: U(-1/sqrt(C), 1/sqrt(C)), deterministic here
    bound = 1.0 / (C ** 0.5)
    wk = jax.random.uniform(kk, (C, hs), jnp.float32, -bound, bound)
    wq = jax.random.uniform(kq, (C, hs), jnp.float32, -bound, bound)
    wv = jax.random.uniform(kv, (C, hs), jnp.float32, -bound, bound)

    out = head_forward(x, wk, wq, wv)
    jax.block_until_ready(out)

    ref = head_reference(x, wk, wq, wv)
    assert out.shape == (B, T, hs)
    # bf16 matmul operands (f32 accumulation) + approx reciprocal -> loose tolerance
    max_err = float(jnp.max(jnp.abs(out - ref)))
    assert jnp.allclose(out, ref, atol=2e-2, rtol=2e-2), f"mismatch vs reference: {max_err}"

    print("KERNEL_OK")
</pallas_src>

<mosaic_0001>
module attributes {stable_mosaic.version = 11 : i64} {
  func.func @head_kernel(%arg0: i32, %arg1: memref<2x128x512xbf16, #tpu.memory_space<vmem>>, %arg2: memref<512x192xbf16, #tpu.memory_space<vmem>>, %arg3: memref<2x128x64xf32, #tpu.memory_space<vmem>>, %arg4: memref<2x128x64xbf16, #tpu.memory_space<vmem>>, %arg5: memref<2x128x64xbf16, #tpu.memory_space<vmem>>, %arg6: memref<2x128x64xbf16, #tpu.memory_space<vmem>>) attributes {dimension_semantics = [#tpu.dimension_semantics<parallel>], iteration_bounds = array<i64: 4>, scalar_prefetch = 0 : i64, scratch_operands = 3 : i64, tpu.core_type = #tpu.core_type<tc>, window_params = [{transform_indices = @transform_0, window_bounds = array<i64: 2, 128, 512>}, {pipeline_mode = #tpu.pipeline_mode<synchronous>, transform_indices = @transform_1, window_bounds = array<i64: 512, 192>}, {transform_indices = @transform_2, window_bounds = array<i64: 2, 128, 64>}]} {
    %c0 = arith.constant 0 : index
    %c0_0 = arith.constant 0 : index
    %c0_1 = arith.constant 0 : index
    %0 = vector.load %arg1[%c0, %c0_0, %c0_1] : memref<2x128x512xbf16, #tpu.memory_space<vmem>>, vector<2x128x512xbf16>
    %1 = vector.shape_cast %0 : vector<2x128x512xbf16> to vector<256x512xbf16>
    %c0_2 = arith.constant 0 : index
    %c0_3 = arith.constant 0 : index
    %2 = vector.load %arg2[%c0_2, %c0_3] : memref<512x192xbf16, #tpu.memory_space<vmem>>, vector<512x192xbf16>
    %cst = arith.constant dense<0.000000e+00> : vector<256x192xf32>
    %3 = tpu.matmul %1, %2, %cst {dimension_numbers = #tpu.dot_dimension_numbers<[1], [0], [0], [1], [0, 0, 1, 1], [], []>} : vector<256x512xbf16>, vector<512x192xbf16>, vector<256x192xf32> -> vector<256x192xf32>
    %4 = arith.truncf %3 : vector<256x192xf32> to vector<256x192xbf16>
    %5 = vector.extract_strided_slice %4 {offsets = [0, 0], sizes = [256, 64], strides = [1, 1]} : vector<256x192xbf16> to vector<256x64xbf16>
    %6 = vector.shape_cast %5 : vector<256x64xbf16> to vector<2x128x64xbf16>
    %c0_4 = arith.constant 0 : index
    %c0_5 = arith.constant 0 : index
    %c0_6 = arith.constant 0 : index
    %7 = vector.load %arg4[%c0_4, %c0_5, %c0_6] : memref<2x128x64xbf16, #tpu.memory_space<vmem>>, vector<2x128x64xbf16>
    tpu.vector_store %arg4[%c0_4, %c0_5, %c0_6], %6 {strides = array<i32>} : memref<2x128x64xbf16, #tpu.memory_space<vmem>>, vector<2x128x64xbf16>,
    %8 = vector.extract_strided_slice %4 {offsets = [0, 64], sizes = [256, 64], strides = [1, 1]} : vector<256x192xbf16> to vector<256x64xbf16>
    %9 = vector.shape_cast %8 : vector<256x64xbf16> to vector<2x128x64xbf16>
    %c0_7 = arith.constant 0 : index
    %c0_8 = arith.constant 0 : index
    %c0_9 = arith.constant 0 : index
    %10 = vector.load %arg5[%c0_7, %c0_8, %c0_9] : memref<2x128x64xbf16, #tpu.memory_space<vmem>>, vector<2x128x64xbf16>
    tpu.vector_store %arg5[%c0_7, %c0_8, %c0_9], %9 {strides = array<i32>} : memref<2x128x64xbf16, #tpu.memory_space<vmem>>, vector<2x128x64xbf16>,
    %11 = vector.extract_strided_slice %4 {offsets = [0, 128], sizes = [256, 64], strides = [1, 1]} : vector<256x192xbf16> to vector<256x64xbf16>
    %12 = vector.shape_cast %11 : vector<256x64xbf16> to vector<2x128x64xbf16>
    %c0_10 = arith.constant 0 : index
    %c0_11 = arith.constant 0 : index
    %c0_12 = arith.constant 0 : index
    %13 = vector.load %arg6[%c0_10, %c0_11, %c0_12] : memref<2x128x64xbf16, #tpu.memory_space<vmem>>, vector<2x128x64xbf16>
    tpu.vector_store %arg6[%c0_10, %c0_11, %c0_12], %12 {strides = array<i32>} : memref<2x128x64xbf16, #tpu.memory_space<vmem>>, vector<2x128x64xbf16>,
    %14 = tpu.iota {dimensions = array<i32: 0>} : vector<128x128xi32>
    %15 = tpu.iota {dimensions = array<i32: 1>} : vector<128x128xi32>
    %16 = arith.cmpi sle, %15, %14 : vector<128x128xi32>
    %c0_i32 = arith.constant 0 : i32
    %17 = arith.index_cast %c0_i32 : i32 to index
    %c0_13 = arith.constant 0 : index
    %c0_14 = arith.constant 0 : index
    %18 = vector.load %arg4[%17, %c0_13, %c0_14] : memref<2x128x64xbf16, #tpu.memory_space<vmem>>, vector<1x128x64xbf16>
    %19 = vector.shape_cast %18 : vector<1x128x64xbf16> to vector<128x64xbf16>
    %20 = arith.index_cast %c0_i32 : i32 to index
    %c0_15 = arith.constant 0 : index
    %c0_16 = arith.constant 0 : index
    %21 = vector.load %arg5[%20, %c0_15, %c0_16] : memref<2x128x64xbf16, #tpu.memory_space<vmem>>, vector<1x128x64xbf16>
    %22 = vector.shape_cast %21 : vector<1x128x64xbf16> to vector<128x64xbf16>
    %23 = arith.index_cast %c0_i32 : i32 to index
    %c0_17 = arith.constant 0 : index
    %c0_18 = arith.constant 0 : index
    %24 = vector.load %arg6[%23, %c0_17, %c0_18] : memref<2x128x64xbf16, #tpu.memory_space<vmem>>, vector<1x128x64xbf16>
    %25 = vector.shape_cast %24 : vector<1x128x64xbf16> to vector<128x64xbf16>
    %cst_19 = arith.constant dense<0.000000e+00> : vector<128x128xf32>
    %26 = tpu.matmul %19, %22, %cst_19 {dimension_numbers = #tpu.dot_dimension_numbers<[1], [1], [0], [0], [0, 0, 1, 0], [], []>} : vector<128x64xbf16>, vector<128x64xbf16>, vector<128x128xf32> -> vector<128x128xf32>
    %cst_20 = arith.constant 0xFF800000 : f32
    %27 = vector.broadcast %cst_20 : f32 to vector<128x128xf32>
    %28 = arith.select %16, %26, %27 : vector<128x128xi1>, vector<128x128xf32>
    %cst_21 = arith.constant dense<0xFF800000> : vector<128xf32>
    %29 = vector.multi_reduction <maximumf>, %28, %cst_21 [1] : vector<128x128xf32> to vector<128xf32>
    %30 = vector.shape_cast %29 : vector<128xf32> to vector<128x1xf32>
    %31 = vector.broadcast %30 : vector<128x1xf32> to vector<128x128xf32>
    %32 = arith.subf %28, %31 : vector<128x128xf32>
    %33 = math.exp %32 : vector<128x128xf32>
    %cst_22 = arith.constant dense<0.000000e+00> : vector<128xf32>
    %34 = vector.multi_reduction <add>, %33, %cst_22 [1] : vector<128x128xf32> to vector<128xf32>
    %35 = vector.shape_cast %34 : vector<128xf32> to vector<128x1xf32>
    %36 = tpu.reciprocal %35 {approx = true} : vector<128x1xf32> -> vector<128x1xf32>
    %37 = vector.broadcast %36 : vector<128x1xf32> to vector<128x128xf32>
    %38 = arith.mulf %33, %37 : vector<128x128xf32>
    %39 = arith.truncf %38 : vector<128x128xf32> to vector<128x128xbf16>
    %cst_23 = arith.constant dense<0.000000e+00> : vector<128x64xf32>
    %40 = tpu.matmul %39, %25, %cst_23 {dimension_numbers = #tpu.dot_dimension_numbers<[1], [0], [0], [1], [0, 0, 1, 1], [], []>} : vector<128x128xbf16>, vector<128x64xbf16>, vector<128x64xf32> -> vector<128x64xf32>
    %41 = arith.index_cast %c0_i32 : i32 to index
    %c0_24 = arith.constant 0 : index
    %c0_25 = arith.constant 0 : index
    %42 = vector.load %arg3[%41, %c0_24, %c0_25] : memref<2x128x64xf32, #tpu.memory_space<vmem>>, vector<1x128x64xf32>
    %43 = vector.shape_cast %42 : vector<1x128x64xf32> to vector<128x64xf32>
    %44 = vector.shape_cast %40 : vector<128x64xf32> to vector<1x128x64xf32>
    tpu.vector_store %arg3[%41, %c0_24, %c0_25], %44 {strides = array<i32>} : memref<2x128x64xf32, #tpu.memory_space<vmem>>, vector<1x128x64xf32>,
    %c1_i32 = arith.constant 1 : i32
    %45 = arith.index_cast %c1_i32 : i32 to index
    %c0_26 = arith.constant 0 : index
    %c0_27 = arith.constant 0 : index
    %46 = vector.load %arg4[%45, %c0_26, %c0_27] : memref<2x128x64xbf16, #tpu.memory_space<vmem>>, vector<1x128x64xbf16>
    %47 = vector.shape_cast %46 : vector<1x128x64xbf16> to vector<128x64xbf16>
    %48 = arith.index_cast %c1_i32 : i32 to index
    %c0_28 = arith.constant 0 : index
    %c0_29 = arith.constant 0 : index
    %49 = vector.load %arg5[%48, %c0_28, %c0_29] : memref<2x128x64xbf16, #tpu.memory_space<vmem>>, vector<1x128x64xbf16>
    %50 = vector.shape_cast %49 : vector<1x128x64xbf16> to vector<128x64xbf16>
    %51 = arith.index_cast %c1_i32 : i32 to index
    %c0_30 = arith.constant 0 : index
    %c0_31 = arith.constant 0 : index
    %52 = vector.load %arg6[%51, %c0_30, %c0_31] : memref<2x128x64xbf16, #tpu.memory_space<vmem>>, vector<1x128x64xbf16>
    %53 = vector.shape_cast %52 : vector<1x128x64xbf16> to vector<128x64xbf16>
    %cst_32 = arith.constant dense<0.000000e+00> : vector<128x128xf32>
    %54 = tpu.matmul %47, %50, %cst_32 {dimension_numbers = #tpu.dot_dimension_numbers<[1], [1], [0], [0], [0, 0, 1, 0], [], []>} : vector<128x64xbf16>, vector<128x64xbf16>, vector<128x128xf32> -> vector<128x128xf32>
    %cst_33 = arith.constant 0xFF800000 : f32
    %55 = vector.broadcast %cst_33 : f32 to vector<128x128xf32>
    %56 = arith.select %16, %54, %55 : vector<128x128xi1>, vector<128x128xf32>
    %cst_34 = arith.constant dense<0xFF800000> : vector<128xf32>
    %57 = vector.multi_reduction <maximumf>, %56, %cst_34 [1] : vector<128x128xf32> to vector<128xf32>
    %58 = vector.shape_cast %57 : vector<128xf32> to vector<128x1xf32>
    %59 = vector.broadcast %58 : vector<128x1xf32> to vector<128x128xf32>
    %60 = arith.subf %56, %59 : vector<128x128xf32>
    %61 = math.exp %60 : vector<128x128xf32>
    %cst_35 = arith.constant dense<0.000000e+00> : vector<128xf32>
    %62 = vector.multi_reduction <add>, %61, %cst_35 [1] : vector<128x128xf32> to vector<128xf32>
    %63 = vector.shape_cast %62 : vector<128xf32> to vector<128x1xf32>
    %64 = tpu.reciprocal %63 {approx = true} : vector<128x1xf32> -> vector<128x1xf32>
    %65 = vector.broadcast %64 : vector<128x1xf32> to vector<128x128xf32>
    %66 = arith.mulf %61, %65 : vector<128x128xf32>
    %67 = arith.truncf %66 : vector<128x128xf32> to vector<128x128xbf16>
    %cst_36 = arith.constant dense<0.000000e+00> : vector<128x64xf32>
    %68 = tpu.matmul %67, %53, %cst_36 {dimension_numbers = #tpu.dot_dimension_numbers<[1], [0], [0], [1], [0, 0, 1, 1], [], []>} : vector<128x128xbf16>, vector<128x64xbf16>, vector<128x64xf32> -> vector<128x64xf32>
    %69 = arith.index_cast %c1_i32 : i32 to index
    %c0_37 = arith.constant 0 : index
    %c0_38 = arith.constant 0 : index
    %70 = vector.load %arg3[%69, %c0_37, %c0_38] : memref<2x128x64xf32, #tpu.memory_space<vmem>>, vector<1x128x64xf32>
    %71 = vector.shape_cast %70 : vector<1x128x64xf32> to vector<128x64xf32>
    %72 = vector.shape_cast %68 : vector<128x64xf32> to vector<1x128x64xf32>
    tpu.vector_store %arg3[%69, %c0_37, %c0_38], %72 {strides = array<i32>} : memref<2x128x64xf32, #tpu.memory_space<vmem>>, vector<1x128x64xf32>,
    %c2_i32 = arith.constant 2 : i32
    return
  }
  func.func @transform_0(%arg0: i32) -> (i32, i32, i32) {
    %c0_i32 = arith.constant 0 : i32
    %c0_i32_0 = arith.constant 0 : i32
    %c0_i32_1 = arith.constant 0 : i32
    return %arg0, %c0_i32, %c0_i32_0 : i32, i32, i32
  }
  func.func @transform_1(%arg0: i32) -> (i32, i32) {
    %c0_i32 = arith.constant 0 : i32
    %c0_i32_0 = arith.constant 0 : i32
    %c0_i32_1 = arith.constant 0 : i32
    return %c0_i32, %c0_i32_0 : i32, i32
  }
  func.func @transform_2(%arg0: i32) -> (i32, i32, i32) {
    %c0_i32 = arith.constant 0 : i32
    %c0_i32_0 = arith.constant 0 : i32
    %c0_i32_1 = arith.constant 0 : i32
    return %arg0, %c0_i32, %c0_i32_0 : i32, i32, i32
  }
}

</mosaic_0001>

<bundles_post_ra>
// kernel: tpu_custom_call.1
= control target key start
LH: loop header
LB: loop body
LE: loop exit
PB: predicated region body
PF: predicated region fallthrough
CT: control target
= control target key end

     0   :  { %7 = vsyncpa [#allocation6], 0  ;;  %s5954_s0 = inlined_call_operand.hbm [shape: bf16[8,128,512], index: 0, kind: input, shape index: {}]   ;;  %s5955_s1 = inlined_call_operand.vmem [shape: bf16[512,192], index: 1, kind: input, shape index: {}]   ;;  %s5956_s2 = inlined_call_operand.vmem [shape: f32[8,128,64], index: 2, kind: output, shape index: {}]  }
   0x1   :  { %9 = vsyncpa [#allocation6 + $0x1], 0  ;;  %s4277_s9 = smov 0   ;;  %s4279_s10 = smov 0  }
   0x2   :  { %s4281_s11 = smov 0   ;;  %s4283_s12 = smov 0  }
   0x3 LB: > { %s3093_s13 = sadd.s32 4294967295, %s4257_s12   ;;  %s4297_s14 = sadd.s32 1, %s4257_s12   ;;  %s4257_s12 = sphi %s4283_s12, %s6041_s12   ;;  %s4253_s11 = sphi %s4281_s11, %s6040_s11   ;;  %s4249_s10 = sphi %s4279_s10, %s6039_s10   ;;  %s4245_s9 = sphi %s4277_s9, %s6038_s9  }
   0x4   : > { %s19_s15 = ssub.s32 %s4257_s12, %s4297_s14  ;;  %s22_s16 = sadd.s32 1, %s4253_s11 }
   0x5   : > { %p20_p0 = scmp.eq.s32.totalorder %s19_s15, 0  ;;  %p29_p1 = scmp.ne.s32.totalorder %s4253_s11, %s4249_s10 }
   0x6   : > { %p30_p2 = scmp.eq.s32.totalorder %s4257_s12, 0  ;;  %p35_p3 = scmp.ne.s32.totalorder %s4249_s10, %s4245_s9 }
   0x7   : > { %s4307_s17 = scalar_select %p20_p0, %s4253_s11, %s22_s16  }
   0x8   : > { %p4309_p4 = por %p30_p2, %p29_p1  ;;  %p36_p5 = scmp.eq.s32.totalorder %s3093_s13, 0 }
   0x9   : > { %p4029_p6 = scmp.lt.s32.totalorder %s4257_s12, 4  ;;  %s109_s20 = sand.u32 1, %s4253_s11  }
   0xa   : > { %p4316_p7 = por %p36_p5, %p35_p3  ;;  %s3097_s21 = sshll.u32 %s109_s20, 9 }
   0xb   : > { %s3845_s22 = sshll.u32 %s4257_s12, 9  ;;  %s113_s26 = scalar_lea.vmem [#allocation5], %s3097_s21 }
   0xc   : > { %s119_s25 = scalar_lea.hbm %s5954_s0, %s3845_s22  ;;  %s122_s27 = sshll.u32 %s113_s26, 4  ;;  %s123_s27 = int_to_ptr.vmem [resolvable:$true] %s122_s27 }
   0xd   : > { %s120_s28 = sshll.u32 %s119_s25, 4  ;;  %p4327_p8 = pnand %p4029_p6, %p4309_p4  ;;  %s121_s28 = int_to_ptr.hbm [resolvable:$true] %s120_s28 }
   0xe   : > { %p3101_p9 = scmp.ge.s32.totalorder %s4257_s12, 1  ;;  %s110_s30 = scalar_lea.sflag [#allocation6], %s109_s20 }
   0xf   : > { %s4193_s3 = sshra.s32 %s121_s28, 4  ;;  %p4197_p11 = pneg %p4327_p8  ;;  %s4194_s3 = int_to_ptr.hbm [resolvable:$true] %s4193_s3 }
  0x10   : > { %s4195_s4 = scalar_lea.hbm %s4194_s3, 512  ;;  %s4200_s7 = scalar_lea.hbm %s5954_s0, 2048 }
  0x11   : > { %p4196_p10 = scmp.ne.s32.totalorder %s4194_s3, %s4195_s4  ;;  %p4201_p0 = scmp.lt.s32.totalorder %s4194_s3, %s5954_s0 }
  0x12   : > { %p4202_p1 = scmp.lt.s32.totalorder %s4200_s7, %s4195_s4 }
  0x13   : > { %p4198_p12 = pnand %p4197_p11, %p4196_p10 }
  0x14   : > { %p4203_p2 = por %p4202_p1, %p4201_p0 }
  0x15   : > { %p4199_p13 = pneg %p4198_p12 }
  0x17   : > { %p4204_p3 = pnand %p4203_p2, %p4199_p13 }
  0x19   : > { %4207 = shalt.err (!%p4204_p3)
}
  0x1a   : > { %s4259_s15 = smov 256   ;;  %s4260_s16 = smov 16  }
  0x1b   : > { %4028 = dma.hbm_to_vmem [thread:$0]  (!%p4327_p8), %s121_s28, 8192, %s123_s27, %s110_s30, %s4259_s15, %s4259_s15, %s4260_s16  }
  0x1c   : > { %p130_p4 = scmp.lt.s32.totalorder %s4257_s12, 5 }
  0x1e   : > { %p131_p5 = pnand %p3101_p9, %p130_p4 }
  0x20   : > { %134 = sbr.rel (%p131_p5) target bundleno = 1741 (0x6cd), region = 28 }
  0x25   : > { %s136_s18 = sand.u32 1, %s4249_s10  }
  0x26   : > { %s3102_s20 = sshll.u32 %s136_s18, 9  ;;  %s137_s21 = scalar_lea.sflag [#allocation6], %s136_s18 }
  0x27   : > { %s4346_s22 = scalar_lea.vmem [#allocation5], %s3102_s20 }
  0x28   : > { %4240 = dma.done.wait (%p4316_p7), %s137_s21, 8192  }
  0x29   : > { %4242 = vsyncadd (%p4316_p7), %s137_s21, 4294959104  ;;  %v3420_v0 = vld [vmem:[%s5955_s1 + $0x70] sm:$0xf]  ;;  %v3926_v1 = vld [vmem:[%s5955_s1 + $0x74] sm:$0xf0]  ;;  %vm1683_vm0 = vcmask 519168  }
  0x2a   : > { %v3484_v2 = vld [vmem:[%s5955_s1 + $0xf0] sm:$0xf]  ;;  %v3421_v3 = vor.u32 %v3926_v1, %v3420_v0  ;;  %v3942_v4 = vld [vmem:[%s5955_s1 + $0xf4] sm:$0xf0]  ;;  %v3412_v11 = vld [vmem:[%s5955_s1 + $0x60] sm:$0xf] }
  0x2b   : > { %v3548_v5 = vld [vmem:[%s5955_s1 + $0x170] sm:$0xf]  ;;  %v3958_v6 = vld [vmem:[%s5955_s1 + $0x174] sm:$0xf0]  ;;  %v3485_v7 = vor.u32 %v3942_v4, %v3484_v2  ;;  %v3924_v13 = vld [vmem:[%s5955_s1 + $0x64] sm:$0xf0] }
  0x2c   : > { %v3549_v8 = vor.u32 %v3958_v6, %v3548_v5  ;;  %v3612_v9 = vld [vmem:[%s5955_s1 + $0x1f0] sm:$0xf]  ;;  %v3974_v10 = vld [vmem:[%s5955_s1 + $0x1f4] sm:$0xf0]  ;;  %939 = vmatpush.bf16.msra.mxu0 %v3421_v3  ;;  %v3476_v14 = vld [vmem:[%s5955_s1 + $0xe0] sm:$0xf]  ;;  %v3413_v16 = vor.u32 %v3924_v13, %v3412_v11 }
  0x2d   : > { %v3613_v12 = vor.u32 %v3974_v10, %v3612_v9  ;;  %v3940_v15 = vld [vmem:[%s5955_s1 + $0xe4] sm:$0xf0]  ;;  %1028 = vmatpush.bf16.msra.mxu1 %v3485_v7  ;;  %v3540_v18 = vld [vmem:[%s5955_s1 + $0x160] sm:$0xf]  ;;  %v3404_v23 = vld [vmem:[%s5955_s1 + $0x50] sm:$0xf] }
  0x2e   : > { %1117 = vmatpush.bf16.msra.mxu2 %v3549_v8  ;;  %v3477_v17 = vor.u32 %v3940_v15, %v3476_v14  ;;  %v3956_v19 = vld [vmem:[%s5955_s1 + $0x164] sm:$0xf0]  ;;  %v3604_v20 = vld [vmem:[%s5955_s1 + $0x1e0] sm:$0xf]  ;;  %v3922_v24 = vld [vmem:[%s5955_s1 + $0x54] sm:$0xf0] }
  0x2f   : > { %1206 = vmatpush.bf16.msra.mxu3 %v3613_v12  ;;  %v3541_v21 = vor.u32 %v3956_v19, %v3540_v18  ;;  %v3972_v22 = vld [vmem:[%s5955_s1 + $0x1e4] sm:$0xf0]  ;;  %v3468_v26 = vld [vmem:[%s5955_s1 + $0xd0] sm:$0xf]  ;;  %v3938_v27 = vld [vmem:[%s5955_s1 + $0xd4] sm:$0xf0]  ;;  %v3405_v29 = vor.u32 %v3922_v24, %v3404_v23 }
  0x30   : > { %v3605_v25 = vor.u32 %v3972_v22, %v3604_v20  ;;  %v3532_v28 = vld [vmem:[%s5955_s1 + $0x150] sm:$0xf]  ;;  %940 = vmatpush.bf16.msra.mxu0 %v3413_v16  ;;  %v3954_v30 = vld [vmem:[%s5955_s1 + $0x154] sm:$0xf0]  ;;  %v3469_v33 = vor.u32 %v3938_v27, %v3468_v26  ;;  %v3396_v35 = vld [vmem:[%s5955_s1 + $0x40] sm:$0xf] }
  0x31   : > { %v3596_v31 = vld [vmem:[%s5955_s1 + $0x1d0] sm:$0xf]  ;;  %v3970_v32 = vld [vmem:[%s5955_s1 + $0x1d4] sm:$0xf0]  ;;  %1029 = vmatpush.bf16.msra.mxu1 %v3477_v17  ;;  %v3533_v34 = vor.u32 %v3954_v30, %v3532_v28  ;;  %v3920_v36 = vld [vmem:[%s5955_s1 + $0x44] sm:$0xf0] }
  0x32   : > { %1118 = vmatpush.bf16.msra.mxu2 %v3541_v21  ;;  %v3460_v37 = vld [vmem:[%s5955_s1 + $0xc0] sm:$0xf]  ;;  %v3597_v38 = vor.u32 %v3970_v32, %v3596_v31  ;;  %v3936_v39 = vld [vmem:[%s5955_s1 + $0xc4] sm:$0xf0]  ;;  %v3397_v44 = vor.u32 %v3920_v36, %v3396_v35  ;;  %v3388_v47 = vld [vmem:[%s5955_s1 + $0x30] sm:$0xf] }
  0x33   : > { %1207 = vmatpush.bf16.msra.mxu3 %v3605_v25  ;;  %v3524_v40 = vld [vmem:[%s5955_s1 + $0x140] sm:$0xf]  ;;  %v3952_v41 = vld [vmem:[%s5955_s1 + $0x144] sm:$0xf0]  ;;  %v3461_v45 = vor.u32 %v3936_v39, %v3460_v37  ;;  %v3918_v48 = vld [vmem:[%s5955_s1 + $0x34] sm:$0xf0] }
  0x34   : > { %v3588_v42 = vld [vmem:[%s5955_s1 + $0x1c0] sm:$0xf]  ;;  %v3968_v43 = vld [vmem:[%s5955_s1 + $0x1c4] sm:$0xf0]  ;;  %941 = vmatpush.bf16.msra.mxu0 %v3405_v29  ;;  %v3525_v46 = vor.u32 %v3952_v41, %v3524_v40  ;;  %v3452_v49 = vld [vmem:[%s5955_s1 + $0xb0] sm:$0xf]  ;;  %v3389_v56 = vor.u32 %v3918_v48, %v3388_v47 }
  0x35   : > { %1030 = vmatpush.bf16.msra.mxu1 %v3469_v33  ;;  %v3589_v50 = vor.u32 %v3968_v43, %v3588_v42  ;;  %v3934_v51 = vld [vmem:[%s5955_s1 + $0xb4] sm:$0xf0]  ;;  %v3516_v52 = vld [vmem:[%s5955_s1 + $0x130] sm:$0xf]  ;;  %v3380_v59 = vld [vmem:[%s5955_s1 + $0x20] sm:$0xf] }
  0x36   : > { %1119 = vmatpush.bf16.msra.mxu2 %v3533_v34  ;;  %v3950_v53 = vld [vmem:[%s5955_s1 + $0x134] sm:$0xf0]  ;;  %v3580_v54 = vld [vmem:[%s5955_s1 + $0x1b0] sm:$0xf]  ;;  %v3453_v57 = vor.u32 %v3934_v51, %v3452_v49  ;;  %v3916_v60 = vld [vmem:[%s5955_s1 + $0x24] sm:$0xf0] }
  0x37   : > { %1208 = vmatpush.bf16.msra.mxu3 %v3597_v38  ;;  %v3966_v55 = vld [vmem:[%s5955_s1 + $0x1b4] sm:$0xf0]  ;;  %v3517_v58 = vor.u32 %v3950_v53, %v3516_v52  ;;  %v3444_v61 = vld [vmem:[%s5955_s1 + $0xa0] sm:$0xf]  ;;  %v3932_v63 = vld [vmem:[%s5955_s1 + $0xa4] sm:$0xf0]  ;;  %v3381_v4 = vor.u32 %v3916_v60, %v3380_v59 }
  0x38   : > { %942 = vmatpush.bf16.msra.mxu0 %v3397_v44  ;;  %v3581_v62 = vor.u32 %v3966_v55, %v3580_v54  ;;  %v3508_v0 = vld [vmem:[%s5955_s1 + $0x120] sm:$0xf]  ;;  %v3948_v1 = vld [vmem:[%s5955_s1 + $0x124] sm:$0xf0]  ;;  %v3445_v5 = vor.u32 %v3932_v63, %v3444_v61  ;;  %v3372_v7 = vld [vmem:[%s5955_s1 + $0x10] sm:$0xf] }
  0x39   : > { %1031 = vmatpush.bf16.msra.mxu1 %v3461_v45  ;;  %v3572_v2 = vld [vmem:[%s5955_s1 + $0x1a0] sm:$0xf]  ;;  %v3964_v3 = vld [vmem:[%s5955_s1 + $0x1a4] sm:$0xf0]  ;;  %v3509_v6 = vor.u32 %v3948_v1, %v3508_v0  ;;  %v3914_v8 = vld [vmem:[%s5955_s1 + $0x14] sm:$0xf0] }
  0x3a   : > { %1120 = vmatpush.bf16.msra.mxu2 %v3525_v46  ;;  %v3436_v9 = vld [vmem:[%s5955_s1 + $0x90] sm:$0xf]  ;;  %v3573_v10 = vor.u32 %v3964_v3, %v3572_v2  ;;  %v3930_v11 = vld [vmem:[%s5955_s1 + $0x94] sm:$0xf0]  ;;  %v3373_v16 = vor.u32 %v3914_v8, %v3372_v7  ;;  %v3364_v19 = vld [vmem:[%s5955_s1] sm:$0xf] }
  0x3b   : > { %1209 = vmatpush.bf16.msra.mxu3 %v3589_v50  ;;  %v3500_v12 = vld [vmem:[%s5955_s1 + $0x110] sm:$0xf]  ;;  %v3946_v13 = vld [vmem:[%s5955_s1 + $0x114] sm:$0xf0]  ;;  %v3437_v17 = vor.u32 %v3930_v11, %v3436_v9  ;;  %v3912_v20 = vld [vmem:[%s5955_s1 + $0x4] sm:$0xf0] }
  0x3c   : > { %943 = vmatpush.bf16.msra.mxu0 %v3389_v56  ;;  %v3564_v14 = vld [vmem:[%s5955_s1 + $0x190] sm:$0xf]  ;;  %v3962_v15 = vld [vmem:[%s5955_s1 + $0x194] sm:$0xf0]  ;;  %v3501_v18 = vor.u32 %v3946_v13, %v3500_v12  ;;  %v3428_v21 = vld [vmem:[%s5955_s1 + $0x80] sm:$0xf]  ;;  %v3365_v28 = vor.u32 %v3912_v20, %v3364_v19 }
  0x3d   : > { %1032 = vmatpush.bf16.msra.mxu1 %v3453_v57  ;;  %v3565_v22 = vor.u32 %v3962_v15, %v3564_v14  ;;  %v3928_v23 = vld [vmem:[%s5955_s1 + $0x84] sm:$0xf0]  ;;  %v3492_v24 = vld [vmem:[%s5955_s1 + $0x100] sm:$0xf]  ;;  %v3849_v30 = vld [vmem:[%s4346_s22 + $0xc] sm:$0xf0] }
  0x3e   : > { %1121 = vmatpush.bf16.msra.mxu2 %v3517_v58  ;;  %v3944_v25 = vld [vmem:[%s5955_s1 + $0x104] sm:$0xf0]  ;;  %v3556_v26 = vld [vmem:[%s5955_s1 + $0x180] sm:$0xf]  ;;  %v3847_v31 = vld [vmem:[%s4346_s22 + $0x4] sm:$0xf]  ;;  %v3429_v32 = vor.u32 %v3928_v23, %v3428_v21 }
  0x3f   : > { %1210 = vmatpush.bf16.msra.mxu3 %v3581_v62  ;;  %v3960_v27 = vld [vmem:[%s5955_s1 + $0x184] sm:$0xf0]  ;;  %v3108_v29 = vld [vmem:[%s4346_s22] sm:$0xf]  ;;  %v3493_v33 = vor.u32 %v3944_v25, %v3492_v24  ;;  %v3110_v34 = vld [vmem:[%s4346_s22 + $0x10] sm:$0xf0] }
  0x40   : > { %944 = vmatpush.bf16.msra.mxu0 %v3381_v4  ;;  %v3116_v35 = vld [vmem:[%s4346_s22 + $0x8] sm:$0xf]  ;;  %v3850_v36 = vld [vmem:[%s4346_s22 + $0x14] sm:$0xf0]  ;;  %v3557_v37 = vor.u32 %v3960_v27, %v3556_v26  ;;  %v3848_v38 = vld [vmem:[%s4346_s22 + $0xc] sm:$0xf]  ;;  %v4552_v40 = vor.u32 %v3849_v30, %v3108_v29  ;;  %v4554_v41 = vor.u32 %v3847_v31, %v3110_v34 }
  0x41   : > { %1033 = vmatpush.bf16.msra.mxu1 %v3445_v5  ;;  %v3118_v39 = vld [vmem:[%s4346_s22 + $0x18] sm:$0xf0]  ;;  %v4556_v42 = vor.u32 %v3850_v36, %v3116_v35  ;;  %v3124_v44 = vld [vmem:[%s4346_s22 + $0x20] sm:$0xf]  ;;  %v3853_v45 = vld [vmem:[%s4346_s22 + $0x2c] sm:$0xf0] }
  0x42   : > { %1122 = vmatpush.bf16.msra.mxu2 %v3509_v6  ;;  %v4558_v43 = vor.u32 %v3848_v38, %v3118_v39  ;;  %v3851_v46 = vld [vmem:[%s4346_s22 + $0x24] sm:$0xf]  ;;  %v3126_v47 = vld [vmem:[%s4346_s22 + $0x30] sm:$0xf0]  ;;  %v3132_v48 = vld [vmem:[%s4346_s22 + $0x28] sm:$0xf]  ;;  %v4572_v52 = vor.u32 %v3853_v45, %v3124_v44 }
  0x43   : > { %1211 = vmatpush.bf16.msra.mxu3 %v3573_v10  ;;  %v3854_v49 = vld [vmem:[%s4346_s22 + $0x34] sm:$0xf0]  ;;  %v3852_v50 = vld [vmem:[%s4346_s22 + $0x2c] sm:$0xf]  ;;  %v3134_v51 = vld [vmem:[%s4346_s22 + $0x38] sm:$0xf0]  ;;  %v4574_v53 = vor.u32 %v3851_v46, %v3126_v47 }
  0x44   : > { %945 = vmatpush.bf16.msra.mxu0 %v3373_v16  ;;  %v4576_v54 = vor.u32 %v3854_v49, %v3132_v48  ;;  %v4578_v55 = vor.u32 %v3852_v50, %v3134_v51  ;;  %v3140_v56 = vld [vmem:[%s4346_s22 + $0x40] sm:$0xf]  ;;  %v3857_v57 = vld [vmem:[%s4346_s22 + $0x4c] sm:$0xf0]  ;;  %v3855_v58 = vld [vmem:[%s4346_s22 + $0x44] sm:$0xf] }
  0x45   : > { %1034 = vmatpush.bf16.msra.mxu1 %v3437_v17  ;;  %v3142_v59 = vld [vmem:[%s4346_s22 + $0x50] sm:$0xf0]  ;;  %v3148_v60 = vld [vmem:[%s4346_s22 + $0x48] sm:$0xf]  ;;  %v3858_v61 = vld [vmem:[%s4346_s22 + $0x54] sm:$0xf0]  ;;  %v4592_v0 = vor.u32 %v3857_v57, %v3140_v56 }
  0x46   : > { %1123 = vmatpush.bf16.msra.mxu2 %v3501_v18  ;;  %v3856_v62 = vld [vmem:[%s4346_s22 + $0x4c] sm:$0xf]  ;;  %v3150_v63 = vld [vmem:[%s4346_s22 + $0x58] sm:$0xf0]  ;;  %v4594_v1 = vor.u32 %v3855_v58, %v3142_v59  ;;  %v4596_v2 = vor.u32 %v3858_v61, %v3148_v60  ;;  %v3156_v4 = vld [vmem:[%s4346_s22 + $0x60] sm:$0xf] }
  0x47   : > { %1212 = vmatpush.bf16.msra.mxu3 %v3565_v22  ;;  %v4598_v3 = vor.u32 %v3856_v62, %v3150_v63  ;;  %v3861_v5 = vld [vmem:[%s4346_s22 + $0x6c] sm:$0xf0]  ;;  %v3859_v6 = vld [vmem:[%s4346_s22 + $0x64] sm:$0xf]  ;;  %v3158_v7 = vld [vmem:[%s4346_s22 + $0x70] sm:$0xf0] }
  0x48   : > { %946 = vmatpush.bf16.msra.mxu0 %v3365_v28  ;;  %v3164_v8 = vld [vmem:[%s4346_s22 + $0x68] sm:$0xf]  ;;  %v3862_v9 = vld [vmem:[%s4346_s22 + $0x74] sm:$0xf0]  ;;  %v3860_v10 = vld [vmem:[%s4346_s22 + $0x6c] sm:$0xf]  ;;  %v4612_v12 = vor.u32 %v3861_v5, %v3156_v4  ;;  %v4614_v13 = vor.u32 %v3859_v6, %v3158_v7 }
  0x49   : > { %1035 = vmatpush.bf16.msra.mxu1 %v3429_v32  ;;  %v3166_v11 = vld [vmem:[%s4346_s22 + $0x78] sm:$0xf0]  ;;  %v4616_v14 = vor.u32 %v3862_v9, %v3164_v8  ;;  %v3172_v16 = vld [vmem:[%s4346_s22 + $0x80] sm:$0xf]  ;;  %v3865_v17 = vld [vmem:[%s4346_s22 + $0x8c] sm:$0xf0] }
  0x4a   : > { %1124 = vmatpush.bf16.msra.mxu2 %v3493_v33  ;;  %v4618_v15 = vor.u32 %v3860_v10, %v3166_v11  ;;  %v3863_v18 = vld [vmem:[%s4346_s22 + $0x84] sm:$0xf]  ;;  %v3174_v19 = vld [vmem:[%s4346_s22 + $0x90] sm:$0xf0]  ;;  %v3180_v20 = vld [vmem:[%s4346_s22 + $0x88] sm:$0xf]  ;;  %v4632_v24 = vor.u32 %v3865_v17, %v3172_v16 }
  0x4b   : > { %1213 = vmatpush.bf16.msra.mxu3 %v3557_v37  ;;  %947 = vmatmul.bf16.vlgmr.msra.gmra.mxu0 %v4552_v40  ;;  %v3866_v21 = vld [vmem:[%s4346_s22 + $0x94] sm:$0xf0]  ;;  %v3864_v22 = vld [vmem:[%s4346_s22 + $0x8c] sm:$0xf]  ;;  %v3182_v23 = vld [vmem:[%s4346_s22 + $0x98] sm:$0xf0]  ;;  %v4634_v25 = vor.u32 %v3863_v18, %v3174_v19 }
  0x4c   : > { %1036 = vmatmul.bf16.vlgmr.msra.gmra.mxu1 %v4554_v41  ;;  %v4636_v26 = vor.u32 %v3866_v21, %v3180_v20  ;;  %v4638_v27 = vor.u32 %v3864_v22, %v3182_v23  ;;  %v3188_v28 = vld [vmem:[%s4346_s22 + $0xa0] sm:$0xf]  ;;  %v3869_v29 = vld [vmem:[%s4346_s22 + $0xac] sm:$0xf0]  ;;  %v3867_v30 = vld [vmem:[%s4346_s22 + $0xa4] sm:$0xf] }
  0x4d   : > { %1125 = vmatmul.bf16.vlgmr.msra.gmra.mxu2 %v4556_v42  ;;  %v3190_v31 = vld [vmem:[%s4346_s22 + $0xb0] sm:$0xf0]  ;;  %v3196_v32 = vld [vmem:[%s4346_s22 + $0xa8] sm:$0xf]  ;;  %v3870_v33 = vld [vmem:[%s4346_s22 + $0xb4] sm:$0xf0]  ;;  %v4652_v36 = vor.u32 %v3869_v29, %v3188_v28 }
  0x4e   : > { %1214 = vmatmul.bf16.vlgmr.msra.gmra.mxu3 %v4558_v43  ;;  %v3868_v34 = vld [vmem:[%s4346_s22 + $0xac] sm:$0xf]  ;;  %v3198_v35 = vld [vmem:[%s4346_s22 + $0xb8] sm:$0xf0]  ;;  %v4654_v37 = vor.u32 %v3867_v30, %v3190_v31  ;;  %v4656_v38 = vor.u32 %v3870_v33, %v3196_v32  ;;  %v3204_v44 = vld [vmem:[%s4346_s22 + $0xc0] sm:$0xf] }
  0x4f   : > { %v4658_v39 = vor.u32 %v3868_v34, %v3198_v35  ;;  %v3873_v45 = vld [vmem:[%s4346_s22 + $0xcc] sm:$0xf0]  ;;  %v3871_v46 = vld [vmem:[%s4346_s22 + $0xc4] sm:$0xf]  ;;  %v3206_v47 = vld [vmem:[%s4346_s22 + $0xd0] sm:$0xf0] }
  0x50   : > { %v3212_v48 = vld [vmem:[%s4346_s22 + $0xc8] sm:$0xf]  ;;  %v3874_v49 = vld [vmem:[%s4346_s22 + $0xd4] sm:$0xf0]  ;;  %v3872_v50 = vld [vmem:[%s4346_s22 + $0xcc] sm:$0xf]  ;;  %v4672_v56 = vor.u32 %v3873_v45, %v3204_v44  ;;  %v4674_v57 = vor.u32 %v3871_v46, %v3206_v47 }
  0x51   : > { %v3214_v51 = vld [vmem:[%s4346_s22 + $0xd8] sm:$0xf0]  ;;  %v4676_v58 = vor.u32 %v3874_v49, %v3212_v48  ;;  %v3220_v60 = vld [vmem:[%s4346_s22 + $0xe0] sm:$0xf]  ;;  %v3877_v61 = vld [vmem:[%s4346_s22 + $0xec] sm:$0xf0] }
  0x52   : > { %v4678_v59 = vor.u32 %v3872_v50, %v3214_v51  ;;  %v3875_v62 = vld [vmem:[%s4346_s22 + $0xe4] sm:$0xf]  ;;  %v3222_v63 = vld [vmem:[%s4346_s22 + $0xf0] sm:$0xf0]  ;;  %v3228_v4 = vld [vmem:[%s4346_s22 + $0xe8] sm:$0xf]  ;;  %v4692_v8 = vor.u32 %v3877_v61, %v3220_v60 }
  0x53   : > { %v3878_v5 = vld [vmem:[%s4346_s22 + $0xf4] sm:$0xf0]  ;;  %v3876_v6 = vld [vmem:[%s4346_s22 + $0xec] sm:$0xf]  ;;  %v3230_v7 = vld [vmem:[%s4346_s22 + $0xf8] sm:$0xf0]  ;;  %v4694_v9 = vor.u32 %v3875_v62, %v3222_v63 }
  0x54   : > { %v4696_v10 = vor.u32 %v3878_v5, %v3228_v4  ;;  %v4698_v11 = vor.u32 %v3876_v6, %v3230_v7  ;;  %v3236_v16 = vld [vmem:[%s4346_s22 + $0x100] sm:$0xf]  ;;  %v3881_v17 = vld [vmem:[%s4346_s22 + $0x10c] sm:$0xf0]  ;;  %v3879_v18 = vld [vmem:[%s4346_s22 + $0x104] sm:$0xf] }
  0x55   : > { %v3238_v19 = vld [vmem:[%s4346_s22 + $0x110] sm:$0xf0]  ;;  %v3244_v20 = vld [vmem:[%s4346_s22 + $0x108] sm:$0xf]  ;;  %v3882_v21 = vld [vmem:[%s4346_s22 + $0x114] sm:$0xf0]  ;;  %v4712_v28 = vor.u32 %v3881_v17, %v3236_v16 }
  0x56   : > { %v3880_v22 = vld [vmem:[%s4346_s22 + $0x10c] sm:$0xf]  ;;  %v3246_v23 = vld [vmem:[%s4346_s22 + $0x118] sm:$0xf0]  ;;  %v4714_v30 = vor.u32 %v3879_v18, %v3238_v19  ;;  %v4716_v31 = vor.u32 %v3882_v21, %v3244_v20  ;;  %v3957_v35 = vld [vmem:[%s5955_s1 + $0x174] sm:$0xf] }
  0x57   : > { %v4718_v33 = vor.u32 %v3880_v22, %v3246_v23  ;;  %v3550_v44 = vld [vmem:[%s5955_s1 + $0x178] sm:$0xf0]  ;;  %v3973_v61 = vld [vmem:[%s5955_s1 + $0x1f4] sm:$0xf]  ;;  %v3252_v16 = vld [vmem:[%s4346_s22 + $0x120] sm:$0xf] }
  0x58   : > { %v3553_v45 = vor.u32 %v3957_v35, %v3550_v44  ;;  %v3614_v62 = vld [vmem:[%s5955_s1 + $0x1f8] sm:$0xf0]  ;;  %v3925_v63 = vld [vmem:[%s5955_s1 + $0x74] sm:$0xf]  ;;  %v3885_v17 = vld [vmem:[%s4346_s22 + $0x12c] sm:$0xf0] }
  0x59   : > { %v3617_v4 = vor.u32 %v3973_v61, %v3614_v62  ;;  %v3422_v5 = vld [vmem:[%s5955_s1 + $0x78] sm:$0xf0]  ;;  %v3941_v6 = vld [vmem:[%s5955_s1 + $0xf4] sm:$0xf]  ;;  %v3883_v18 = vld [vmem:[%s4346_s22 + $0x124] sm:$0xf]  ;;  %v4758_v35 = vor.u32 %v3885_v17, %v3252_v16 }
  0x5a   : > { %1473 = vmatpush.bf16.msrb.mxu2 %v3553_v45  ;;  %v3486_v7 = vld [vmem:[%s5955_s1 + $0xf8] sm:$0xf0]  ;;  %v3425_v19 = vor.u32 %v3925_v63, %v3422_v5  ;;  %v3254_v21 = vld [vmem:[%s4346_s22 + $0x130] sm:$0xf0]  ;;  %v3260_v22 = vld [vmem:[%s4346_s22 + $0x128] sm:$0xf] }
  0x5b   : > { %952 = vmatmul.bf16.gmra.mxu0 %v4572_v52  ;;  %v3489_v20 = vor.u32 %v3941_v6, %v3486_v7  ;;  %v3886_v23 = vld [vmem:[%s4346_s22 + $0x134] sm:$0xf0]  ;;  %1562 = vmatpush.bf16.msrb.mxu3 %v3617_v4  ;;  %v3268_v17 = vld [vmem:[%s4346_s22 + $0x140] sm:$0xf]  ;;  %vm2135_vm1 = vcmask 523264   ;;  %s3103_s27 = sshll.u32 %s3093_s13, 1 }
  0x5c   : > { %1041 = vmatmul.bf16.gmra.mxu1 %v4574_v53  ;;  %1295 = vmatpush.bf16.msrb.mxu0 %v3425_v19  ;;  %v3887_v19 = vld [vmem:[%s4346_s22 + $0x144] sm:$0xf]  ;;  %p165_p6 = scmp.lt.s32.totalorder %s3103_s27, 7 }
  0x5d   : > { %1130 = vmatmul.bf16.gmra.mxu2 %v4576_v54  ;;  %1384 = vmatpush.bf16.msrb.mxu1 %v3489_v20  ;;  %v3270_v20 = vld [vmem:[%s4346_s22 + $0x150] sm:$0xf0] }
  0x5e   : > { %1219 = vmatmul.bf16.gmra.mxu3 %v4578_v55  ;;  %s6043_s27 = smov (!%p165_p6, %s3103_s27), 7 }
  0x5f   : > { %s3846_s28 = sshll.u32 %s6043_s27, 7 }
  0x60   : > { %s5829_s3 = scalar_lea.vmem %s5956_s2, %s3846_s28 }
  0x6b   : > { %957 = vmatmul.bf16.gmra.mxu0 %v4592_v0 }
  0x6c   : > { %1046 = vmatmul.bf16.gmra.mxu1 %v4594_v1 }
  0x6d   : > { %1135 = vmatmul.bf16.gmra.mxu2 %v4596_v2 }
  0x6e   : > { %1224 = vmatmul.bf16.gmra.mxu3 %v4598_v3 }
  0x7b   : > { %962 = vmatmul.bf16.gmra.mxu0 %v4612_v12 }
  0x7c   : > { %1051 = vmatmul.bf16.gmra.mxu1 %v4614_v13 }
  0x7d   : > { %1140 = vmatmul.bf16.gmra.mxu2 %v4616_v14 }
  0x7e   : > { %1229 = vmatmul.bf16.gmra.mxu3 %v4618_v15 }
  0x8b   : > { %967 = vmatmul.bf16.gmra.mxu0 %v4632_v24 }
  0x8c   : > { %1056 = vmatmul.bf16.gmra.mxu1 %v4634_v25 }
  0x8d   : > { %1145 = vmatmul.bf16.gmra.mxu2 %v4636_v26 }
  0x8e   : > { %1234 = vmatmul.bf16.gmra.mxu3 %v4638_v27 }
  0x9b   : > { %972 = vmatmul.bf16.gmra.mxu0 %v4652_v36 }
  0x9c   : > { %1061 = vmatmul.bf16.gmra.mxu1 %v4654_v37 }
  0x9d   : > { %1150 = vmatmul.bf16.gmra.mxu2 %v4656_v38 }
  0x9e   : > { %1239 = vmatmul.bf16.gmra.mxu3 %v4658_v39 }
  0xab   : > { %977 = vmatmul.bf16.gmra.mxu0 %v4672_v56 }
  0xac   : > { %1066 = vmatmul.bf16.gmra.mxu1 %v4674_v57 }
  0xad   : > { %1155 = vmatmul.bf16.gmra.mxu2 %v4676_v58 }
  0xae   : > { %1244 = vmatmul.bf16.gmra.mxu3 %v4678_v59 }
  0xbb   : > { %982 = vmatmul.bf16.gmra.mxu0 %v4692_v8 }
  0xbc   : > { %1071 = vmatmul.bf16.gmra.mxu1 %v4694_v9 }
  0xbd   : > { %1160 = vmatmul.bf16.gmra.mxu2 %v4696_v10 }
  0xbe   : > { %1249 = vmatmul.bf16.gmra.mxu3 %v4698_v11 }
  0xc8   : > { %v948_v29 = vpop.f32.mrf.mxu0 }
  0xc9   : > { %v1037_v32 = vpop.f32.mrf.mxu1 }
  0xca   : > { %v1038_v34 = vadd.f32 %v1037_v32, %v948_v29  ;;  %v3884_v29 = vld [vmem:[%s4346_s22 + $0x12c] sm:$0xf]  ;;  %v3262_v32 = vld [vmem:[%s4346_s22 + $0x138] sm:$0xf0] }
  0xcb   : > { %987 = vmatmul.bf16.gmra.mxu0 %v4712_v28 }
  0xcc   : > { %1076 = vmatmul.bf16.gmra.mxu1 %v4714_v30 }
  0xcd   : > { %1165 = vmatmul.bf16.gmra.mxu2 %v4716_v31 }
  0xce   : > { %1254 = vmatmul.bf16.gmra.mxu3 %v4718_v33 }
  0xd0   : > { %v1126_v46 = vpop.f32.mrf.mxu2  ;;  %v950_v49 = vpop.f32.mrf.mxu0 }
  0xd1   : > { %v1127_v47 = vadd.f32 %v1126_v46, %v1038_v34  ;;  %v1215_v48 = vpop.f32.mrf.mxu3  ;;  %v1039_v50 = vpop.f32.mrf.mxu1 }
  0xd2   : > { %v1040_v60 = vadd.f32 %v1039_v50, %v950_v49  ;;  %v4764_v50 = vor.u32 %v3884_v29, %v3262_v32  ;;  %v3278_v29 = vld [vmem:[%s4346_s22 + $0x158] sm:$0xf0] }
  0xd3   : > { %v4730_v51 = vadd.f32 %v1215_v48, %v1127_v47  ;;  %v4760_v47 = vor.u32 %v3883_v18, %v3254_v21  ;;  %v4762_v48 = vor.u32 %v3886_v23, %v3260_v22  ;;  %v3889_v18 = vld [vmem:[%s4346_s22 + $0x14c] sm:$0xf0]  ;;  %v3276_v21 = vld [vmem:[%s4346_s22 + $0x148] sm:$0xf]  ;;  %v3890_v22 = vld [vmem:[%s4346_s22 + $0x154] sm:$0xf0] }
  0xd4   : > { %5982 = vst [vmem:[#allocation10_spill] sm:$0xff] %v4764_v50  ;;  %v3888_v23 = vld [vmem:[%s4346_s22 + $0x14c] sm:$0xf] }
  0xd5   : > { %5980 = vst [vmem:[#allocation8_spill] sm:$0xff] %v4760_v47 }
  0xd6   : > { %5981 = vst [vmem:[#allocation9_spill] sm:$0xff] %v4762_v48 }
  0xd8   : > { %v1128_v34 = vpop.f32.mrf.mxu2  ;;  %v953_v46 = vpop.f32.mrf.mxu0 }
  0xd9   : > { %v1129_v44 = vadd.f32 %v1128_v34, %v1040_v60  ;;  %v1217_v45 = vpop.f32.mrf.mxu3  ;;  %v1042_v49 = vpop.f32.mrf.mxu1  ;;  %v4782_v34 = vor.u32 %v3889_v18, %v3268_v17 }
  0xda   : > { %v1043_v62 = vadd.f32 %v1042_v49, %v953_v46  ;;  %v4784_v49 = vor.u32 %v3887_v19, %v3270_v20 }
  0xdb   : > { %v4766_v61 = vadd.f32 %v1217_v45, %v1129_v44  ;;  %992 = vmatmul.bf16.gmra.mxu0 %v4758_v35  ;;  %5984 = vst [vmem:[#allocation12_spill] sm:$0xff] %v4782_v34 }
  0xdc   : > { %1081 = vmatmul.bf16.gmra.mxu1 %v4760_v47  ;;  %5985 = vst [vmem:[#allocation13_spill] sm:$0xff] %v4784_v49 }
  0xdd   : > { %1170 = vmatmul.bf16.gmra.mxu2 %v4762_v48  ;;  %v3342_v48 = vld [vmem:[%s4346_s22 + $0x1d8] sm:$0xf0] }
  0xde   : > { %1259 = vmatmul.bf16.gmra.mxu3 %v4764_v50 }
  0xe0   : > { %v1131_v60 = vpop.f32.mrf.mxu2  ;;  %v955_v5 = vpop.f32.mrf.mxu0 }
  0xe1   : > { %v1132_v63 = vadd.f32 %v1131_v60, %v1043_v62  ;;  %v1220_v4 = vpop.f32.mrf.mxu3  ;;  %v1044_v6 = vpop.f32.mrf.mxu1  ;;  %v4786_v62 = vor.u32 %v3890_v22, %v3276_v21 }
  0xe2   : > { %v1045_v16 = vadd.f32 %v1044_v6, %v955_v5  ;;  %v3955_v6 = vld [vmem:[%s5955_s1 + $0x164] sm:$0xf] }
  0xe3   : > { %v4772_v7 = vadd.f32 %v1220_v4, %v1132_v63  ;;  %5986 = vst [vmem:[#allocation14_spill] sm:$0xff] %v4786_v62  ;;  %v4788_v63 = vor.u32 %v3888_v23, %v3278_v29 }
  0xe5   : > { %5983 = vst [vmem:[#allocation11_spill] sm:$0xff] %v4772_v7 }
  0xe6   : > { %5987 = vst [vmem:[#allocation15_spill] sm:$0xff] %v4788_v63 }
  0xe8   : > { %v1133_v32 = vpop.f32.mrf.mxu2  ;;  %v958_v46 = vpop.f32.mrf.mxu0 }
  0xe9   : > { %v1134_v44 = vadd.f32 %v1133_v32, %v1045_v16  ;;  %v1222_v45 = vpop.f32.mrf.mxu3  ;;  %v1047_v60 = vpop.f32.mrf.mxu1  ;;  %v3542_v16 = vld [vmem:[%s5955_s1 + $0x168] sm:$0xf0]  ;;  %v3971_v32 = vld [vmem:[%s5955_s1 + $0x1e4] sm:$0xf] }
  0xea   : > { %v1048_v5 = vadd.f32 %v1047_v60, %v958_v46  ;;  %v3545_v17 = vor.u32 %v3955_v6, %v3542_v16  ;;  %v3414_v60 = vld [vmem:[%s5955_s1 + $0x68] sm:$0xf0]  ;;  %v3284_v16 = vld [vmem:[%s4346_s22 + $0x160] sm:$0xf] }
  0xeb   : > { %v4790_v4 = vadd.f32 %v1222_v45, %v1134_v44  ;;  %997 = vmatmul.bf16.gmra.mxu0 %v4782_v34  ;;  %v3606_v44 = vld [vmem:[%s5955_s1 + $0x1e8] sm:$0xf0]  ;;  %v3923_v45 = vld [vmem:[%s5955_s1 + $0x64] sm:$0xf] }
  0xec   : > { %1086 = vmatmul.bf16.gmra.mxu1 %v4784_v49  ;;  %1474 = vmatpush.bf16.msrb.mxu2 %v3545_v17  ;;  %v3609_v46 = vor.u32 %v3971_v32, %v3606_v44  ;;  %v3478_v6 = vld [vmem:[%s5955_s1 + $0xe8] sm:$0xf0]  ;;  %v3893_v17 = vld [vmem:[%s4346_s22 + $0x16c] sm:$0xf0]  ;;  %v3894_v32 = vld [vmem:[%s4346_s22 + $0x174] sm:$0xf0] }
  0xed   : > { %5988 = vst [vmem:[#allocation16_spill] sm:$0xff] %v4790_v4  ;;  %1175 = vmatmul.bf16.gmra.mxu2 %v4786_v62  ;;  %v3892_v44 = vld [vmem:[%s4346_s22 + $0x16c] sm:$0xf]  ;;  %v4830_v62 = vor.u32 %v3893_v17, %v3284_v16  ;;  %v3300_v16 = vld [vmem:[%s4346_s22 + $0x180] sm:$0xf] }
  0xee   : > { %1264 = vmatmul.bf16.gmra.mxu3 %v4788_v63  ;;  %v3897_v17 = vld [vmem:[%s4346_s22 + $0x18c] sm:$0xf0] }
  0xef   : > { %1563 = vmatpush.bf16.msrb.mxu3 %v3609_v46  ;;  %5990 = vst [vmem:[#allocation18_spill] sm:$0xff] %v4830_v62 }
  0xf0   : > { %v1136_v18 = vpop.f32.mrf.mxu2  ;;  %v960_v21 = vpop.f32.mrf.mxu0 }
  0xf1   : > { %v1137_v19 = vadd.f32 %v1136_v18, %v1048_v5  ;;  %v1225_v20 = vpop.f32.mrf.mxu3  ;;  %v1049_v22 = vpop.f32.mrf.mxu1  ;;  %v3939_v5 = vld [vmem:[%s5955_s1 + $0xe4] sm:$0xf] }
  0xf2   : > { %v1050_v29 = vadd.f32 %v1049_v22, %v960_v21  ;;  %v3891_v18 = vld [vmem:[%s4346_s22 + $0x164] sm:$0xf]  ;;  %v3286_v21 = vld [vmem:[%s4346_s22 + $0x170] sm:$0xf0]  ;;  %v3292_v22 = vld [vmem:[%s4346_s22 + $0x168] sm:$0xf] }
  0xf3   : > { %v4802_v23 = vadd.f32 %v1225_v20, %v1137_v19  ;;  %v3417_v19 = vor.u32 %v3923_v45, %v3414_v60  ;;  %v3481_v20 = vor.u32 %v3939_v5, %v3478_v6  ;;  %v4832_v7 = vor.u32 %v3891_v18, %v3286_v21  ;;  %v3895_v18 = vld [vmem:[%s4346_s22 + $0x184] sm:$0xf]  ;;  %v3898_v21 = vld [vmem:[%s4346_s22 + $0x194] sm:$0xf0] }
  0xf4   : > { %v4834_v50 = vor.u32 %v3894_v32, %v3292_v22  ;;  %v3896_v22 = vld [vmem:[%s4346_s22 + $0x18c] sm:$0xf]  ;;  %v3310_v32 = vld [vmem:[%s4346_s22 + $0x198] sm:$0xf0] }
  0xf5   : > { %5989 = vst [vmem:[#allocation17_spill] sm:$0xff] %v4802_v23  ;;  %v3294_v23 = vld [vmem:[%s4346_s22 + $0x178] sm:$0xf0]  ;;  %1296 = vmatpush.bf16.msrb.mxu0 %v3417_v19  ;;  %1385 = vmatpush.bf16.msrb.mxu1 %v3481_v20  ;;  %v3302_v19 = vld [vmem:[%s4346_s22 + $0x190] sm:$0xf0] }
  0xf6   : > { %5991 = vst [vmem:[#allocation19_spill] sm:$0xff] %v4832_v7  ;;  %v4836_v60 = vor.u32 %v3892_v44, %v3294_v23  ;;  %v3308_v20 = vld [vmem:[%s4346_s22 + $0x188] sm:$0xf] }
  0xf7   : > { %5992 = vst [vmem:[#allocation20_spill] sm:$0xff] %v4834_v50 }
  0xf8   : > { %v1138_v63 = vpop.f32.mrf.mxu2  ;;  %v963_v34 = vpop.f32.mrf.mxu0  ;;  %5993 = vst [vmem:[#allocation21_spill] sm:$0xff] %v4836_v60 }
  0xf9   : > { %v1139_v49 = vadd.f32 %v1138_v63, %v1050_v29  ;;  %v1227_v4 = vpop.f32.mrf.mxu3  ;;  %v1052_v45 = vpop.f32.mrf.mxu1 }
  0xfa   : > { %v1053_v5 = vadd.f32 %v1052_v45, %v963_v34  ;;  %v4854_v45 = vor.u32 %v3897_v17, %v3300_v16  ;;  %v3534_v16 = vld [vmem:[%s5955_s1 + $0x158] sm:$0xf0] }
  0xfb   : > { %v4838_v46 = vadd.f32 %v1227_v4, %v1139_v49  ;;  %1002 = vmatmul.bf16.gmra.mxu0 %v4830_v62  ;;  %v3904_v62 = vld [vmem:[%s4346_s22 + $0x1cc] sm:$0xf] }
  0xfc   : > { %1091 = vmatmul.bf16.gmra.mxu1 %v4832_v7  ;;  %5996 = vst [vmem:[#allocation24_spill] sm:$0xff] %v4854_v45  ;;  %v4858_v7 = vor.u32 %v3898_v21, %v3308_v20 }
  0xfd   : > { %5994 = vst [vmem:[#allocation22_spill] sm:$0xff] %v4838_v46  ;;  %1180 = vmatmul.bf16.gmra.mxu2 %v4834_v50 }
  0xfe   : > { %1269 = vmatmul.bf16.gmra.mxu3 %v4836_v60  ;;  %5998 = vst [vmem:[#allocation26_spill] sm:$0xff] %v4858_v7 }
 0x100   : > { %v1141_v63 = vpop.f32.mrf.mxu2  ;;  %v965_v6 = vpop.f32.mrf.mxu0 }
 0x101   : > { %v1142_v23 = vadd.f32 %v1141_v63, %v1053_v5  ;;  %v1230_v29 = vpop.f32.mrf.mxu3  ;;  %v1054_v49 = vpop.f32.mrf.mxu1  ;;  %v4856_v63 = vor.u32 %v3895_v18, %v3302_v19 }
 0x102   : > { %v1055_v34 = vadd.f32 %v1054_v49, %v965_v6 }
 0x103   : > { %v4844_v4 = vadd.f32 %v1230_v29, %v1142_v23  ;;  %5997 = vst [vmem:[#allocation25_spill] sm:$0xff] %v4856_v63  ;;  %v4860_v29 = vor.u32 %v3896_v22, %v3310_v32  ;;  %v3969_v32 = vld [vmem:[%s5955_s1 + $0x1d4] sm:$0xf] }
 0x105   : > { %5995 = vst [vmem:[#allocation23_spill] sm:$0xff] %v4844_v4  ;;  %v3526_v4 = vld [vmem:[%s5955_s1 + $0x148] sm:$0xf0] }
 0x106   : > { %5999 = vst [vmem:[#allocation27_spill] sm:$0xff] %v4860_v29 }
 0x108   : > { %v1143_v44 = vpop.f32.mrf.mxu2  ;;  %v968_v5 = vpop.f32.mrf.mxu0 }
 0x109   : > { %v1144_v60 = vadd.f32 %v1143_v44, %v1055_v34  ;;  %v1232_v50 = vpop.f32.mrf.mxu3  ;;  %v1057_v23 = vpop.f32.mrf.mxu1  ;;  %v3953_v34 = vld [vmem:[%s5955_s1 + $0x154] sm:$0xf]  ;;  %v3598_v44 = vld [vmem:[%s5955_s1 + $0x1d8] sm:$0xf0] }
 0x10a   : > { %v1058_v49 = vadd.f32 %v1057_v23, %v968_v5  ;;  %v3537_v17 = vor.u32 %v3953_v34, %v3534_v16  ;;  %v3921_v5 = vld [vmem:[%s5955_s1 + $0x54] sm:$0xf]  ;;  %v3601_v23 = vor.u32 %v3969_v32, %v3598_v44  ;;  %v3470_v16 = vld [vmem:[%s5955_s1 + $0xd8] sm:$0xf0]  ;;  %v3902_v32 = vld [vmem:[%s4346_s22 + $0x1b4] sm:$0xf0] }
 0x10b   : > { %v4862_v6 = vadd.f32 %v1232_v50, %v1144_v60  ;;  %1007 = vmatmul.bf16.gmra.mxu0 %v4854_v45  ;;  %v3937_v34 = vld [vmem:[%s5955_s1 + $0xd4] sm:$0xf]  ;;  %v3900_v44 = vld [vmem:[%s4346_s22 + $0x1ac] sm:$0xf]  ;;  %v3951_v45 = vld [vmem:[%s5955_s1 + $0x144] sm:$0xf] }
 0x10c   : > { %1096 = vmatmul.bf16.gmra.mxu1 %v4856_v63  ;;  %1475 = vmatpush.bf16.msrb.mxu2 %v3537_v17  ;;  %v3316_v17 = vld [vmem:[%s4346_s22 + $0x1a0] sm:$0xf] }
 0x10d   : > { %6000 = vst [vmem:[#allocation28_spill] sm:$0xff] %v4862_v6  ;;  %1185 = vmatmul.bf16.gmra.mxu2 %v4858_v7  ;;  %1564 = vmatpush.bf16.msrb.mxu3 %v3601_v23  ;;  %v3919_v6 = vld [vmem:[%s5955_s1 + $0x44] sm:$0xf] }
 0x10e   : > { %1274 = vmatmul.bf16.gmra.mxu3 %v4860_v29  ;;  %v3326_v29 = vld [vmem:[%s4346_s22 + $0x1b8] sm:$0xf0] }
 0x110   : > { %v1146_v50 = vpop.f32.mrf.mxu2  ;;  %v970_v19 = vpop.f32.mrf.mxu0 }
 0x111   : > { %v1147_v60 = vadd.f32 %v1146_v50, %v1058_v49  ;;  %v1235_v18 = vpop.f32.mrf.mxu3  ;;  %v1059_v20 = vpop.f32.mrf.mxu1  ;;  %v3406_v49 = vld [vmem:[%s5955_s1 + $0x58] sm:$0xf0]  ;;  %v3901_v50 = vld [vmem:[%s4346_s22 + $0x1ac] sm:$0xf0] }
 0x112   : > { %v1060_v22 = vadd.f32 %v1059_v20, %v970_v19  ;;  %v3473_v19 = vor.u32 %v3937_v34, %v3470_v16  ;;  %v3318_v20 = vld [vmem:[%s4346_s22 + $0x1b0] sm:$0xf0]  ;;  %v4902_v63 = vor.u32 %v3901_v50, %v3316_v17  ;;  %v3462_v50 = vld [vmem:[%s5955_s1 + $0xc8] sm:$0xf0] }
 0x113   : > { %v4874_v21 = vadd.f32 %v1235_v18, %v1147_v60  ;;  %v3899_v60 = vld [vmem:[%s4346_s22 + $0x1a4] sm:$0xf]  ;;  %v3409_v18 = vor.u32 %v3921_v5, %v3406_v49  ;;  %v3398_v5 = vld [vmem:[%s5955_s1 + $0x48] sm:$0xf0] }
 0x114   : > { %1386 = vmatpush.bf16.msrb.mxu1 %v3473_v19  ;;  %6002 = vst [vmem:[#allocation30_spill] sm:$0xff] %v4902_v63  ;;  %v3935_v49 = vld [vmem:[%s5955_s1 + $0xc4] sm:$0xf]  ;;  %v3401_v17 = vor.u32 %v3919_v6, %v3398_v5 }
 0x115   : > { %6001 = vst [vmem:[#allocation29_spill] sm:$0xff] %v4874_v21  ;;  %v3324_v21 = vld [vmem:[%s4346_s22 + $0x1a8] sm:$0xf]  ;;  %1297 = vmatpush.bf16.msrb.mxu0 %v3409_v18  ;;  %v4913_v18 = vor.u32 %v3899_v60, %v3318_v20  ;;  %v3465_v60 = vor.u32 %v3935_v49, %v3462_v50  ;;  %v3529_v20 = vor.u32 %v3951_v45, %v3526_v4  ;;  %v3967_v6 = vld [vmem:[%s5955_s1 + $0x1c4] sm:$0xf] }
 0x116   : > { %v4915_v19 = vor.u32 %v3902_v32, %v3324_v21  ;;  %v3590_v21 = vld [vmem:[%s5955_s1 + $0x1c8] sm:$0xf0]  ;;  %v3917_v4 = vld [vmem:[%s5955_s1 + $0x34] sm:$0xf]  ;;  %v3390_v45 = vld [vmem:[%s5955_s1 + $0x38] sm:$0xf0] }
 0x117   : > { %6003 = vst [vmem:[#allocation31_spill] sm:$0xff] %v4913_v18  ;;  %v3593_v46 = vor.u32 %v3967_v6, %v3590_v21  ;;  %1476 = vmatpush.bf16.msrb.mxu2 %v3529_v20  ;;  %v3393_v49 = vor.u32 %v3917_v4, %v3390_v45  ;;  %v3382_v20 = vld [vmem:[%s5955_s1 + $0x28] sm:$0xf0] }
 0x118   : > { %v1148_v7 = vpop.f32.mrf.mxu2  ;;  %v973_v16 = vpop.f32.mrf.mxu0  ;;  %6004 = vst [vmem:[#allocation32_spill] sm:$0xff] %v4915_v19  ;;  %1387 = vmatpush.bf16.msrb.mxu1 %v3465_v60  ;;  %v3915_v60 = vld [vmem:[%s5955_s1 + $0x24] sm:$0xf] }
 0x119   : > { %v1149_v23 = vadd.f32 %v1148_v7, %v1060_v22  ;;  %v1237_v34 = vpop.f32.mrf.mxu3  ;;  %v1062_v7 = vpop.f32.mrf.mxu1  ;;  %v4926_v22 = vor.u32 %v3900_v44, %v3326_v29  ;;  %1298 = vmatpush.bf16.msrb.mxu0 %v3401_v17  ;;  %v3933_v29 = vld [vmem:[%s5955_s1 + $0xb4] sm:$0xf]  ;;  %v3454_v44 = vld [vmem:[%s5955_s1 + $0xb8] sm:$0xf0]  ;;  %1565 = vmatpush.bf16.msrb.mxu3 %v3593_v46 }
 0x11a   : > { %v1063_v5 = vadd.f32 %v1062_v7, %v973_v16  ;;  %v3518_v16 = vld [vmem:[%s5955_s1 + $0x138] sm:$0xf0]  ;;  %v3965_v17 = vld [vmem:[%s5955_s1 + $0x1b4] sm:$0xf] }
 0x11b   : > { %6005 = vst [vmem:[#allocation33_spill] sm:$0xff] %v4926_v22  ;;  %v4934_v32 = vadd.f32 %v1237_v34, %v1149_v23  ;;  %1012 = vmatmul.bf16.gmra.mxu0 %v4902_v63  ;;  %v3457_v23 = vor.u32 %v3933_v29, %v3454_v44  ;;  %v3949_v34 = vld [vmem:[%s5955_s1 + $0x134] sm:$0xf]  ;;  %v3582_v46 = vld [vmem:[%s5955_s1 + $0x1b8] sm:$0xf0]  ;;  %v3385_v29 = vor.u32 %v3915_v60, %v3382_v20 }
 0x11c   : > { %1101 = vmatmul.bf16.gmra.mxu1 %v4913_v18  ;;  %v3521_v7 = vor.u32 %v3949_v34, %v3518_v16  ;;  %v3585_v45 = vor.u32 %v3965_v17, %v3582_v46  ;;  %v3931_v44 = vld [vmem:[%s5955_s1 + $0xa4] sm:$0xf]  ;;  %v3446_v34 = vld [vmem:[%s5955_s1 + $0xa8] sm:$0xf0]  ;;  %v3332_v20 = vld [vmem:[%s4346_s22 + $0x1c0] sm:$0xf] }
 0x11d   : > { %6006 = vst [vmem:[#allocation34_spill] sm:$0xff] %v4934_v32  ;;  %1190 = vmatmul.bf16.gmra.mxu2 %v4915_v19  ;;  %1299 = vmatpush.bf16.msrb.mxu0 %v3393_v49  ;;  %v3510_v49 = vld [vmem:[%s5955_s1 + $0x128] sm:$0xf0]  ;;  %v3374_v19 = vld [vmem:[%s5955_s1 + $0x18] sm:$0xf0] }
 0x11e   : > { %1279 = vmatmul.bf16.gmra.mxu3 %v4926_v22  ;;  %1388 = vmatpush.bf16.msrb.mxu1 %v3457_v23  ;;  %v3963_v23 = vld [vmem:[%s5955_s1 + $0x1a4] sm:$0xf]  ;;  %v3574_v17 = vld [vmem:[%s5955_s1 + $0x1a8] sm:$0xf0]  ;;  %v3905_v22 = vld [vmem:[%s4346_s22 + $0x1cc] sm:$0xf0] }
 0x11f   : > { %1477 = vmatpush.bf16.msrb.mxu2 %v3521_v7  ;;  %1566 = vmatpush.bf16.msrb.mxu3 %v3585_v45  ;;  %v3502_v45 = vld [vmem:[%s5955_s1 + $0x118] sm:$0xf0]  ;;  %v3340_v18 = vld [vmem:[%s4346_s22 + $0x1c8] sm:$0xf]  ;;  %v3906_v32 = vld [vmem:[%s4346_s22 + $0x1d4] sm:$0xf0] }
 0x120   : > { %v1151_v50 = vpop.f32.mrf.mxu2  ;;  %v975_v4 = vpop.f32.mrf.mxu0 }
 0x121   : > { %v1152_v6 = vadd.f32 %v1151_v50, %v1063_v5  ;;  %v1240_v21 = vpop.f32.mrf.mxu3  ;;  %v3947_v5 = vld [vmem:[%s5955_s1 + $0x124] sm:$0xf]  ;;  %v1064_v16 = vpop.f32.mrf.mxu1  ;;  %v3449_v50 = vor.u32 %v3931_v44, %v3446_v34  ;;  %v3577_v44 = vor.u32 %v3963_v23, %v3574_v17  ;;  %v3913_v34 = vld [vmem:[%s5955_s1 + $0x14] sm:$0xf]  ;;  %1300 = vmatpush.bf16.msrb.mxu0 %v3385_v29  ;;  %v3566_v17 = vld [vmem:[%s5955_s1 + $0x198] sm:$0xf0] }
 0x122   : > { %v1065_v60 = vadd.f32 %v1064_v16, %v975_v4  ;;  %v3513_v7 = vor.u32 %v3947_v5, %v3510_v49  ;;  %v3945_v4 = vld [vmem:[%s5955_s1 + $0x114] sm:$0xf]  ;;  %v3903_v5 = vld [vmem:[%s4346_s22 + $0x1c4] sm:$0xf]  ;;  %v3377_v16 = vor.u32 %v3913_v34, %v3374_v19  ;;  %v5022_v19 = vor.u32 %v3905_v22, %v3332_v20  ;;  %v3430_v22 = vld [vmem:[%s5955_s1 + $0x88] sm:$0xf0] }
 0x123   : > { %v4988_v46 = vadd.f32 %v1240_v21, %v1152_v6  ;;  %v3929_v6 = vld [vmem:[%s5955_s1 + $0x94] sm:$0xf]  ;;  %v3438_v21 = vld [vmem:[%s5955_s1 + $0x98] sm:$0xf0]  ;;  %1389 = vmatpush.bf16.msrb.mxu1 %v3449_v50  ;;  %v3505_v63 = vor.u32 %v3945_v4, %v3502_v45  ;;  %1567 = vmatpush.bf16.msrb.mxu3 %v3577_v44  ;;  %v3911_v34 = vld [vmem:[%s5955_s1 + $0x4] sm:$0xf] }
 0x124   : > { %v3441_v49 = vor.u32 %v3929_v6, %v3438_v21  ;;  %v3961_v23 = vld [vmem:[%s5955_s1 + $0x194] sm:$0xf]  ;;  %1478 = vmatpush.bf16.msrb.mxu2 %v3513_v7  ;;  %v3366_v6 = vld [vmem:[%s5955_s1 + $0x8] sm:$0xf0]  ;;  %v3927_v7 = vld [vmem:[%s5955_s1 + $0x84] sm:$0xf] }
 0x125   : > { %6007 = vst [vmem:[#allocation35_spill] sm:$0xff] %v4988_v46  ;;  %v3334_v46 = vld [vmem:[%s4346_s22 + $0x1d0] sm:$0xf0]  ;;  %v3569_v29 = vor.u32 %v3961_v23, %v3566_v17  ;;  %v5035_v23 = vor.u32 %v3906_v32, %v3340_v18  ;;  %1301 = vmatpush.bf16.msrb.mxu0 %v3377_v16  ;;  %v3943_v20 = vld [vmem:[%s5955_s1 + $0x104] sm:$0xf]  ;;  %v3369_v18 = vor.u32 %v3911_v34, %v3366_v6 }
 0x126   : > { %v5033_v44 = vor.u32 %v3903_v5, %v3334_v46  ;;  %v3959_v32 = vld [vmem:[%s5955_s1 + $0x184] sm:$0xf]  ;;  %v3558_v46 = vld [vmem:[%s5955_s1 + $0x188] sm:$0xf0] }
 0x127   : > { %1390 = vmatpush.bf16.msrb.mxu1 %v3441_v49  ;;  %1568 = vmatpush.bf16.msrb.mxu3 %v3569_v29  ;;  %v3433_v49 = vor.u32 %v3927_v7, %v3430_v22  ;;  %v3907_v22 = vld [vmem:[%s4346_s22 + $0x1e4] sm:$0xf] }
 0x128   : > { %v1153_v50 = vpop.f32.mrf.mxu2  ;;  %v978_v45 = vpop.f32.mrf.mxu0  ;;  %1479 = vmatpush.bf16.msrb.mxu2 %v3505_v63 }
 0x129   : > { %v1154_v21 = vadd.f32 %v1153_v50, %v1065_v60  ;;  %v1242_v4 = vpop.f32.mrf.mxu3  ;;  %v3494_v60 = vld [vmem:[%s5955_s1 + $0x108] sm:$0xf0]  ;;  %v1067_v17 = vpop.f32.mrf.mxu1  ;;  %v5046_v50 = vor.u32 %v3904_v62, %v3342_v48  ;;  %v3561_v48 = vor.u32 %v3959_v32, %v3558_v46  ;;  %1302 = vmatpush.bf16.msrb.mxu0 %v3369_v18  ;;  %v3358_v32 = vld [vmem:[%s4346_s22 + $0x1f8] sm:$0xf0] }
 0x12a   : > { %v1068_v16 = vadd.f32 %v1067_v17, %v978_v45  ;;  %v3497_v47 = vor.u32 %v3943_v20, %v3494_v60  ;;  %v3909_v45 = vld [vmem:[%s4346_s22 + $0x1ec] sm:$0xf0]  ;;  %v3350_v20 = vld [vmem:[%s4346_s22 + $0x1f0] sm:$0xf0]  ;;  %v3356_v60 = vld [vmem:[%s4346_s22 + $0x1e8] sm:$0xf] }
 0x12b   : > { %6008 = vst [vmem:[#allocation36_spill] sm:$0xff] %v5046_v50  ;;  %v5054_v5 = vadd.f32 %v1242_v4, %v1154_v21  ;;  %1017 = vmatmul.bf16.gmra.mxu0 %v5022_v19  ;;  %1391 = vmatpush.bf16.msrb.mxu1 %v3433_v49  ;;  %v3348_v4 = vld [vmem:[%s4346_s22 + $0x1e0] sm:$0xf]  ;;  %v3910_v17 = vld [vmem:[%s4346_s22 + $0x1f4] sm:$0xf0] }
 0x12c   : > { %1106 = vmatmul.bf16.gmra.mxu1 %v5033_v44  ;;  %1480 = vmatpush.bf16.msrb.mxu2 %v3497_v47  ;;  %v3908_v18 = vld [vmem:[%s4346_s22 + $0x1ec] sm:$0xf]  ;;  %v5070_v47 = vor.u32 %v3909_v45, %v3348_v4  ;;  %s4261_s22 = smov 64  }
 0x12d   : > { %1195 = vmatmul.bf16.gmra.mxu2 %v5035_v23  ;;  %1569 = vmatpush.bf16.msrb.mxu3 %v3561_v48 }
 0x12e   : > { %1284 = vmatmul.bf16.gmra.mxu3 %v5046_v50  ;;  %v5074_v50 = vor.u32 %v3910_v17, %v3356_v60 }
 0x130   : > { %v1156_v62 = vpop.f32.mrf.mxu2  ;;  %v980_v34 = vpop.f32.mrf.mxu0 }
 0x131   : > { %v1157_v63 = vadd.f32 %v1156_v62, %v1068_v16  ;;  %v1245_v29 = vpop.f32.mrf.mxu3  ;;  %v1069_v6 = vpop.f32.mrf.mxu1  ;;  %v5072_v62 = vor.u32 %v3907_v22, %v3350_v20 }
 0x132   : > { %v1070_v21 = vadd.f32 %v1069_v6, %v980_v34 }
 0x133   : > { %v5060_v7 = vadd.f32 %v1245_v29, %v1157_v63  ;;  %v5076_v29 = vor.u32 %v3908_v18, %v3358_v32 }
 0x138   : > { %v1158_v46 = vpop.f32.mrf.mxu2  ;;  %v983_v16 = vpop.f32.mrf.mxu0 }
 0x139   : > { %v1159_v49 = vadd.f32 %v1158_v46, %v1070_v21  ;;  %v1247_v48 = vpop.f32.mrf.mxu3  ;;  %v1072_v63 = vpop.f32.mrf.mxu1 }
 0x13a   : > { %v1073_v6 = vadd.f32 %v1072_v63, %v983_v16 }
 0x13b   : > { %v5078_v34 = vadd.f32 %v1247_v48, %v1159_v49  ;;  %1022 = vmatmul.bf16.gmra.mxu0 %v5070_v47 }
 0x13c   : > { %1111 = vmatmul.bf16.gmra.mxu1 %v5072_v62 }
 0x13d   : > { %1200 = vmatmul.bf16.gmra.mxu2 %v5074_v50 }
 0x13e   : > { %1289 = vmatmul.bf16.gmra.mxu3 %v5076_v29 }
 0x140   : > { %v1161_v21 = vpop.f32.mrf.mxu2  ;;  %v985_v22 = vpop.f32.mrf.mxu0 }
 0x141   : > { %v1162_v4 = vadd.f32 %v1161_v21, %v1073_v6  ;;  %v1250_v45 = vpop.f32.mrf.mxu3  ;;  %v1074_v20 = vpop.f32.mrf.mxu1 }
 0x142   : > { %v1075_v17 = vadd.f32 %v1074_v20, %v985_v22 }
 0x143   : > { %v5084_v60 = vadd.f32 %v1250_v45, %v1162_v4 }
 0x148   : > { %v1163_v18 = vpop.f32.mrf.mxu2  ;;  %v988_v49 = vpop.f32.mrf.mxu0 }
 0x149   : > { %v1164_v32 = vadd.f32 %v1163_v18, %v1075_v17  ;;  %v1252_v46 = vpop.f32.mrf.mxu3  ;;  %v1077_v48 = vpop.f32.mrf.mxu1 }
 0x14a   : > { %v1078_v63 = vadd.f32 %v1077_v48, %v988_v49 }
 0x14b   : > { %v5086_v16 = vadd.f32 %v1252_v46, %v1164_v32  ;;  %1303 = vmatmul.bf16.vlgmr.msrb.gmra.mxu0 %v4552_v40 }
 0x14c   : > { %1392 = vmatmul.bf16.vlgmr.msrb.gmra.mxu1 %v4554_v41 }
 0x14d   : > { %1481 = vmatmul.bf16.vlgmr.msrb.gmra.mxu2 %v4556_v42 }
 0x14e   : > { %1570 = vmatmul.bf16.vlgmr.msrb.gmra.mxu3 %v4558_v43 }
 0x150   : > { %v1166_v6 = vpop.f32.mrf.mxu2  ;;  %v990_v45 = vpop.f32.mrf.mxu0 }
 0x151   : > { %v1167_v21 = vadd.f32 %v1166_v6, %v1078_v63  ;;  %v1255_v4 = vpop.f32.mrf.mxu3  ;;  %v1079_v22 = vpop.f32.mrf.mxu1 }
 0x152   : > { %v1080_v17 = vadd.f32 %v1079_v22, %v990_v45 }
 0x153   : > { %v5092_v20 = vadd.f32 %v1255_v4, %v1167_v21 }
 0x158   : > { %v1168_v18 = vpop.f32.mrf.mxu2  ;;  %v993_v49 = vpop.f32.mrf.mxu0 }
 0x159   : > { %v1169_v32 = vadd.f32 %v1168_v18, %v1080_v17  ;;  %v1257_v46 = vpop.f32.mrf.mxu3  ;;  %v1082_v48 = vpop.f32.mrf.mxu1 }
 0x15a   : > { %v1083_v41 = vadd.f32 %v1082_v48, %v993_v49 }
 0x15b   : > { %v5094_v40 = vadd.f32 %v1257_v46, %v1169_v32  ;;  %1308 = vmatmul.bf16.gmra.mxu0 %v4572_v52 }
 0x15c   : > { %1397 = vmatmul.bf16.gmra.mxu1 %v4574_v53 }
 0x15d   : > { %1486 = vmatmul.bf16.gmra.mxu2 %v4576_v54 }
 0x15e   : > { %1575 = vmatmul.bf16.gmra.mxu3 %v4578_v55 }
 0x160   : > { %v1171_v42 = vpop.f32.mrf.mxu2  ;;  %v995_v6 = vpop.f32.mrf.mxu0 }
 0x161   : > { %v1172_v43 = vadd.f32 %v1171_v42, %v1083_v41  ;;  %v1260_v63 = vpop.f32.mrf.mxu3  ;;  %v1084_v21 = vpop.f32.mrf.mxu1 }
 0x162   : > { %v1085_v45 = vadd.f32 %v1084_v21, %v995_v6 }
 0x163   : > { %v5100_v4 = vadd.f32 %v1260_v63, %v1172_v43 }
 0x168   : > { %v1173_v22 = vpop.f32.mrf.mxu2  ;;  %v998_v32 = vpop.f32.mrf.mxu0 }
 0x169   : > { %v1174_v17 = vadd.f32 %v1173_v22, %v1085_v45  ;;  %v1262_v18 = vpop.f32.mrf.mxu3  ;;  %v1087_v46 = vpop.f32.mrf.mxu1 }
 0x16a   : > { %v1088_v53 = vadd.f32 %v1087_v46, %v998_v32 }
 0x16b   : > { %v5102_v52 = vadd.f32 %v1262_v18, %v1174_v17  ;;  %1313 = vmatmul.bf16.gmra.mxu0 %v4592_v0 }
 0x16c   : > { %1402 = vmatmul.bf16.gmra.mxu1 %v4594_v1 }
 0x16d   : > { %1491 = vmatmul.bf16.gmra.mxu2 %v4596_v2 }
 0x16e   : > { %1580 = vmatmul.bf16.gmra.mxu3 %v4598_v3 }
 0x170   : > { %v1176_v54 = vpop.f32.mrf.mxu2  ;;  %v1000_v48 = vpop.f32.mrf.mxu0 }
 0x171   : > { %v1177_v55 = vadd.f32 %v1176_v54, %v1088_v53  ;;  %v1265_v49 = vpop.f32.mrf.mxu3  ;;  %v1089_v41 = vpop.f32.mrf.mxu1 }
 0x172   : > { %v1090_v43 = vadd.f32 %v1089_v41, %v1000_v48 }
 0x173   : > { %v5108_v42 = vadd.f32 %v1265_v49, %v1177_v55 }
 0x178   : > { %v1178_v63 = vpop.f32.mrf.mxu2  ;;  %v1003_v45 = vpop.f32.mrf.mxu0 }
 0x179   : > { %v1179_v6 = vadd.f32 %v1178_v63, %v1090_v43  ;;  %v1267_v21 = vpop.f32.mrf.mxu3  ;;  %v1092_v22 = vpop.f32.mrf.mxu1 }
 0x17a   : > { %v1093_v1 = vadd.f32 %v1092_v22, %v1003_v45 }
 0x17b   : > { %v5110_v0 = vadd.f32 %v1267_v21, %v1179_v6  ;;  %1318 = vmatmul.bf16.gmra.mxu0 %v4612_v12 }
 0x17c   : > { %1407 = vmatmul.bf16.gmra.mxu1 %v4614_v13 }
 0x17d   : > { %1496 = vmatmul.bf16.gmra.mxu2 %v4616_v14 }
 0x17e   : > { %1585 = vmatmul.bf16.gmra.mxu3 %v4618_v15 }
 0x180   : > { %v1181_v2 = vpop.f32.mrf.mxu2  ;;  %v1005_v18 = vpop.f32.mrf.mxu0 }
 0x181   : > { %v1182_v3 = vadd.f32 %v1181_v2, %v1093_v1  ;;  %v1270_v17 = vpop.f32.mrf.mxu3  ;;  %v1094_v32 = vpop.f32.mrf.mxu1 }
 0x182   : > { %v1095_v53 = vadd.f32 %v1094_v32, %v1005_v18 }
 0x183   : > { %v5116_v46 = vadd.f32 %v1270_v17, %v1182_v3 }
 0x188   : > { %v1183_v54 = vpop.f32.mrf.mxu2  ;;  %v1008_v48 = vpop.f32.mrf.mxu0 }
 0x189   : > { %v1184_v55 = vadd.f32 %v1183_v54, %v1095_v53  ;;  %v1272_v49 = vpop.f32.mrf.mxu3  ;;  %v1097_v41 = vpop.f32.mrf.mxu1 }
 0x18a   : > { %v1098_v13 = vadd.f32 %v1097_v41, %v1008_v48 }
 0x18b   : > { %v5118_v12 = vadd.f32 %v1272_v49, %v1184_v55  ;;  %1323 = vmatmul.bf16.gmra.mxu0 %v4632_v24 }
 0x18c   : > { %1412 = vmatmul.bf16.gmra.mxu1 %v4634_v25 }
 0x18d   : > { %1501 = vmatmul.bf16.gmra.mxu2 %v4636_v26 }
 0x18e   : > { %1590 = vmatmul.bf16.gmra.mxu3 %v4638_v27 }
 0x190   : > { %v1186_v14 = vpop.f32.mrf.mxu2  ;;  %v1010_v63 = vpop.f32.mrf.mxu0 }
 0x191   : > { %v1187_v15 = vadd.f32 %v1186_v14, %v1098_v13  ;;  %v1275_v43 = vpop.f32.mrf.mxu3  ;;  %v1099_v6 = vpop.f32.mrf.mxu1 }
 0x192   : > { %v1100_v45 = vadd.f32 %v1099_v6, %v1010_v63 }
 0x193   : > { %v5124_v21 = vadd.f32 %v1275_v43, %v1187_v15 }
 0x198   : > { %v1188_v22 = vpop.f32.mrf.mxu2  ;;  %v1013_v3 = vpop.f32.mrf.mxu0 }
 0x199   : > { %v1189_v1 = vadd.f32 %v1188_v22, %v1100_v45  ;;  %v1277_v2 = vpop.f32.mrf.mxu3  ;;  %v1102_v17 = vpop.f32.mrf.mxu1 }
 0x19a   : > { %v1103_v25 = vadd.f32 %v1102_v17, %v1013_v3 }
 0x19b   : > { %v5126_v24 = vadd.f32 %v1277_v2, %v1189_v1  ;;  %1328 = vmatmul.bf16.gmra.mxu0 %v4652_v36 }
 0x19c   : > { %1417 = vmatmul.bf16.gmra.mxu1 %v4654_v37 }
 0x19d   : > { %1506 = vmatmul.bf16.gmra.mxu2 %v4656_v38 }
 0x19e   : > { %1595 = vmatmul.bf16.gmra.mxu3 %v4658_v39 }
 0x1a0   : > { %v1191_v26 = vpop.f32.mrf.mxu2  ;;  %v1015_v32 = vpop.f32.mrf.mxu0 }
 0x1a1   : > { %v1192_v27 = vadd.f32 %v1191_v26, %v1103_v25  ;;  %v1280_v18 = vpop.f32.mrf.mxu3  ;;  %v1104_v53 = vpop.f32.mrf.mxu1 }
 0x1a2   : > { %v1105_v55 = vadd.f32 %v1104_v53, %v1015_v32 }
 0x1a3   : > { %v5132_v54 = vadd.f32 %v1280_v18, %v1192_v27 }
 0x1a8   : > { %v1193_v49 = vpop.f32.mrf.mxu2  ;;  %v1018_v13 = vpop.f32.mrf.mxu0 }
 0x1a9   : > { %v1194_v48 = vadd.f32 %v1193_v49, %v1105_v55  ;;  %v1282_v41 = vpop.f32.mrf.mxu3  ;;  %v1107_v14 = vpop.f32.mrf.mxu1 }
 0x1aa   : > { %v1108_v37 = vadd.f32 %v1107_v14, %v1018_v13 }
 0x1ab   : > { %v5134_v36 = vadd.f32 %v1282_v41, %v1194_v48  ;;  %1333 = vmatmul.bf16.gmra.mxu0 %v4672_v56 }
 0x1ac   : > { %1422 = vmatmul.bf16.gmra.mxu1 %v4674_v57 }
 0x1ad   : > { %1511 = vmatmul.bf16.gmra.mxu2 %v4676_v58 }
 0x1ae   : > { %1600 = vmatmul.bf16.gmra.mxu3 %v4678_v59 }
 0x1b0   : > { %v1196_v38 = vpop.f32.mrf.mxu2  ;;  %v1020_v43 = vpop.f32.mrf.mxu0 }
 0x1b1   : > { %v1197_v39 = vadd.f32 %v1196_v38, %v1108_v37  ;;  %v1285_v15 = vpop.f32.mrf.mxu3  ;;  %v1109_v63 = vpop.f32.mrf.mxu1 }
 0x1b2   : > { %v1110_v45 = vadd.f32 %v1109_v63, %v1020_v43 }
 0x1b3   : > { %v5140_v6 = vadd.f32 %v1285_v15, %v1197_v39 }
 0x1b8   : > { %v1198_v22 = vpop.f32.mrf.mxu2  ;;  %v1023_v3 = vpop.f32.mrf.mxu0 }
 0x1b9   : > { %v1199_v1 = vadd.f32 %v1198_v22, %v1110_v45  ;;  %v1287_v2 = vpop.f32.mrf.mxu3  ;;  %v1112_v17 = vpop.f32.mrf.mxu1 }
 0x1ba   : > { %v1113_v57 = vadd.f32 %v1112_v17, %v1023_v3  ;;  %v6011_v3 = vld [vmem:[#allocation10_spill] sm:$0xff] }
 0x1bb   : > { %v5142_v56 = vadd.f32 %v1287_v2, %v1199_v1  ;;  %1338 = vmatmul.bf16.gmra.mxu0 %v4692_v8  ;;  %v6009_v1 = vld [vmem:[#allocation8_spill] sm:$0xff]  ;;  %v6010_v2 = vld [vmem:[#allocation9_spill] sm:$0xff] }
 0x1bc   : > { %1427 = vmatmul.bf16.gmra.mxu1 %v4694_v9 }
 0x1bd   : > { %1516 = vmatmul.bf16.gmra.mxu2 %v4696_v10 }
 0x1be   : > { %1605 = vmatmul.bf16.gmra.mxu3 %v4698_v11 }
 0x1c0   : > { %v1201_v58 = vpop.f32.mrf.mxu2  ;;  %v1025_v26 = vpop.f32.mrf.mxu0 }
 0x1c1   : > { %v1202_v59 = vadd.f32 %v1201_v58, %v1113_v57  ;;  %v1290_v25 = vpop.f32.mrf.mxu3  ;;  %v1114_v27 = vpop.f32.mrf.mxu1 }
 0x1c2   : > { %v1115_v32 = vadd.f32 %v1114_v27, %v1025_v26  ;;  %v6012_v26 = vld [vmem:[#allocation11_spill] sm:$0xff] }
 0x1c3   : > { %v5148_v18 = vadd.f32 %v1290_v25, %v1202_v59 }
 0x1c8   : > { %v1203_v53 = vpop.f32.mrf.mxu2  ;;  %v1304_v48 = vpop.f32.mrf.mxu0 }
 0x1c9   : > { %v1204_v55 = vadd.f32 %v1203_v53, %v1115_v32  ;;  %v1292_v49 = vpop.f32.mrf.mxu3  ;;  %v1393_v41 = vpop.f32.mrf.mxu1 }
 0x1ca   : > { %v1394_v9 = vadd.f32 %v1393_v41, %v1304_v48 }
 0x1cb   : > { %v5150_v8 = vadd.f32 %v1292_v49, %v1204_v55  ;;  %1343 = vmatmul.bf16.gmra.mxu0 %v4712_v28 }
 0x1cc   : > { %1432 = vmatmul.bf16.gmra.mxu1 %v4714_v30 }
 0x1cd   : > { %1521 = vmatmul.bf16.gmra.mxu2 %v4716_v31 }
 0x1ce   : > { %1610 = vmatmul.bf16.gmra.mxu3 %v4718_v33 }
 0x1d0   : > { %v1482_v10 = vpop.f32.mrf.mxu2  ;;  %v1306_v14 = vpop.f32.mrf.mxu0 }
 0x1d1   : > { %v1483_v11 = vadd.f32 %v1482_v10, %v1394_v9  ;;  %v1571_v13 = vpop.f32.mrf.mxu3  ;;  %v1395_v37 = vpop.f32.mrf.mxu1 }
 0x1d2   : > { %v1396_v30 = vadd.f32 %v1395_v37, %v1306_v14 }
 0x1d3   : > { %v1572_v38 = vadd.f32 %v1571_v13, %v1483_v11  ;;  %v6013_v11 = vld [vmem:[#allocation12_spill] sm:$0xff] }
 0x1d4   : > { %v6014_v13 = vld [vmem:[#allocation16_spill] sm:$0xff] }
 0x1d5   : > { %v5157_v39 = vpack.c.bf16 %v1572_v38, %v4730_v51  ;;  %v6015_v38 = vld [vmem:[#allocation13_spill] sm:$0xff] }
 0x1d7   : > { %1684 = vst.msk [vmem:[#allocation2] sm:$0xf] %vm1683_vm0, %v5157_v39  ;;  %v1876_v28 = vrot.slane %v5157_v39, 4 }
 0x1d8   : > { %v1484_v15 = vpop.f32.mrf.mxu2  ;;  %v1309_v43 = vpop.f32.mrf.mxu0 }
 0x1d9   : > { %1940 = vst.msk [vmem:[#allocation4] sm:$0xf] %vm1683_vm0, %v1876_v28  ;;  %v1485_v31 = vadd.f32 %v1484_v15, %v1396_v30  ;;  %v1573_v33 = vpop.f32.mrf.mxu3  ;;  %v1398_v63 = vpop.f32.mrf.mxu1  ;;  %v6016_v28 = vld [vmem:[#allocation14_spill] sm:$0xff]  ;;  %v6017_v30 = vld [vmem:[#allocation15_spill] sm:$0xff] }
 0x1da   : > { %v1399_v51 = vadd.f32 %v1398_v63, %v1309_v43 }
 0x1db   : > { %v1574_v45 = vadd.f32 %v1573_v33, %v1485_v31  ;;  %1348 = vmatmul.bf16.gmra.mxu0 %v4758_v35 }
 0x1dc   : > { %1437 = vmatmul.bf16.gmra.mxu1 %v6009_v1  ;;  %v6018_v1 = vld [vmem:[#allocation17_spill] sm:$0xff] }
 0x1dd   : > { %v5165_v22 = vpack.c.bf16 %v1574_v45, %v4766_v61  ;;  %1526 = vmatmul.bf16.gmra.mxu2 %v6010_v2 }
 0x1de   : > { %1615 = vmatmul.bf16.gmra.mxu3 %v6011_v3 }
 0x1df   : > { %1685 = vst.msk [vmem:[#allocation2 + $0x4] sm:$0xf] %vm1683_vm0, %v5165_v22  ;;  %v1877_v17 = vrot.slane %v5165_v22, 4 }
 0x1e0   : > { %v1487_v57 = vpop.f32.mrf.mxu2  ;;  %v1311_v59 = vpop.f32.mrf.mxu0 }
 0x1e1   : > { %1941 = vst.msk [vmem:[#allocation4 + $0x4] sm:$0xf] %vm1683_vm0, %v1877_v17  ;;  %v1488_v58 = vadd.f32 %v1487_v57, %v1399_v51  ;;  %v1576_v35 = vpop.f32.mrf.mxu3  ;;  %v1400_v61 = vpop.f32.mrf.mxu1 }
 0x1e2   : > { %v1401_v53 = vadd.f32 %v1400_v61, %v1311_v59 }
 0x1e3   : > { %v1577_v25 = vadd.f32 %v1576_v35, %v1488_v58 }
 0x1e5   : > { %v5175_v27 = vpack.c.bf16 %v1577_v25, %v6012_v26  ;;  %v6019_v26 = vld [vmem:[#allocation18_spill] sm:$0xff] }
 0x1e7   : > { %1686 = vst.msk [vmem:[#allocation2 + $0x8] sm:$0xf] %vm1683_vm0, %v5175_v27  ;;  %v1878_v32 = vrot.slane %v5175_v27, 4 }
 0x1e8   : > { %v1489_v55 = vpop.f32.mrf.mxu2  ;;  %v1314_v41 = vpop.f32.mrf.mxu0 }
 0x1e9   : > { %1942 = vst.msk [vmem:[#allocation4 + $0x8] sm:$0xf] %vm1683_vm0, %v1878_v32  ;;  %v1490_v49 = vadd.f32 %v1489_v55, %v1401_v53  ;;  %v1578_v48 = vpop.f32.mrf.mxu3  ;;  %v1403_v9 = vpop.f32.mrf.mxu1  ;;  %v6020_v32 = vld [vmem:[#allocation22_spill] sm:$0xff] }
 0x1ea   : > { %v1404_v37 = vadd.f32 %v1403_v9, %v1314_v41  ;;  %v6023_v41 = vld [vmem:[#allocation21_spill] sm:$0xff] }
 0x1eb   : > { %v1579_v10 = vadd.f32 %v1578_v48, %v1490_v49  ;;  %1353 = vmatmul.bf16.gmra.mxu0 %v6013_v11  ;;  %v6021_v49 = vld [vmem:[#allocation19_spill] sm:$0xff]  ;;  %v6022_v48 = vld [vmem:[#allocation20_spill] sm:$0xff] }
 0x1ec   : > { %1442 = vmatmul.bf16.gmra.mxu1 %v6015_v38 }
 0x1ed   : > { %v5183_v14 = vpack.c.bf16 %v1579_v10, %v6014_v13  ;;  %1531 = vmatmul.bf16.gmra.mxu2 %v6016_v28 }
 0x1ee   : > { %1620 = vmatmul.bf16.gmra.mxu3 %v6017_v30  ;;  %v6024_v30 = vld [vmem:[#allocation23_spill] sm:$0xff] }
 0x1ef   : > { %1687 = vst.msk [vmem:[#allocation2 + $0xc] sm:$0xf] %vm1683_vm0, %v5183_v14  ;;  %v1879_v15 = vrot.slane %v5183_v14, 4 }
 0x1f0   : > { %v1492_v31 = vpop.f32.mrf.mxu2  ;;  %v1316_v63 = vpop.f32.mrf.mxu0 }
 0x1f1   : > { %1943 = vst.msk [vmem:[#allocation4 + $0xc] sm:$0xf] %vm1683_vm0, %v1879_v15  ;;  %v1493_v33 = vadd.f32 %v1492_v31, %v1404_v37  ;;  %v1581_v43 = vpop.f32.mrf.mxu3  ;;  %v1405_v45 = vpop.f32.mrf.mxu1 }
 0x1f2   : > { %v1406_v17 = vadd.f32 %v1405_v45, %v1316_v63 }
 0x1f3   : > { %v1582_v51 = vadd.f32 %v1581_v43, %v1493_v33 }
 0x1f5   : > { %v5193_v2 = vpack.c.bf16 %v1582_v51, %v6018_v1 }
 0x1f7   : > { %1688 = vst.msk [vmem:[#allocation2 + $0x10] sm:$0xf] %vm1683_vm0, %v5193_v2  ;;  %v1880_v3 = vrot.slane %v5193_v2, 4 }
 0x1f8   : > { %v1494_v57 = vpop.f32.mrf.mxu2  ;;  %v1319_v59 = vpop.f32.mrf.mxu0 }
 0x1f9   : > { %1944 = vst.msk [vmem:[#allocation4 + $0x10] sm:$0xf] %vm1683_vm0, %v1880_v3  ;;  %v1495_v58 = vadd.f32 %v1494_v57, %v1406_v17  ;;  %v1583_v35 = vpop.f32.mrf.mxu3  ;;  %v1408_v61 = vpop.f32.mrf.mxu1  ;;  %v6025_v17 = vld [vmem:[#allocation24_spill] sm:$0xff] }
 0x1fa   : > { %v1409_v55 = vadd.f32 %v1408_v61, %v1319_v59  ;;  %v6026_v57 = vld [vmem:[#allocation28_spill] sm:$0xff]  ;;  %v6027_v59 = vld [vmem:[#allocation25_spill] sm:$0xff]  ;;  %v6028_v61 = vld [vmem:[#allocation26_spill] sm:$0xff] }
 0x1fb   : > { %v1584_v25 = vadd.f32 %v1583_v35, %v1495_v58  ;;  %1358 = vmatmul.bf16.gmra.mxu0 %v6019_v26 }
 0x1fc   : > { %1447 = vmatmul.bf16.gmra.mxu1 %v6021_v49 }
 0x1fd   : > { %v5201_v53 = vpack.c.bf16 %v1584_v25, %v6020_v32  ;;  %1536 = vmatmul.bf16.gmra.mxu2 %v6022_v48  ;;  %v6029_v25 = vld [vmem:[#allocation27_spill] sm:$0xff] }
 0x1fe   : > { %1625 = vmatmul.bf16.gmra.mxu3 %v6023_v41 }
 0x1ff   : > { %1689 = vst.msk [vmem:[#allocation2 + $0x14] sm:$0xf] %vm1683_vm0, %v5201_v53  ;;  %v1881_v9 = vrot.slane %v5201_v53, 4 }
 0x200   : > { %v1497_v10 = vpop.f32.mrf.mxu2  ;;  %v1321_v37 = vpop.f32.mrf.mxu0 }
 0x201   : > { %1945 = vst.msk [vmem:[#allocation4 + $0x14] sm:$0xf] %vm1683_vm0, %v1881_v9  ;;  %v1498_v11 = vadd.f32 %v1497_v10, %v1409_v55  ;;  %v1586_v13 = vpop.f32.mrf.mxu3  ;;  %v1410_v38 = vpop.f32.mrf.mxu1  ;;  %v6030_v10 = vld [vmem:[#allocation29_spill] sm:$0xff] }
 0x202   : > { %v1411_v33 = vadd.f32 %v1410_v38, %v1321_v37 }
 0x203   : > { %v1587_v28 = vadd.f32 %v1586_v13, %v1498_v11 }
 0x205   : > { %v5211_v15 = vpack.c.bf16 %v1587_v28, %v6024_v30 }
 0x207   : > { %1690 = vst.msk [vmem:[#allocation2 + $0x18] sm:$0xf] %vm1683_vm0, %v5211_v15  ;;  %v1882_v31 = vrot.slane %v5211_v15, 4 }
 0x208   : > { %v1499_v43 = vpop.f32.mrf.mxu2  ;;  %v1324_v51 = vpop.f32.mrf.mxu0 }
 0x209   : > { %1946 = vst.msk [vmem:[#allocation4 + $0x18] sm:$0xf] %vm1683_vm0, %v1882_v31  ;;  %v1500_v63 = vadd.f32 %v1499_v43, %v1411_v33  ;;  %v1588_v45 = vpop.f32.mrf.mxu3  ;;  %v1413_v1 = vpop.f32.mrf.mxu1 }
 0x20a   : > { %v1414_v35 = vadd.f32 %v1413_v1, %v1324_v51 }
 0x20b   : > { %v1589_v3 = vadd.f32 %v1588_v45, %v1500_v63  ;;  %1363 = vmatmul.bf16.gmra.mxu0 %v6025_v17  ;;  %v6031_v63 = vld [vmem:[#allocation30_spill] sm:$0xff]  ;;  %v6034_v17 = vld [vmem:[#allocation32_spill] sm:$0xff] }
 0x20c   : > { %1452 = vmatmul.bf16.gmra.mxu1 %v6027_v59  ;;  %v6032_v45 = vld [vmem:[#allocation34_spill] sm:$0xff] }
 0x20d   : > { %v5219_v58 = vpack.c.bf16 %v1589_v3, %v6026_v57  ;;  %1541 = vmatmul.bf16.gmra.mxu2 %v6028_v61  ;;  %v6033_v3 = vld [vmem:[#allocation31_spill] sm:$0xff]  ;;  %v6035_v57 = vld [vmem:[#allocation33_spill] sm:$0xff] }
 0x20e   : > { %1630 = vmatmul.bf16.gmra.mxu3 %v6029_v25 }
 0x20f   : > { %1691 = vst.msk [vmem:[#allocation2 + $0x1c] sm:$0xf] %vm1683_vm0, %v5219_v58  ;;  %v1883_v26 = vrot.slane %v5219_v58, 4 }
 0x210   : > { %v1502_v32 = vpop.f32.mrf.mxu2  ;;  %v1326_v48 = vpop.f32.mrf.mxu0 }
 0x211   : > { %1947 = vst.msk [vmem:[#allocation4 + $0x1c] sm:$0xf] %vm1683_vm0, %v1883_v26  ;;  %v1503_v55 = vadd.f32 %v1502_v32, %v1414_v35  ;;  %v1591_v49 = vpop.f32.mrf.mxu3  ;;  %v1415_v41 = vpop.f32.mrf.mxu1 }
 0x212   : > { %v1416_v37 = vadd.f32 %v1415_v41, %v1326_v48 }
 0x213   : > { %v1592_v9 = vadd.f32 %v1591_v49, %v1503_v55  ;;  %v6036_v49 = vld [vmem:[#allocation35_spill] sm:$0xff] }
 0x215   : > { %v5229_v11 = vpack.c.bf16 %v1592_v9, %v6030_v10 }
 0x217   : > { %1692 = vst.msk [vmem:[#allocation2 + $0x20] sm:$0xf] %vm1683_vm0, %v5229_v11  ;;  %v1884_v13 = vrot.slane %v5229_v11, 4 }
 0x218   : > { %v1504_v38 = vpop.f32.mrf.mxu2  ;;  %v1329_v31 = vpop.f32.mrf.mxu0 }
 0x219   : > { %1948 = vst.msk [vmem:[#allocation4 + $0x20] sm:$0xf] %vm1683_vm0, %v1884_v13  ;;  %v1505_v28 = vadd.f32 %v1504_v38, %v1416_v37  ;;  %v1593_v30 = vpop.f32.mrf.mxu3  ;;  %v1418_v33 = vpop.f32.mrf.mxu1 }
 0x21a   : > { %v1419_v1 = vadd.f32 %v1418_v33, %v1329_v31 }
 0x21b   : > { %v1594_v43 = vadd.f32 %v1593_v30, %v1505_v28  ;;  %1368 = vmatmul.bf16.gmra.mxu0 %v6031_v63 }
 0x21c   : > { %1457 = vmatmul.bf16.gmra.mxu1 %v6033_v3 }
 0x21d   : > { %v5237_v51 = vpack.c.bf16 %v1594_v43, %v6032_v45  ;;  %1546 = vmatmul.bf16.gmra.mxu2 %v6034_v17  ;;  %v6037_v43 = vld [vmem:[#allocation36_spill] sm:$0xff] }
 0x21e   : > { %1635 = vmatmul.bf16.gmra.mxu3 %v6035_v57 }
 0x21f   : > { %1693 = vst.msk [vmem:[#allocation2 + $0x24] sm:$0xf] %vm1683_vm0, %v5237_v51  ;;  %v1885_v35 = vrot.slane %v5237_v51, 4 }
 0x220   : > { %v1507_v59 = vpop.f32.mrf.mxu2  ;;  %v1331_v26 = vpop.f32.mrf.mxu0 }
 0x221   : > { %1949 = vst.msk [vmem:[#allocation4 + $0x24] sm:$0xf] %vm1683_vm0, %v1885_v35  ;;  %v1508_v61 = vadd.f32 %v1507_v59, %v1419_v1  ;;  %v1596_v25 = vpop.f32.mrf.mxu3  ;;  %v1420_v32 = vpop.f32.mrf.mxu1 }
 0x222   : > { %v1421_v9 = vadd.f32 %v1420_v32, %v1331_v26 }
 0x223   : > { %v1597_v55 = vadd.f32 %v1596_v25, %v1508_v61 }
 0x225   : > { %v5247_v48 = vpack.c.bf16 %v1597_v55, %v6036_v49 }
 0x227   : > { %1694 = vst.msk [vmem:[#allocation2 + $0x28] sm:$0xf] %vm1683_vm0, %v5247_v48  ;;  %v1886_v41 = vrot.slane %v5247_v48, 4 }
 0x228   : > { %v1509_v10 = vpop.f32.mrf.mxu2  ;;  %v1334_v38 = vpop.f32.mrf.mxu0 }
 0x229   : > { %1950 = vst.msk [vmem:[#allocation4 + $0x28] sm:$0xf] %vm1683_vm0, %v1886_v41  ;;  %v1510_v13 = vadd.f32 %v1509_v10, %v1421_v9  ;;  %v1598_v37 = vpop.f32.mrf.mxu3  ;;  %v1423_v28 = vpop.f32.mrf.mxu1 }
 0x22a   : > { %v1424_v33 = vadd.f32 %v1423_v28, %v1334_v38 }
 0x22b   : > { %v1599_v30 = vadd.f32 %v1598_v37, %v1510_v13  ;;  %1373 = vmatmul.bf16.gmra.mxu0 %v5022_v19 }
 0x22c   : > { %1462 = vmatmul.bf16.gmra.mxu1 %v5033_v44 }
 0x22d   : > { %v5255_v31 = vpack.c.bf16 %v1599_v30, %v5054_v5  ;;  %1551 = vmatmul.bf16.gmra.mxu2 %v5035_v23 }
 0x22e   : > { %1640 = vmatmul.bf16.gmra.mxu3 %v6037_v43 }
 0x22f   : > { %1695 = vst.msk [vmem:[#allocation2 + $0x2c] sm:$0xf] %vm1683_vm0, %v5255_v31  ;;  %v1887_v63 = vrot.slane %v5255_v31, 4 }
 0x230   : > { %v1512_v45 = vpop.f32.mrf.mxu2  ;;  %v1336_v3 = vpop.f32.mrf.mxu0 }
 0x231   : > { %1951 = vst.msk [vmem:[#allocation4 + $0x2c] sm:$0xf] %vm1683_vm0, %v1887_v63  ;;  %v1513_v1 = vadd.f32 %v1512_v45, %v1424_v33  ;;  %v1601_v19 = vpop.f32.mrf.mxu3  ;;  %v1425_v5 = vpop.f32.mrf.mxu1 }
 0x232   : > { %v1426_v23 = vadd.f32 %v1425_v5, %v1336_v3 }
 0x233   : > { %v1602_v17 = vadd.f32 %v1601_v19, %v1513_v1 }
 0x235   : > { %v1663_v57 = vpack.c.bf16 %v1602_v17, %v5060_v7 }
 0x237   : > { %1696 = vst.msk [vmem:[#allocation2 + $0x30] sm:$0xf] %vm1683_vm0, %v1663_v57  ;;  %v1888_v44 = vrot.slane %v1663_v57, 4  ;;  %1772 = vrot.lane.b32.xlu2 %v1663_v57, %s4261_s22 }
 0x238   : > { %v1514_v35 = vpop.f32.mrf.mxu2  ;;  %v1339_v25 = vpop.f32.mrf.mxu0 }
 0x239   : > { %1952 = vst.msk [vmem:[#allocation4 + $0x30] sm:$0xf] %vm1683_vm0, %v1888_v44  ;;  %v1515_v59 = vadd.f32 %v1514_v35, %v1426_v23  ;;  %v1603_v61 = vpop.f32.mrf.mxu3  ;;  %v1428_v26 = vpop.f32.mrf.mxu1 }
 0x23a   : > { %v1429_v7 = vadd.f32 %v1428_v26, %v1339_v25 }
 0x23b   : > { %v1604_v32 = vadd.f32 %v1603_v61, %v1515_v59  ;;  %1378 = vmatmul.bf16.gmra.mxu0 %v5070_v47 }
 0x23c   : > { %1467 = vmatmul.bf16.gmra.mxu1 %v5072_v62 }
 0x23d   : > { %v5270_v55 = vpack.c.bf16 %v1604_v32, %v5078_v34  ;;  %1556 = vmatmul.bf16.gmra.mxu2 %v5074_v50 }
 0x23e   : > { %1645 = vmatmul.bf16.gmra.mxu3 %v5076_v29 }
 0x23f   : > { %1697 = vst.msk [vmem:[#allocation2 + $0x34] sm:$0xf] %vm1683_vm0, %v5270_v55  ;;  %v1889_v49 = vrot.slane %v5270_v55, 4 }
 0x240   : > { %v1517_v41 = vpop.f32.mrf.mxu2  ;;  %v1341_v10 = vpop.f32.mrf.mxu0 }
 0x241   : > { %1953 = vst.msk [vmem:[#allocation4 + $0x34] sm:$0xf] %vm1683_vm0, %v1889_v49  ;;  %v1518_v9 = vadd.f32 %v1517_v41, %v1429_v7  ;;  %v1606_v47 = vpop.f32.mrf.mxu3  ;;  %v1430_v34 = vpop.f32.mrf.mxu1 }
 0x242   : > { %v1431_v62 = vadd.f32 %v1430_v34, %v1341_v10  ;;  %v3996_v10 = vld [vmem:[#allocation4 + $0x28] sm:$0xff] }
 0x243   : > { %v1607_v13 = vadd.f32 %v1606_v47, %v1518_v9 }
 0x245   : > { %v1665_v37 = vpack.c.bf16 %v1607_v13, %v5084_v60 }
 0x247   : > { %1698 = vst.msk [vmem:[#allocation2 + $0x38] sm:$0xf] %vm1683_vm0, %v1665_v37  ;;  %v1890_v50 = vrot.slane %v1665_v37, 4  ;;  %1776 = vrot.lane.b32.xlu2 %v1665_v37, %s4261_s22 }
 0x248   : > { %v1519_v29 = vpop.f32.mrf.mxu2  ;;  %v1344_v30 = vpop.f32.mrf.mxu0  ;;  %v3997_v49 = vld [vmem:[#allocation4 + $0x30] sm:$0xff] }
 0x249   : > { %1954 = vst.msk [vmem:[#allocation4 + $0x38] sm:$0xf] %vm1683_vm0, %v1890_v50  ;;  %v1520_v38 = vadd.f32 %v1519_v29, %v1431_v62  ;;  %v1608_v28 = vpop.f32.mrf.mxu3  ;;  %v1433_v33 = vpop.f32.mrf.mxu1  ;;  %v3995_v29 = vld [vmem:[#allocation4 + $0x20] sm:$0xff] }
 0x24a   : > { %v1434_v45 = vadd.f32 %v1433_v33, %v1344_v30  ;;  %v3994_v33 = vld [vmem:[#allocation4 + $0x18] sm:$0xff] }
 0x24b   : > { %v1609_v43 = vadd.f32 %v1608_v28, %v1520_v38 }
 0x24d   : > { %v1666_v63 = vpack.c.bf16 %v1609_v43, %v5086_v16 }
 0x24f   : > { %1699 = vst.msk [vmem:[#allocation2 + $0x3c] sm:$0xf] %vm1683_vm0, %v1666_v63  ;;  %v1891_v60 = vrot.slane %v1666_v63, 4  ;;  %1778 = vrot.lane.b32.xlu2 %v1666_v63, %s4261_s22 }
 0x250   : > { %v1522_v1 = vpop.f32.mrf.mxu2  ;;  %v1346_v5 = vpop.f32.mrf.mxu0 }
 0x251   : > { %1955 = vst.msk [vmem:[#allocation4 + $0x3c] sm:$0xf] %vm1683_vm0, %v1891_v60  ;;  %v1523_v19 = vadd.f32 %v1522_v1, %v1434_v45  ;;  %v1611_v3 = vpop.f32.mrf.mxu3  ;;  %v1435_v17 = vpop.f32.mrf.mxu1 }
 0x252   : > { %v1436_v23 = vadd.f32 %v1435_v17, %v1346_v5 }
 0x253   : > { %v1612_v57 = vadd.f32 %v1611_v3, %v1523_v19  ;;  %v3993_v19 = vld [vmem:[#allocation4 + $0x10] sm:$0xff] }
 0x255   : > { %v5288_v44 = vpack.c.bf16 %v1612_v57, %v5092_v20  ;;  %v3992_v57 = vld [vmem:[#allocation4 + $0x8] sm:$0xff] }
 0x257   : > { %1700 = vst.msk [vmem:[#allocation2 + $0x40] sm:$0xf] %vm1683_vm0, %v5288_v44  ;;  %v1892_v16 = vrot.slane %v5288_v44, 4 }
 0x258   : > { %v1524_v35 = vpop.f32.mrf.mxu2  ;;  %v3998_v59 = vld [vmem:[#allocation4 + $0x38] sm:$0xff]  ;;  %v1349_v26 = vpop.f32.mrf.mxu0 }
 0x259   : > { %1956 = vst.msk [vmem:[#allocation4 + $0x40] sm:$0xf] %vm1683_vm0, %v1892_v16  ;;  %v1525_v61 = vadd.f32 %v1524_v35, %v1436_v23  ;;  %v1613_v25 = vpop.f32.mrf.mxu3  ;;  %v1438_v32 = vpop.f32.mrf.mxu1  ;;  %2449 = vmatpush.bf16.msra.mxu1 %v3998_v59 }
 0x25a   : > { %v1439_v41 = vadd.f32 %v1438_v32, %v1349_v26 }
 0x25b   : > { %v1614_v7 = vadd.f32 %v1613_v25, %v1525_v61  ;;  %v3991_v25 = vld [vmem:[#allocation4] sm:$0xff] }
 0x25d   : > { %v5295_v20 = vpack.c.bf16 %v1614_v7, %v5094_v40  ;;  %2450 = vmatpush.bf16.msra.mxu1 %v3997_v49 }
 0x25f   : > { %1701 = vst.msk [vmem:[#allocation2 + $0x44] sm:$0xf] %vm1683_vm0, %v5295_v20  ;;  %v1893_v9 = vrot.slane %v5295_v20, 4 }
 0x260   : > { %v1527_v47 = vpop.f32.mrf.mxu2  ;;  %v1351_v37 = vpop.f32.mrf.mxu0 }
 0x261   : > { %1957 = vst.msk [vmem:[#allocation4 + $0x44] sm:$0xf] %vm1683_vm0, %v1893_v9  ;;  %v1528_v34 = vadd.f32 %v1527_v47, %v1439_v41  ;;  %v1616_v13 = vpop.f32.mrf.mxu3  ;;  %v1440_v50 = vpop.f32.mrf.mxu1  ;;  %2451 = vmatpush.bf16.msra.mxu1 %v3996_v10 }
 0x262   : > { %v1441_v28 = vadd.f32 %v1440_v50, %v1351_v37 }
 0x263   : > { %v1617_v62 = vadd.f32 %v1616_v13, %v1528_v34 }
 0x265   : > { %v5302_v40 = vpack.c.bf16 %v1617_v62, %v5100_v4  ;;  %2452 = vmatpush.bf16.msra.mxu1 %v3995_v29 }
 0x267   : > { %1702 = vst.msk [vmem:[#allocation2 + $0x48] sm:$0xf] %vm1683_vm0, %v5302_v40  ;;  %v1894_v38 = vrot.slane %v5302_v40, 4 }
 0x268   : > { %v1529_v30 = vpop.f32.mrf.mxu2  ;;  %v1354_v45 = vpop.f32.mrf.mxu0 }
 0x269   : > { %1958 = vst.msk [vmem:[#allocation4 + $0x48] sm:$0xf] %vm1683_vm0, %v1894_v38  ;;  %v1530_v43 = vadd.f32 %v1529_v30, %v1441_v28  ;;  %v1618_v63 = vpop.f32.mrf.mxu3  ;;  %v1443_v60 = vpop.f32.mrf.mxu1  ;;  %2453 = vmatpush.bf16.msra.mxu1 %v3994_v33 }
 0x26a   : > { %v1444_v3 = vadd.f32 %v1443_v60, %v1354_v45 }
 0x26b   : > { %v1619_v1 = vadd.f32 %v1618_v63, %v1530_v43 }
 0x26d   : > { %v5309_v4 = vpack.c.bf16 %v1619_v1, %v5102_v52  ;;  %2454 = vmatpush.bf16.msra.mxu1 %v3993_v19 }
 0x26f   : > { %1703 = vst.msk [vmem:[#allocation2 + $0x4c] sm:$0xf] %vm1683_vm0, %v5309_v4  ;;  %v1895_v5 = vrot.slane %v5309_v4, 4 }
 0x270   : > { %v1532_v17 = vpop.f32.mrf.mxu2  ;;  %v1356_v35 = vpop.f32.mrf.mxu0 }
 0x271   : > { %1959 = vst.msk [vmem:[#allocation4 + $0x4c] sm:$0xf] %vm1683_vm0, %v1895_v5  ;;  %v1533_v16 = vadd.f32 %v1532_v17, %v1444_v3  ;;  %v1621_v23 = vpop.f32.mrf.mxu3  ;;  %v1445_v59 = vpop.f32.mrf.mxu1  ;;  %2455 = vmatpush.bf16.msra.mxu1 %v3992_v57 }
 0x272   : > { %v1446_v32 = vadd.f32 %v1445_v59, %v1356_v35 }
 0x273   : > { %v1622_v61 = vadd.f32 %v1621_v23, %v1533_v16 }
 0x275   : > { %v5316_v52 = vpack.c.bf16 %v1622_v61, %v5108_v42  ;;  %2456 = vmatpush.bf16.msra.mxu1 %v3991_v25 }
 0x277   : > { %1704 = vst.msk [vmem:[#allocation2 + $0x50] sm:$0xf] %vm1683_vm0, %v5316_v52  ;;  %v1896_v26 = vrot.slane %v5316_v52, 4 }
 0x278   : > { %v1534_v7 = vpop.f32.mrf.mxu2  ;;  %v1359_v9 = vpop.f32.mrf.mxu0 }
 0x279   : > { %1960 = vst.msk [vmem:[#allocation4 + $0x50] sm:$0xf] %vm1683_vm0, %v1896_v26  ;;  %v1535_v49 = vadd.f32 %v1534_v7, %v1446_v32  ;;  %v1623_v41 = vpop.f32.mrf.mxu3  ;;  %v1448_v47 = vpop.f32.mrf.mxu1 }
 0x27a   : > { %v1449_v42 = vadd.f32 %v1448_v47, %v1359_v9 }
 0x27b   : > { %v1624_v10 = vadd.f32 %v1623_v41, %v1535_v49 }
 0x27d   : > { %v5323_v34 = vpack.c.bf16 %v1624_v10, %v5110_v0 }
 0x27f   : > { %1705 = vst.msk [vmem:[#allocation2 + $0x54] sm:$0xf] %vm1683_vm0, %v5323_v34  ;;  %v1897_v13 = vrot.slane %v5323_v34, 4 }
 0x280   : > { %v1537_v37 = vpop.f32.mrf.mxu2  ;;  %v1361_v29 = vpop.f32.mrf.mxu0 }
 0x281   : > { %1961 = vst.msk [vmem:[#allocation4 + $0x54] sm:$0xf] %vm1683_vm0, %v1897_v13  ;;  %v1538_v50 = vadd.f32 %v1537_v37, %v1449_v42  ;;  %v1626_v62 = vpop.f32.mrf.mxu3  ;;  %v1450_v38 = vpop.f32.mrf.mxu1 }
 0x282   : > { %v1451_v33 = vadd.f32 %v1450_v38, %v1361_v29 }
 0x283   : > { %v1627_v28 = vadd.f32 %v1626_v62, %v1538_v50 }
 0x285   : > { %v1673_v30 = vpack.c.bf16 %v1627_v28, %v5116_v46 }
 0x287   : > { %1706 = vst.msk [vmem:[#allocation2 + $0x58] sm:$0xf] %vm1683_vm0, %v1673_v30  ;;  %v1898_v0 = vrot.slane %v1673_v30, 4 }
 0x288   : > { %v1539_v43 = vpop.f32.mrf.mxu2  ;;  %v1364_v60 = vpop.f32.mrf.mxu0 }
 0x289   : > { %1962 = vst.msk [vmem:[#allocation4 + $0x58] sm:$0xf] %vm1683_vm0, %v1898_v0  ;;  %v1540_v63 = vadd.f32 %v1539_v43, %v1451_v33  ;;  %v1628_v45 = vpop.f32.mrf.mxu3  ;;  %v1453_v1 = vpop.f32.mrf.mxu1 }
 0x28a   : > { %v1454_v5 = vadd.f32 %v1453_v1, %v1364_v60 }
 0x28b   : > { %v1629_v19 = vadd.f32 %v1628_v45, %v1540_v63 }
 0x28d   : > { %v5333_v3 = vpack.c.bf16 %v1629_v19, %v5118_v12 }
 0x28f   : > { %1707 = vst.msk [vmem:[#allocation2 + $0x5c] sm:$0xf] %vm1683_vm0, %v5333_v3  ;;  %v1899_v46 = vrot.slane %v5333_v3, 4 }
 0x290   : > { %v1542_v17 = vpop.f32.mrf.mxu2  ;;  %v1366_v35 = vpop.f32.mrf.mxu0 }
 0x291   : > { %1963 = vst.msk [vmem:[#allocation4 + $0x5c] sm:$0xf] %vm1683_vm0, %v1899_v46  ;;  %v1543_v57 = vadd.f32 %v1542_v17, %v1454_v5  ;;  %v1631_v16 = vpop.f32.mrf.mxu3  ;;  %v1773_v23 = vpop.permute.xlu2 %1772 }
 0x292   : > { %1856 = vst.msk [vmem:[#allocation3 + $0x30] sm:$0xf] %vm1683_vm0, %v1773_v23  ;;  %v1455_v59 = vpop.f32.mrf.mxu1 }
 0x293   : > { %v1632_v61 = vadd.f32 %v1631_v16, %v1543_v57  ;;  %v1456_v26 = vadd.f32 %v1455_v59, %v1366_v35 }
 0x295   : > { %v5341_v12 = vpack.c.bf16 %v1632_v61, %v5124_v21 }
 0x297   : > { %1708 = vst.msk [vmem:[#allocation2 + $0x60] sm:$0xf] %vm1683_vm0, %v5341_v12  ;;  %v1900_v25 = vrot.slane %v5341_v12, 4 }
 0x298   : > { %v1544_v32 = vpop.f32.mrf.mxu2  ;;  %v1369_v41 = vpop.f32.mrf.mxu0 }
 0x299   : > { %1964 = vst.msk [vmem:[#allocation4 + $0x60] sm:$0xf] %vm1683_vm0, %v1900_v25  ;;  %v1545_v7 = vadd.f32 %v1544_v32, %v1456_v26  ;;  %v1633_v49 = vpop.f32.mrf.mxu3 }
 0x29a   : > { %v1458_v9 = vpop.f32.mrf.mxu1 }
 0x29b   : > { %v1634_v47 = vadd.f32 %v1633_v49, %v1545_v7  ;;  %v1459_v42 = vadd.f32 %v1458_v9, %v1369_v41 }
 0x29d   : > { %v1676_v10 = vpack.c.bf16 %v1634_v47, %v5126_v24 }
 0x29f   : > { %1709 = vst.msk [vmem:[#allocation2 + $0x64] sm:$0xf] %vm1683_vm0, %v1676_v10  ;;  %v1901_v21 = vrot.slane %v1676_v10, 4  ;;  %1798 = vrot.lane.b32.xlu2 %v1676_v10, %s4261_s22 }
 0x2a0   : > { %v1547_v13 = vpop.f32.mrf.mxu2  ;;  %v1371_v29 = vpop.f32.mrf.mxu0 }
 0x2a1   : > { %1965 = vst.msk [vmem:[#allocation4 + $0x64] sm:$0xf] %vm1683_vm0, %v1901_v21  ;;  %v1548_v37 = vadd.f32 %v1547_v13, %v1459_v42  ;;  %v1636_v50 = vpop.f32.mrf.mxu3  ;;  %v1777_v62 = vpop.permute.xlu2 %1776 }
 0x2a2   : > { %1858 = vst.msk [vmem:[#allocation3 + $0x38] sm:$0xf] %vm1683_vm0, %v1777_v62  ;;  %v1460_v38 = vpop.f32.mrf.mxu1 }
 0x2a3   : > { %v1637_v28 = vadd.f32 %v1636_v50, %v1548_v37  ;;  %v1461_v33 = vadd.f32 %v1460_v38, %v1371_v29 }
 0x2a5   : > { %v1677_v0 = vpack.c.bf16 %v1637_v28, %v5132_v54 }
 0x2a7   : > { %1710 = vst.msk [vmem:[#allocation2 + $0x68] sm:$0xf] %vm1683_vm0, %v1677_v0  ;;  %v1902_v24 = vrot.slane %v1677_v0, 4  ;;  %1800 = vrot.lane.b32.xlu0 %v1677_v0, %s4261_s22  ;;  %1792 = vrot.lane.b32.xlu2 %v1673_v30, %s4261_s22 }
 0x2a8   : > { %v1549_v43 = vpop.f32.mrf.mxu2  ;;  %v1374_v1 = vpop.f32.mrf.mxu0 }
 0x2a9   : > { %1966 = vst.msk [vmem:[#allocation4 + $0x68] sm:$0xf] %vm1683_vm0, %v1902_v24  ;;  %v1550_v63 = vadd.f32 %v1549_v43, %v1461_v33  ;;  %v1638_v45 = vpop.f32.mrf.mxu3  ;;  %v1779_v60 = vpop.permute.xlu2 %1778 }
 0x2aa   : > { %1859 = vst.msk [vmem:[#allocation3 + $0x3c] sm:$0xf] %vm1683_vm0, %v1779_v60  ;;  %v1463_v19 = vpop.f32.mrf.mxu1 }
 0x2ab   : > { %v1639_v5 = vadd.f32 %v1638_v45, %v1550_v63  ;;  %v1464_v46 = vadd.f32 %v1463_v19, %v1374_v1 }
 0x2ad   : > { %v1678_v54 = vpack.c.bf16 %v1639_v5, %v5134_v36 }
 0x2af   : > { %1711 = vst.msk [vmem:[#allocation2 + $0x6c] sm:$0xf] %vm1683_vm0, %v1678_v54  ;;  %v1903_v17 = vrot.slane %v1678_v54, 4  ;;  %1802 = vrot.lane.b32.xlu1 %v1678_v54, %s4261_s22  ;;  %1766 = vrot.lane.b32.xlu2 %v5237_v51, %s4261_s22 }
 0x2b0   : > { %v1552_v30 = vpop.f32.mrf.mxu2  ;;  %v1376_v35 = vpop.f32.mrf.mxu0 }
 0x2b1   : > { %1967 = vst.msk [vmem:[#allocation4 + $0x6c] sm:$0xf] %vm1683_vm0, %v1903_v17  ;;  %v1553_v57 = vadd.f32 %v1552_v30, %v1464_v46  ;;  %v1641_v16 = vpop.f32.mrf.mxu3  ;;  %v3990_v23 = vld [vmem:[#allocation3 + $0x38] sm:$0xff] }
 0x2b2   : > { %v1465_v59 = vpop.f32.mrf.mxu1  ;;  %v2182_v36 = vsel %vm2135_vm1, %v3990_v23, 0 }
 0x2b3   : > { %v1642_v61 = vadd.f32 %v1641_v16, %v1553_v57  ;;  %2184 = vmatpush.bf16.xpose.msra.mxu0 %v2182_v36  ;;  %v1466_v32 = vadd.f32 %v1465_v59, %v1376_v35 }
 0x2b5   : > { %v1679_v25 = vpack.c.bf16 %v1642_v61, %v5140_v6 }
 0x2b7   : > { %1712 = vst.msk [vmem:[#allocation2 + $0x70] sm:$0xf] %vm1683_vm0, %v1679_v25  ;;  %v1904_v26 = vrot.slane %v1679_v25, 4  ;;  %1804 = vrot.lane.b32.xlu1 %v1679_v25, %s4261_s22  ;;  %1760 = vrot.lane.b32.xlu2 %v5211_v15, %s4261_s22 }
 0x2b8   : > { %v1554_v51 = vpop.f32.mrf.mxu2  ;;  %v1379_v41 = vpop.f32.mrf.mxu0 }
 0x2b9   : > { %1968 = vst.msk [vmem:[#allocation4 + $0x70] sm:$0xf] %vm1683_vm0, %v1904_v26  ;;  %v1555_v7 = vadd.f32 %v1554_v51, %v1466_v32  ;;  %v1643_v49 = vpop.f32.mrf.mxu3 }
 0x2ba   : > { %v1468_v9 = vpop.f32.mrf.mxu1 }
 0x2bb   : > { %v1644_v47 = vadd.f32 %v1643_v49, %v1555_v7  ;;  %v1469_v6 = vadd.f32 %v1468_v9, %v1379_v41 }
 0x2bd   : > { %v1680_v10 = vpack.c.bf16 %v1644_v47, %v5142_v56 }
 0x2bf   : > { %1713 = vst.msk [vmem:[#allocation2 + $0x74] sm:$0xf] %vm1683_vm0, %v1680_v10  ;;  %v1905_v42 = vrot.slane %v1680_v10, 4  ;;  %1806 = vrot.lane.b32.xlu1 %v1680_v10, %s4261_s22  ;;  %1786 = vrot.lane.b32.xlu2 %v5309_v4, %s4261_s22 }
 0x2c0   : > { %v1557_v15 = vpop.f32.mrf.mxu2  ;;  %v1381_v50 = vpop.f32.mrf.mxu0 }
 0x2c1   : > { %1969 = vst.msk [vmem:[#allocation4 + $0x74] sm:$0xf] %vm1683_vm0, %v1905_v42  ;;  %v1558_v21 = vadd.f32 %v1557_v15, %v1469_v6  ;;  %v1646_v13 = vpop.f32.mrf.mxu3 }
 0x2c2   : > { %v1470_v62 = vpop.f32.mrf.mxu1 }
 0x2c3   : > { %v1647_v37 = vadd.f32 %v1646_v13, %v1558_v21  ;;  %v1471_v38 = vadd.f32 %v1470_v62, %v1381_v50 }
 0x2c5   : > { %v1681_v29 = vpack.c.bf16 %v1647_v37, %v5148_v18 }
 0x2c7   : > { %1714 = vst.msk [vmem:[#allocation2 + $0x78] sm:$0xf] %vm1683_vm0, %v1681_v29  ;;  %v1906_v56 = vrot.slane %v1681_v29, 4  ;;  %1808 = vrot.lane.b32.xlu0 %v1681_v29, %s4261_s22  ;;  %1796 = vrot.lane.b32.xlu1 %v5341_v12, %s4261_s22 }
 0x2c8   : > { %1780 = vrot.lane.b32.xlu2 %v5288_v44, %s4261_s22  ;;  %v1559_v4 = vpop.f32.mrf.mxu2  ;;  %v4021_v44 = vld [vmem:[#allocation4 + $0x70] sm:$0xff] }
 0x2c9   : > { %1970 = vst.msk [vmem:[#allocation4 + $0x78] sm:$0xf] %vm1683_vm0, %v1906_v56  ;;  %v1560_v28 = vadd.f32 %v1559_v4, %v1471_v38  ;;  %v1648_v0 = vpop.f32.mrf.mxu3 }
 0x2cb   : > { %v1649_v24 = vadd.f32 %v1648_v0, %v1560_v28 }
 0x2cd   : > { %v1682_v18 = vpack.c.bf16 %v1649_v24, %v5150_v8 }
 0x2cf   : > { %1715 = vst.msk [vmem:[#allocation2 + $0x7c] sm:$0xf] %vm1683_vm0, %v1682_v18  ;;  %v1907_v33 = vrot.slane %v1682_v18, 4  ;;  %1810 = vrot.lane.b32.xlu0 %v1682_v18, %s4261_s22  ;;  %1770 = vrot.lane.b32.xlu1 %v5255_v31, %s4261_s22  ;;  %v4020_v31 = vld [vmem:[#allocation4 + $0x68] sm:$0xff] }
 0x2d0   : > { %1754 = vrot.lane.b32.xlu2 %v5183_v14, %s4261_s22  ;;  %v4019_v14 = vld [vmem:[#allocation4 + $0x60] sm:$0xff] }
 0x2d1   : > { %1971 = vst.msk [vmem:[#allocation4 + $0x7c] sm:$0xf] %vm1683_vm0, %v1907_v33 }
 0x2d7   : > { %1774 = vrot.lane.b32.xlu0 %v5270_v55, %s4261_s22  ;;  %1764 = vrot.lane.b32.xlu1 %v5229_v11, %s4261_s22  ;;  %v4018_v11 = vld [vmem:[#allocation4 + $0x58] sm:$0xff]  ;;  %v4017_v55 = vld [vmem:[#allocation4 + $0x50] sm:$0xff] }
 0x2d8   : > { %v4022_v8 = vld [vmem:[#allocation4 + $0x78] sm:$0xff] }
 0x2d9   : > { %2958 = vmatpush.bf16.msra.mxu3 %v4022_v8 }
 0x2dd   : > { %2959 = vmatpush.bf16.msra.mxu3 %v4021_v44  ;;  %v3999_v44 = vld [vmem:[#allocation2 + $0x40] sm:$0xff] }
 0x2df   : > { %1768 = vrot.lane.b32.xlu0 %v5247_v48, %s4261_s22  ;;  %1790 = vrot.lane.b32.xlu1 %v5323_v34, %s4261_s22  ;;  %v4016_v48 = vld [vmem:[#allocation4 + $0x48] sm:$0xff]  ;;  %v4015_v34 = vld [vmem:[#allocation4 + $0x40] sm:$0xff] }
 0x2e1   : > { %2960 = vmatpush.bf16.msra.mxu3 %v4020_v31 }
 0x2e5   : > { %2961 = vmatpush.bf16.msra.mxu3 %v4019_v14 }
 0x2e7   : > { %1794 = vrot.lane.b32.xlu0 %v5333_v3, %s4261_s22  ;;  %1784 = vrot.lane.b32.xlu1 %v5302_v40, %s4261_s22 }
 0x2e9   : > { %2962 = vmatpush.bf16.msra.mxu3 %v4018_v11  ;;  %v3975_v11 = vld [vmem:[#allocation2] sm:$0xff] }
 0x2ed   : > { %2963 = vmatpush.bf16.msra.mxu3 %v4017_v55  ;;  %v4000_v55 = vld [vmem:[#allocation2 + $0x48] sm:$0xff] }
 0x2ef   : > { %1788 = vrot.lane.b32.xlu0 %v5316_v52, %s4261_s22  ;;  %1758 = vrot.lane.b32.xlu1 %v5201_v53, %s4261_s22 }
 0x2f1   : > { %2964 = vmatpush.bf16.msra.mxu3 %v4016_v48  ;;  %v3976_v48 = vld [vmem:[#allocation2 + $0x8] sm:$0xff] }
 0x2f5   : > { %2965 = vmatpush.bf16.msra.mxu3 %v4015_v34  ;;  %v4001_v34 = vld [vmem:[#allocation2 + $0x50] sm:$0xff] }
 0x2f7   : > { %1762 = vrot.lane.b32.xlu0 %v5219_v58, %s4261_s22  ;;  %1752 = vrot.lane.b32.xlu1 %v5175_v27, %s4261_s22 }
 0x2f9   : > { %v1799_v40 = vpop.permute.xlu2 %1798 }
 0x2fa   : > { %1869 = vst.msk [vmem:[#allocation3 + $0x64] sm:$0xf] %vm1683_vm0, %v1799_v40  ;;  %v3977_v40 = vld [vmem:[#allocation2 + $0x10] sm:$0xff] }
 0x2ff   : > { %1756 = vrot.lane.b32.xlu0 %v5193_v2, %s4261_s22  ;;  %1750 = vrot.lane.b32.xlu1 %v5165_v22, %s4261_s22 }
 0x301   : > { %v1793_v53 = vpop.permute.xlu2 %1792 }
 0x302   : > { %1866 = vst.msk [vmem:[#allocation3 + $0x58] sm:$0xf] %vm1683_vm0, %v1793_v53  ;;  %v4002_v53 = vld [vmem:[#allocation2 + $0x58] sm:$0xff] }
 0x307   : > { %1782 = vrot.lane.b32.xlu0 %v5295_v20, %s4261_s22 }
 0x309   : > { %v1767_v52 = vpop.permute.xlu2 %1766 }
 0x30a   : > { %1853 = vst.msk [vmem:[#allocation3 + $0x24] sm:$0xf] %vm1683_vm0, %v1767_v52  ;;  %v3978_v52 = vld [vmem:[#allocation2 + $0x18] sm:$0xff] }
 0x30f   : > { %1748 = vrot.lane.b32.xlu0 %v5157_v39, %s4261_s22 }
 0x311   : > { %v1761_v27 = vpop.permute.xlu2 %1760 }
 0x312   : > { %1850 = vst.msk [vmem:[#allocation3 + $0x18] sm:$0xf] %vm1683_vm0, %v1761_v27  ;;  %v4003_v27 = vld [vmem:[#allocation2 + $0x60] sm:$0xff] }
 0x319   : > { %v1801_v58 = vpop.permute.xlu0 %1800  ;;  %v1787_v2 = vpop.permute.xlu2 %1786 }
 0x31a   : > { %1870 = vst.msk [vmem:[#allocation3 + $0x68] sm:$0xf] %vm1683_vm0, %v1801_v58  ;;  %v3979_v58 = vld [vmem:[#allocation2 + $0x20] sm:$0xff] }
 0x31b   : > { %1863 = vst.msk [vmem:[#allocation3 + $0x4c] sm:$0xf] %vm1683_vm0, %v1787_v2  ;;  %v4004_v2 = vld [vmem:[#allocation2 + $0x68] sm:$0xff] }
 0x321   : > { %v1803_v22 = vpop.permute.xlu1 %1802 }
 0x322   : > { %1871 = vst.msk [vmem:[#allocation3 + $0x6c] sm:$0xf] %vm1683_vm0, %v1803_v22  ;;  %v1781_v3 = vpop.permute.xlu2 %1780  ;;  %v3980_v22 = vld [vmem:[#allocation2 + $0x28] sm:$0xff] }
 0x323   : > { %1860 = vst.msk [vmem:[#allocation3 + $0x40] sm:$0xf] %vm1683_vm0, %v1781_v3  ;;  %v4005_v3 = vld [vmem:[#allocation2 + $0x70] sm:$0xff] }
 0x329   : > { %v1805_v20 = vpop.permute.xlu1 %1804  ;;  %v4012_v35 = vld [vmem:[#allocation3 + $0x68] sm:$0xff] }
 0x32a   : > { %1872 = vst.msk [vmem:[#allocation3 + $0x70] sm:$0xf] %vm1683_vm0, %v1805_v20  ;;  %v1755_v12 = vpop.permute.xlu2 %1754  ;;  %v2685_v26 = vsel %vm2135_vm1, %v4012_v35, 0  ;;  %v3981_v20 = vld [vmem:[#allocation2 + $0x30] sm:$0xff] }
 0x32b   : > { %1847 = vst.msk [vmem:[#allocation3 + $0xc] sm:$0xf] %vm1683_vm0, %v1755_v12  ;;  %v4006_v12 = vld [vmem:[#allocation2 + $0x78] sm:$0xff] }
 0x331   : > { %v1807_v39 = vpop.permute.xlu1 %1806 }
 0x332   : > { %1873 = vst.msk [vmem:[#allocation3 + $0x74] sm:$0xf] %vm1683_vm0, %v1807_v39  ;;  %v3982_v39 = vld [vmem:[#allocation2 + $0x38] sm:$0xff] }
 0x339   : > { %v1809_v43 = vpop.permute.xlu0 %1808  ;;  %v1797_v63 = vpop.permute.xlu1 %1796  ;;  %v4013_v46 = vld [vmem:[#allocation3 + $0x70] sm:$0xff] }
 0x33a   : > { %1874 = vst.msk [vmem:[#allocation3 + $0x78] sm:$0xf] %vm1683_vm0, %v1809_v43  ;;  %v2688_v23 = vsel %vm2135_vm1, %v4013_v46, 0  ;;  %v1972_v43 = vlaneseq }
 0x33b   : > { %1868 = vst.msk [vmem:[#allocation3 + $0x60] sm:$0xf] %vm1683_vm0, %v1797_v63 }
 0x33c   : > { %v5481_v63 = vshrl.u32 %v1972_v43, 7 }
 0x33e   : > { %v1975_v46 = vadd.s32 16, %v5481_v63 }
 0x341   : > { %v1811_v45 = vpop.permute.xlu0 %1810  ;;  %v1771_v60 = vpop.permute.xlu1 %1770 }
 0x342   : > { %1875 = vst.msk [vmem:[#allocation3 + $0x7c] sm:$0xf] %vm1683_vm0, %v1811_v45  ;;  %v4011_v51 = vld [vmem:[#allocation3 + $0x60] sm:$0xff]  ;;  %v5483_v45 = vand.u32 127, %v1972_v43 }
 0x343   : > { %1855 = vst.msk [vmem:[#allocation3 + $0x2c] sm:$0xf] %vm1683_vm0, %v1771_v60  ;;  %v2682_v9 = vsel %vm2135_vm1, %v4011_v51, 0 }
 0x344   : > { %vm1991_vm2 = vcmp.le.s32.totalorder %v5483_v45, %v5481_v63  ;;  %vm1993_vm4 = vcmp.le.s32.totalorder %v5483_v45, %v1975_v46  ;;  %v1983_v46 = vadd.s32 80, %v5481_v63 }
 0x346   : > { %vm2001_vm13 = vcmp.le.s32.totalorder %v5483_v45, %v1983_v46 }
 0x349   : > { %v1775_v1 = vpop.permute.xlu0 %1774  ;;  %v1765_v19 = vpop.permute.xlu1 %1764  ;;  %v4014_v5 = vld [vmem:[#allocation3 + $0x78] sm:$0xff] }
 0x34a   : > { %1857 = vst.msk [vmem:[#allocation3 + $0x34] sm:$0xf] %vm1683_vm0, %v1775_v1  ;;  %v2691_v54 = vsel %vm2135_vm1, %v4014_v5, 0 }
 0x34b   : > { %1852 = vst.msk [vmem:[#allocation3 + $0x20] sm:$0xf] %vm1683_vm0, %v1765_v19  ;;  %2693 = vmatpush.bf16.xpose.msra.mxu2 %v2691_v54  ;;  %v1974_v19 = vadd.s32 8, %v5481_v63 }
 0x34d   : > { %vm1992_vm3 = vcmp.le.s32.totalorder %v5483_v45, %v1974_v19 }
 0x351   : > { %v1769_v17 = vpop.permute.xlu0 %1768  ;;  %v1791_v30 = vpop.permute.xlu1 %1790  ;;  %v3989_v57 = vld [vmem:[#allocation3 + $0x30] sm:$0xff] }
 0x352   : > { %1854 = vst.msk [vmem:[#allocation3 + $0x28] sm:$0xf] %vm1683_vm0, %v1769_v17  ;;  %v2179_v16 = vsel %vm2135_vm1, %v3989_v57, 0  ;;  %v3987_v32 = vld [vmem:[#allocation3 + $0x20] sm:$0xff]  ;;  %v1976_v57 = vadd.s32 24, %v5481_v63 }
 0x353   : > { %1865 = vst.msk [vmem:[#allocation3 + $0x54] sm:$0xf] %vm1683_vm0, %v1791_v30  ;;  %2185 = vmatpush.bf16.xpose.msra.mxu0 %v2179_v16  ;;  %2694 = vmatpush.bf16.xpose.msra.mxu2 %v2688_v23  ;;  %v2173_v41 = vsel %vm2135_vm1, %v3987_v32, 0 }
 0x354   : > { %vm1994_vm5 = vcmp.le.s32.totalorder %v5483_v45, %v1976_v57 }
 0x359   : > { %v1795_v59 = vpop.permute.xlu0 %1794  ;;  %v1785_v61 = vpop.permute.xlu1 %1784  ;;  %v3988_v36 = vld [vmem:[#allocation3 + $0x28] sm:$0xff] }
 0x35a   : > { %1867 = vst.msk [vmem:[#allocation3 + $0x5c] sm:$0xf] %vm1683_vm0, %v1795_v59  ;;  %v2176_v25 = vsel %vm2135_vm1, %v3988_v36, 0 }
 0x35b   : > { %1862 = vst.msk [vmem:[#allocation3 + $0x48] sm:$0xf] %vm1683_vm0, %v1785_v61  ;;  %2186 = vmatpush.bf16.xpose.msra.mxu0 %v2176_v25  ;;  %2695 = vmatpush.bf16.xpose.msra.mxu2 %v2685_v26  ;;  %v5518_v25 = vadd.s32 32, %v5481_v63  ;;  %v5521_v26 = vadd.s32 40, %v5481_v63 }
 0x35d   : > { %vm1995_vm6 = vcmp.le.s32.totalorder %v5483_v45, %v5518_v25  ;;  %vm1996_vm7 = vcmp.le.s32.totalorder %v5483_v45, %v5521_v26 }
 0x361   : > { %v1789_v7 = vpop.permute.xlu0 %1788  ;;  %v1759_v49 = vpop.permute.xlu1 %1758  ;;  %v4010_v47 = vld [vmem:[#allocation3 + $0x58] sm:$0xff] }
 0x362   : > { %1864 = vst.msk [vmem:[#allocation3 + $0x50] sm:$0xf] %vm1683_vm0, %v1789_v7  ;;  %v2679_v42 = vsel %vm2135_vm1, %v4010_v47, 0  ;;  %v4008_v29 = vld [vmem:[#allocation3 + $0x48] sm:$0xff] }
 0x363   : > { %1849 = vst.msk [vmem:[#allocation3 + $0x14] sm:$0xf] %vm1683_vm0, %v1759_v49  ;;  %2187 = vmatpush.bf16.xpose.msra.mxu0 %v2173_v41  ;;  %2696 = vmatpush.bf16.xpose.msra.mxu2 %v2682_v9  ;;  %v2673_v28 = vsel %vm2135_vm1, %v4008_v29, 0 }
 0x369   : > { %v1763_v10 = vpop.permute.xlu0 %1762  ;;  %v1753_v6 = vpop.permute.xlu1 %1752  ;;  %v4009_v15 = vld [vmem:[#allocation3 + $0x50] sm:$0xff] }
 0x36a   : > { %1851 = vst.msk [vmem:[#allocation3 + $0x1c] sm:$0xf] %vm1683_vm0, %v1763_v10  ;;  %v2676_v62 = vsel %vm2135_vm1, %v4009_v15, 0  ;;  %v1979_v10 = vadd.s32 48, %v5481_v63 }
 0x36b   : > { %1846 = vst.msk [vmem:[#allocation3 + $0x8] sm:$0xf] %vm1683_vm0, %v1753_v6  ;;  %2697 = vmatpush.bf16.xpose.msra.mxu2 %v2679_v42  ;;  %v1980_v6 = vadd.s32 56, %v5481_v63 }
 0x36c   : > { %vm1997_vm8 = vcmp.le.s32.totalorder %v5483_v45, %v1979_v10 }
 0x36d   : > { %vm1998_vm9 = vcmp.le.s32.totalorder %v5483_v45, %v1980_v6  ;;  %v1984_v6 = vadd.s32 88, %v5481_v63 }
 0x36f   : > { %vm2002_vm14 = vcmp.le.s32.totalorder %v5483_v45, %v1984_v6 }
 0x371   : > { %v1757_v21 = vpop.permute.xlu0 %1756  ;;  %v1751_v13 = vpop.permute.xlu1 %1750  ;;  %v3986_v37 = vld [vmem:[#allocation3 + $0x18] sm:$0xff] }
 0x372   : > { %1848 = vst.msk [vmem:[#allocation3 + $0x10] sm:$0xf] %vm1683_vm0, %v1757_v21  ;;  %v2170_v50 = vsel %vm2135_vm1, %v3986_v37, 0  ;;  %v3984_v0 = vld [vmem:[#allocation3 + $0x8] sm:$0xff] }
 0x373   : > { %1845 = vst.msk [vmem:[#allocation3 + $0x4] sm:$0xf] %vm1683_vm0, %v1751_v13  ;;  %2188 = vmatpush.bf16.xpose.msra.mxu0 %v2170_v50  ;;  %2698 = vmatpush.bf16.xpose.msra.mxu2 %v2676_v62  ;;  %v2164_v33 = vsel %vm2135_vm1, %v3984_v0, 0 }
 0x379   : > { %v1783_v56 = vpop.permute.xlu0 %1782  ;;  %v3985_v38 = vld [vmem:[#allocation3 + $0x10] sm:$0xff] }
 0x37a   : > { %1861 = vst.msk [vmem:[#allocation3 + $0x44] sm:$0xf] %vm1683_vm0, %v1783_v56  ;;  %v2167_v4 = vsel %vm2135_vm1, %v3985_v38, 0  ;;  %v5573_v38 = vadd.s32 96, %v5481_v63 }
 0x37b   : > { %2189 = vmatpush.bf16.xpose.msra.mxu0 %v2167_v4  ;;  %2699 = vmatpush.bf16.xpose.msra.mxu2 %v2673_v28 }
 0x37c   : > { %vm2003_vm10 = vcmp.le.s32.totalorder %v5483_v45, %v5573_v38 }
 0x381   : > { %v1749_v24 = vpop.permute.xlu0 %1748  ;;  %v4007_v18 = vld [vmem:[#allocation3 + $0x40] sm:$0xff] }
 0x382   : > { %1844 = vst.msk [vmem:[#allocation3] sm:$0xf] %vm1683_vm0, %v1749_v24  ;;  %v2670_v8 = vsel %vm2135_vm1, %v4007_v18, 0 }
 0x383   : > { %2190 = vmatpush.bf16.xpose.msra.mxu0 %v2164_v33  ;;  %2700 = vmatpush.bf16.xpose.msra.mxu2 %v2670_v8 }
 0x389   : > { %v3983_v31 = vld [vmem:[#allocation3] sm:$0xff] }
 0x38a   : > { %3786 = vmatmul.msk.bf16.vlgmr.msra.gmra.mxu2 %vm2135_vm1, %v3999_v44  ;;  %v2161_v14 = vsel %vm2135_vm1, %v3983_v31, 0 }
 0x38b   : > { %2191 = vmatpush.bf16.xpose.msra.mxu0 %v2161_v14 }
 0x392   : > { %3682 = vmatmul.msk.bf16.vlgmr.msra.gmra.mxu0 %vm2135_vm1, %v3975_v11 }
 0x39a   : > { %3787 = vmatmul.msk.bf16.gmra.mxu2 %vm2135_vm1, %v4000_v55 }
 0x3a2   : > { %3683 = vmatmul.msk.bf16.gmra.mxu0 %vm2135_vm1, %v3976_v48 }
 0x3aa   : > { %3788 = vmatmul.msk.bf16.gmra.mxu2 %vm2135_vm1, %v4001_v34  ;;  %v1981_v34 = vadd.s32 64, %v5481_v63 }
 0x3ac   : > { %vm1999_vm11 = vcmp.le.s32.totalorder %v5483_v45, %v1981_v34 }
 0x3b2   : > { %3684 = vmatmul.msk.bf16.gmra.mxu0 %vm2135_vm1, %v3977_v40 }
 0x3ba   : > { %3789 = vmatmul.msk.bf16.gmra.mxu2 %vm2135_vm1, %v4002_v53 }
 0x3c2   : > { %3685 = vmatmul.msk.bf16.gmra.mxu0 %vm2135_vm1, %v3978_v52 }
 0x3ca   : > { %3790 = vmatmul.msk.bf16.gmra.mxu2 %vm2135_vm1, %v4003_v27 }
 0x3d2   : > { %3686 = vmatmul.msk.bf16.gmra.mxu0 %vm2135_vm1, %v3979_v58 }
 0x3da   : > { %3791 = vmatmul.msk.bf16.gmra.mxu2 %vm2135_vm1, %v4004_v2 }
 0x3e2   : > { %3687 = vmatmul.msk.bf16.gmra.mxu0 %vm2135_vm1, %v3980_v22  ;;  %v1982_v22 = vadd.s32 72, %v5481_v63 }
 0x3e4   : > { %vm2000_vm12 = vcmp.le.s32.totalorder %v5483_v45, %v1982_v22 }
 0x3ea   : > { %3792 = vmatmul.msk.bf16.gmra.mxu2 %vm2135_vm1, %v4005_v3 }
 0x3f2   : > { %3688 = vmatmul.msk.bf16.gmra.mxu0 %vm2135_vm1, %v3981_v20 }
 0x3fa   : > { %3793 = vmatmul.msk.bf16.gmra.mxu2 %vm2135_vm1, %v4006_v12 }
 0x402   : > { %3689 = vmatmul.msk.bf16.gmra.mxu0 %vm2135_vm1, %v3982_v39 }
 0x40d   : > { %v2702_v35 = vpop.f32.mrf.mxu2 }
 0x40e   : > { %v5514_v61 = vsel %vm1991_vm2, %v2702_v35, -inf }
 0x40f   : > { %v2193_v60 = vpop.f32.mrf.mxu0 }
 0x410   : > { %v2233_v1 = vsel %vm1991_vm2, %v2193_v60, -inf }
 0x411   : > { %2249 = vmax.xlane.f32.xlu1 %v2233_v1 }
 0x415   : > { %v2704_v36 = vpop.f32.mrf.mxu2 }
 0x416   : > { %v5545_v47 = vsel %vm1992_vm3, %v2704_v36, -inf }
 0x417   : > { %v2195_v5 = vpop.f32.mrf.mxu0 }
 0x418   : > { %v5494_v54 = vsel %vm1992_vm3, %v2195_v5, -inf }
 0x419   : > { %2251 = vmax.xlane.f32.xlu2 %v5494_v54 }
 0x41d   : > { %v2707_v49 = vpop.f32.mrf.mxu2 }
 0x41e   : > { %v5541_v9 = vsel %vm1993_vm4, %v2707_v49, -inf }
 0x41f   : > { %v2198_v17 = vpop.f32.mrf.mxu0 }
 0x420   : > { %v5501_v30 = vsel %vm1993_vm4, %v2198_v17, -inf }
 0x421   : > { %2253 = vmax.xlane.f32.xlu1 %v5501_v30 }
 0x425   : > { %v2709_v13 = vpop.f32.mrf.mxu2 }
 0x426   : > { %v5565_v50 = vsel %vm1994_vm5, %v2709_v13, -inf }
 0x427   : > { %v2200_v16 = vpop.f32.mrf.mxu0 }
 0x428   : > { %v5508_v23 = vsel %vm1994_vm5, %v2200_v16, -inf }
 0x429   : > { %2255 = vmax.xlane.f32.xlu2 %v5508_v23 }
 0x42d   : > { %v2712_v0 = vpop.f32.mrf.mxu2 }
 0x42f   : > { %v2203_v59 = vpop.f32.mrf.mxu0 }
 0x430   : > { %v5530_v51 = vsel %vm1995_vm6, %v2203_v59, -inf }
 0x431   : > { %2758 = vmax.xlane.f32.xlu2 %v5514_v61 }
 0x435   : > { %v2714_v24 = vpop.f32.mrf.mxu2 }
 0x436   : > { %v5603_v12 = vsel %vm1996_vm7, %v2714_v24, -inf }
 0x437   : > { %v2205_v32 = vpop.f32.mrf.mxu0 }
 0x438   : > { %v5535_v7 = vsel %vm1996_vm7, %v2205_v32, -inf }
 0x439   : > { %2257 = vmax.xlane.f32.xlu2 %v5530_v51  ;;  %2259 = vmax.xlane.f32.xlu0 %v5535_v7 }
 0x43d   : > { %v2717_v33 = vpop.f32.mrf.mxu2 }
 0x43e   : > { %v5620_v19 = vsel %vm1997_vm8, %v2717_v33, -inf }
 0x43f   : > { %v2208_v41 = vpop.f32.mrf.mxu0 }
 0x440   : > { %v5555_v15 = vsel %vm1997_vm8, %v2208_v41, -inf }
 0x441   : > { %2762 = vmax.xlane.f32.xlu2 %v5541_v9  ;;  %2760 = vmax.xlane.f32.xlu0 %v5545_v47 }
 0x445   : > { %v2719_v55 = vpop.f32.mrf.mxu2 }
 0x446   : > { %v5626_v5 = vsel %vm1998_vm9, %v2719_v55, -inf }
 0x447   : > { %v2210_v42 = vpop.f32.mrf.mxu0 }
 0x448   : > { %v5559_v21 = vsel %vm1998_vm9, %v2210_v42, -inf }
 0x449   : > { %2261 = vmax.xlane.f32.xlu2 %v5555_v15  ;;  %2263 = vmax.xlane.f32.xlu0 %v5559_v21 }
 0x44d   : > { %v2722_v2 = vpop.f32.mrf.mxu2 }
 0x44e   : > { %v5634_v35 = vsel %vm1999_vm11, %v2722_v2, -inf }
 0x44f   : > { %v2213_v37 = vpop.f32.mrf.mxu0 }
 0x450   : > { %v5593_v58 = vsel %vm1999_vm11, %v2213_v37, -inf }
 0x451   : > { %2764 = vmax.xlane.f32.xlu0 %v5565_v50 }
 0x455   : > { %v2724_v43 = vpop.f32.mrf.mxu2 }
 0x456   : > { %v5638_v59 = vsel %vm2000_vm12, %v2724_v43, -inf }
 0x457   : > { %v2215_v62 = vpop.f32.mrf.mxu0 }
 0x458   : > { %v5610_v39 = vsel %vm2000_vm12, %v2215_v62, -inf }
 0x45d   : > { %v2727_v57 = vpop.f32.mrf.mxu2 }
 0x45f   : > { %v5568_v29 = vpop.f32.mrf.mxu0 }
 0x465   : > { %v2729_v37 = vpop.f32.mrf.mxu2 }
 0x467   : > { %v5570_v56 = vpop.f32.mrf.mxu0 }
 0x46f   : > { %v2223_v4 = vpop.f32.mrf.mxu0 }
 0x470   : > { %v5580_v28 = vsel %vm2003_vm10, %v2223_v4, -inf }
 0x484   : > { %v2250_v18 = vpop.xlane.xlu1 %2249 }
 0x485   : > { %v2281_v8 = vsub.f32 %v2233_v1, %v2250_v18  ;;  %v5616_v1 = vsel %vm1995_vm6, %v2712_v0, -inf  ;;  %v5662_v0 = vsel %vm2002_vm14, %v2729_v37, -inf }
 0x487   : > { %v2297_v44 = vmul.f32 1.442695, %v2281_v8 }
 0x489   : > { %4065 = vpow2.f32 %v2297_v44 }
 0x48c   : > { %v2252_v31 = vpop.xlane.xlu2 %2251 }
 0x48d   : > { %v2282_v14 = vsub.f32 %v5494_v54, %v2252_v31  ;;  %v5682_v31 = vsel %vm2002_vm14, %v5570_v56, -inf  ;;  %v1986_v56 = vadd.s32 104, %v5481_v63 }
 0x48f   : > { %v5583_v11 = vpop.eup %4065  ;;  %v2299_v48 = vmul.f32 1.442695, %v2282_v14  ;;  %v2732_v14 = vpop.f32.mrf.mxu2  ;;  %vm2004_vm15 = vcmp.le.s32.totalorder %v5483_v45, %v1986_v56 }
 0x490   : > { %2329 = vadd.xlane.f32.xlu1 %v5583_v11  ;;  %v5695_v34 = vsel %vm2003_vm10, %v2732_v14, -inf }
 0x491   : > { %4067 = vpow2.f32 %v2299_v48  ;;  %v5689_v48 = vsel %vm2001_vm13, %v5568_v29, -inf }
 0x494   : > { %v2254_v40 = vpop.xlane.xlu1 %2253 }
 0x495   : > { %v2283_v53 = vsub.f32 %v5501_v30, %v2254_v40  ;;  %v2225_v40 = vpop.f32.mrf.mxu0 }
 0x496   : > { %v5705_v29 = vsel %vm2004_vm15, %v2225_v40, -inf }
 0x497   : > { %v5589_v52 = vpop.eup %4067  ;;  %v2301_v27 = vmul.f32 1.442695, %v2283_v53 }
 0x498   : > { %2331 = vadd.xlane.f32.xlu2 %v5589_v52  ;;  %2265 = vmax.xlane.f32.xlu1 %v5593_v58 }
 0x499   : > { %4069 = vpow2.f32 %v2301_v27 }
 0x49c   : > { %v2256_v3 = vpop.xlane.xlu2 %2255 }
 0x49d   : > { %v2284_v13 = vsub.f32 %v5508_v23, %v2256_v3 }
 0x49f   : > { %v5598_v20 = vpop.eup %4069 }
 0x4a0   : > { %2333 = vadd.xlane.f32.xlu0 %v5598_v20  ;;  %2768 = vmax.xlane.f32.xlu1 %v5603_v12 }
 0x4a1   : > { %2267 = vmax.xlane.f32.xlu2 %v5610_v39 }
 0x4a4   : > { %v2759_v60 = vpop.xlane.xlu2 %2758 }
 0x4a5   : > { %v2790_v54 = vsub.f32 %v5514_v61, %v2759_v60  ;;  %v5644_v61 = vsel %vm2001_vm13, %v2727_v57, -inf }
 0x4a7   : > { %v2806_v16 = vmul.f32 1.442695, %v2790_v54 }
 0x4a8   : > { %2766 = vmax.xlane.f32.xlu0 %v5616_v1  ;;  %2770 = vmax.xlane.f32.xlu1 %v5620_v19 }
 0x4a9   : > { %2772 = vmax.xlane.f32.xlu2 %v5626_v5  ;;  %4071 = vpow2.f32 %v2806_v16 }
 0x4ac   : > { %v2258_v17 = vpop.xlane.xlu2 %2257  ;;  %v2260_v30 = vpop.xlane.xlu0 %2259 }
 0x4ad   : > { %v2285_v42 = vsub.f32 %v5530_v51, %v2258_v17 }
 0x4af   : > { %v5649_v49 = vpop.eup %4071 }
 0x4b0   : > { %2774 = vmax.xlane.f32.xlu0 %v5634_v35  ;;  %2776 = vmax.xlane.f32.xlu1 %v5638_v59 }
 0x4b1   : > { %2778 = vmax.xlane.f32.xlu2 %v5644_v61 }
 0x4b4   : > { %v2763_v36 = vpop.xlane.xlu2 %2762  ;;  %v2761_v25 = vpop.xlane.xlu0 %2760 }
 0x4b5   : > { %v2792_v26 = vsub.f32 %v5541_v9, %v2763_v36  ;;  %v2791_v32 = vsub.f32 %v5545_v47, %v2761_v25  ;;  %v2305_v9 = vmul.f32 1.442695, %v2285_v42  ;;  %v2303_v47 = vmul.f32 1.442695, %v2284_v13 }
 0x4b7   : > { %v2810_v41 = vmul.f32 1.442695, %v2792_v26  ;;  %v2808_v10 = vmul.f32 1.442695, %v2791_v32 }
 0x4b8   : > { %2838 = vadd.xlane.f32.xlu0 %v5649_v49 }
 0x4b9   : > { %4073 = vpow2.f32 %v2810_v41 }
 0x4ba   : > { %4075 = vpow2.f32 %v2808_v10  ;;  %v2734_v10 = vpop.f32.mrf.mxu2 }
 0x4bb   : > { %4077 = vpow2.f32 %v2305_v9 }
 0x4bc   : > { %v5655_v62 = vpop.xlane.xlu0 %2263  ;;  %4079 = vpow2.f32 %v2303_v47  ;;  %v2262_v38 = vpop.xlane.xlu2 %2261 }
 0x4bd   : > { %v2288_v47 = vsub.f32 %v5559_v21, %v5655_v62 }
 0x4bf   : > { %v5658_v4 = vpop.eup %4073 }
 0x4c0   : > { %v5664_v24 = vpop.eup %4075  ;;  %2780 = vmax.xlane.f32.xlu0 %v5662_v0  ;;  %2842 = vadd.xlane.f32.xlu2 %v5658_v4 }
 0x4c1   : > { %2840 = vadd.xlane.f32.xlu1 %v5664_v24  ;;  %v5670_v18 = vpop.eup %4077 }
 0x4c2   : > { %v5672_v8 = vpop.eup %4079 }
 0x4c4   : > { %v2765_v23 = vpop.xlane.xlu0 %2764 }
 0x4c5   : > { %v2793_v51 = vsub.f32 %v5565_v50, %v2765_v23  ;;  %v2286_v50 = vsub.f32 %v5535_v7, %v2260_v30  ;;  %v5736_v23 = vadd.s32 112, %v5481_v63 }
 0x4c7   : > { %v2812_v33 = vmul.f32 1.442695, %v2793_v51  ;;  %v2307_v55 = vmul.f32 1.442695, %v2286_v50  ;;  %v2737_v50 = vpop.f32.mrf.mxu2  ;;  %vm2005_vm0 = vcmp.le.s32.totalorder %v5483_v45, %v5736_v23 }
 0x4c8   : > { %2337 = vadd.xlane.f32.xlu2 %v5670_v18 }
 0x4c9   : > { %4081 = vpow2.f32 %v2812_v33  ;;  %2335 = vadd.xlane.f32.xlu1 %v5672_v8  ;;  %v2311_v33 = vmul.f32 1.442695, %v2288_v47 }
 0x4ca   : > { %4083 = vpow2.f32 %v2307_v55 }
 0x4cf   : > { %v5676_v44 = vpop.eup %4081 }
 0x4d0   : > { %2844 = vadd.xlane.f32.xlu0 %v5676_v44  ;;  %v5698_v7 = vpop.eup %4083 }
 0x4d1   : > { %2271 = vmax.xlane.f32.xlu1 %v5682_v31 }
 0x4d8   : > { %2269 = vmax.xlane.f32.xlu0 %v5689_v48 }
 0x4d9   : > { %2782 = vmax.xlane.f32.xlu1 %v5695_v34 }
 0x4e0   : > { %2339 = vadd.xlane.f32.xlu0 %v5698_v7 }
 0x4e8   : > { %2275 = vmax.xlane.f32.xlu0 %v5705_v29 }
 0x503   : > { %v2330_v53 = vpop.xlane.xlu1 %2329 }
 0x504   : > { %4085 = vrcp.f32 %v2330_v53 }
 0x50a   : > { %v4086_v22 = vpop.eup %4085 }
 0x50b   : > { %v2332_v27 = vpop.xlane.xlu2 %2331  ;;  %v2266_v2 = vpop.xlane.xlu1 %2265  ;;  %v2377_v43 = vmul.f32 %v4086_v22, %v5583_v11 }
 0x50c   : > { %4087 = vrcp.f32 %v2332_v27  ;;  %v2289_v56 = vsub.f32 %v5593_v58, %v2266_v2  ;;  %v1988_v58 = vadd.s32 120, %v5481_v63  ;;  %v2228_v2 = vpop.f32.mrf.mxu0 }
 0x50e   : > { %v2313_v27 = vmul.f32 1.442695, %v2289_v56  ;;  %vm2006_vm2 = vcmp.le.s32.totalorder %v5483_v45, %v1988_v58 }
 0x512   : > { %v4088_v3 = vpop.eup %4087 }
 0x513   : > { %v2378_v60 = vmul.f32 %v4088_v3, %v5589_v52  ;;  %v5710_v54 = vpop.xlane.xlu0 %2333  ;;  %v2769_v46 = vpop.xlane.xlu1 %2768 }
 0x514   : > { %v2795_v17 = vsub.f32 %v5603_v12, %v2769_v46  ;;  %v5713_v16 = vpop.xlane.xlu2 %2267  ;;  %v2287_v12 = vsub.f32 %v5555_v15, %v2262_v38 }
 0x515   : > { %v2393_v30 = vpack.c.bf16 %v2378_v60, %v2377_v43 }
 0x516   : > { %v2816_v57 = vmul.f32 1.442695, %v2795_v17  ;;  %v2309_v42 = vmul.f32 1.442695, %v2287_v12 }
 0x517   : > { %2457 = vmatmul.bf16.vlgmr.msra.gmra.mxu1 %v2393_v30  ;;  %v2739_v30 = vpop.f32.mrf.mxu2 }
 0x518   : > { %4089 = vpow2.f32 %v2816_v57 }
 0x51b   : > { %v2767_v36 = vpop.xlane.xlu0 %2766  ;;  %v2771_v25 = vpop.xlane.xlu1 %2770 }
 0x51c   : > { %v2794_v26 = vsub.f32 %v5616_v1, %v2767_v36  ;;  %v2796_v32 = vsub.f32 %v5620_v19, %v2771_v25  ;;  %v2773_v13 = vpop.xlane.xlu2 %2772  ;;  %v5725_v1 = vsel %vm2004_vm15, %v2734_v10, -inf  ;;  %v2230_v10 = vpop.f32.mrf.mxu0 }
 0x51d   : > { %v2797_v15 = vsub.f32 %v5626_v5, %v2773_v13  ;;  %v5748_v5 = vsel %vm2005_vm0, %v2737_v50, -inf }
 0x51e   : > { %v5717_v11 = vpop.eup %4089  ;;  %v2814_v52 = vmul.f32 1.442695, %v2794_v26  ;;  %v2818_v41 = vmul.f32 1.442695, %v2796_v32 }
 0x51f   : > { %2848 = vadd.xlane.f32.xlu2 %v5717_v11  ;;  %v2820_v14 = vmul.f32 1.442695, %v2797_v15  ;;  %v5791_v15 = vsel %vm2006_vm2, %v2230_v10, -inf }
 0x520   : > { %4091 = vpow2.f32 %v2814_v52  ;;  %v5772_v52 = vsel %vm2006_vm2, %v2739_v30, -inf }
 0x521   : > { %4093 = vpow2.f32 %v2818_v41 }
 0x522   : > { %4095 = vpow2.f32 %v2309_v42 }
 0x523   : > { %v2775_v6 = vpop.xlane.xlu0 %2774  ;;  %v2777_v9 = vpop.xlane.xlu1 %2776  ;;  %4097 = vpow2.f32 %v2311_v33 }
 0x524   : > { %v2799_v51 = vsub.f32 %v5638_v59, %v2777_v9  ;;  %4099 = vpow2.f32 %v2820_v14  ;;  %v2798_v59 = vsub.f32 %v5634_v35, %v2775_v6  ;;  %v2779_v60 = vpop.xlane.xlu2 %2778 }
 0x526   : > { %v5721_v37 = vpop.eup %4091  ;;  %v2824_v21 = vmul.f32 1.442695, %v2799_v51  ;;  %v2822_v40 = vmul.f32 1.442695, %v2798_v59 }
 0x527   : > { %v5727_v19 = vpop.eup %4093  ;;  %2784 = vmax.xlane.f32.xlu2 %v5725_v1  ;;  %2846 = vadd.xlane.f32.xlu1 %v5721_v37 }
 0x528   : > { %2850 = vadd.xlane.f32.xlu0 %v5727_v19  ;;  %v5741_v62 = vpop.eup %4095  ;;  %4101 = vpow2.f32 %v2824_v21 }
 0x529   : > { %v5753_v53 = vpop.eup %4097 }
 0x52a   : > { %v5755_v22 = vpop.eup %4099 }
 0x52b   : > { %v2839_v55 = vpop.xlane.xlu0 %2838 }
 0x52c   : > { %4103 = vrcp.f32 %v2839_v55 }
 0x52e   : > { %v5757_v43 = vpop.eup %4101 }
 0x52f   : > { %2341 = vadd.xlane.f32.xlu1 %v5741_v62  ;;  %2273 = vmax.xlane.f32.xlu2 %v5580_v28 }
 0x530   : > { %2786 = vmax.xlane.f32.xlu0 %v5748_v5 }
 0x532   : > { %v4104_v35 = vpop.eup %4103 }
 0x533   : > { %v2781_v3 = vpop.xlane.xlu0 %2780  ;;  %v2886_v57 = vmul.f32 %v4104_v35, %v5649_v49  ;;  %v2843_v41 = vpop.xlane.xlu2 %2842  ;;  %v2800_v49 = vsub.f32 %v5644_v61, %v2779_v60  ;;  %v5787_v61 = vsel %vm2005_vm0, %v2228_v2, -inf }
 0x534   : > { %v2841_v38 = vpop.xlane.xlu1 %2840  ;;  %v2801_v46 = vsub.f32 %v5662_v0, %v2781_v3 }
 0x535   : > { %4105 = vrcp.f32 %v2841_v38  ;;  %v2826_v13 = vmul.f32 1.442695, %v2800_v49 }
 0x536   : > { %4107 = vpow2.f32 %v2822_v40  ;;  %v2828_v63 = vmul.f32 1.442695, %v2801_v46 }
 0x537   : > { %2852 = vadd.xlane.f32.xlu1 %v5755_v22  ;;  %2343 = vadd.xlane.f32.xlu2 %v5753_v53  ;;  %4109 = vpow2.f32 %v2313_v27 }
 0x538   : > { %2856 = vadd.xlane.f32.xlu0 %v5757_v43  ;;  %4111 = vrcp.f32 %v5710_v54  ;;  %v2290_v54 = vsub.f32 %v5610_v39, %v5713_v16 }
 0x53a   : > { %v2315_v6 = vmul.f32 1.442695, %v2290_v54 }
 0x53b   : > { %v4106_v17 = vpop.eup %4105  ;;  %v2338_v27 = vpop.xlane.xlu2 %2337 }
 0x53c   : > { %v2887_v36 = vmul.f32 %v4106_v17, %v5664_v24  ;;  %v2336_v25 = vpop.xlane.xlu1 %2335  ;;  %v5768_v26 = vpop.eup %4107 }
 0x53d   : > { %4113 = vrcp.f32 %v2336_v25  ;;  %v5774_v0 = vpop.eup %4109 }
 0x53e   : > { %v2902_v32 = vpack.c.bf16 %v2887_v36, %v2886_v57  ;;  %v4112_v24 = vpop.eup %4111  ;;  %4115 = vpow2.f32 %v2828_v63 }
 0x53f   : > { %2788 = vmax.xlane.f32.xlu1 %v5772_v52  ;;  %2854 = vadd.xlane.f32.xlu2 %v5768_v26  ;;  %4117 = vrcp.f32 %v2843_v41  ;;  %v2379_v16 = vmul.f32 %v4112_v24, %v5598_v20 }
 0x540   : > { %2966 = vmatmul.bf16.vlgmr.msra.gmra.mxu3 %v2902_v32  ;;  %2345 = vadd.xlane.f32.xlu0 %v5774_v0 }
 0x543   : > { %v4114_v12 = vpop.eup %4113  ;;  %v2845_v42 = vpop.xlane.xlu0 %2844 }
 0x544   : > { %4119 = vrcp.f32 %v2845_v42  ;;  %v2272_v39 = vpop.xlane.xlu1 %2271  ;;  %v2380_v9 = vmul.f32 %v4114_v12, %v5672_v8  ;;  %v5793_v51 = vpop.eup %4115 }
 0x545   : > { %4121 = vpow2.f32 %v2315_v6  ;;  %v2292_v33 = vsub.f32 %v5682_v31, %v2272_v39  ;;  %v4118_v20 = vpop.eup %4117 }
 0x546   : > { %v2394_v47 = vpack.c.bf16 %v2380_v9, %v2379_v16  ;;  %4123 = vpow2.f32 %v2826_v13  ;;  %v2888_v45 = vmul.f32 %v4118_v20, %v5658_v4 }
 0x547   : > { %2277 = vmax.xlane.f32.xlu1 %v5787_v61  ;;  %2279 = vmax.xlane.f32.xlu2 %v5791_v15  ;;  %v2319_v23 = vmul.f32 1.442695, %v2292_v33 }
 0x548   : > { %2462 = vmatmul.bf16.gmra.mxu1 %v2394_v47  ;;  %2860 = vadd.xlane.f32.xlu0 %v5793_v51 }
 0x549   : > { %4125 = vpow2.f32 %v2319_v23 }
 0x54a   : > { %v4120_v8 = vpop.eup %4119 }
 0x54b   : > { %v2270_v50 = vpop.xlane.xlu0 %2269  ;;  %v2889_v14 = vmul.f32 %v4120_v8, %v5676_v44  ;;  %v5802_v31 = vpop.eup %4121 }
 0x54c   : > { %v2291_v55 = vsub.f32 %v5689_v48, %v2270_v50  ;;  %v2783_v21 = vpop.xlane.xlu1 %2782  ;;  %v5805_v40 = vpop.eup %4123 }
 0x54d   : > { %v2802_v59 = vsub.f32 %v5695_v34, %v2783_v21  ;;  %v2903_v56 = vpack.c.bf16 %v2889_v14, %v2888_v45 }
 0x54e   : > { %v2317_v38 = vmul.f32 1.442695, %v2291_v55 }
 0x54f   : > { %v2830_v3 = vmul.f32 1.442695, %v2802_v59  ;;  %2347 = vadd.xlane.f32.xlu1 %v5802_v31  ;;  %2858 = vadd.xlane.f32.xlu2 %v5805_v40  ;;  %v5809_v44 = vpop.eup %4125 }
 0x550   : > { %4127 = vpow2.f32 %v2317_v38  ;;  %2971 = vmatmul.bf16.gmra.mxu3 %v2903_v56 }
 0x551   : > { %4129 = vpow2.f32 %v2830_v3 }
 0x552   : > { %4131 = vrcp.f32 %v2338_v27 }
 0x553   : > { %v2340_v4 = vpop.xlane.xlu0 %2339 }
 0x554   : > { %4133 = vrcp.f32 %v2340_v4 }
 0x556   : > { %v5811_v48 = vpop.eup %4127 }
 0x557   : > { %v5813_v34 = vpop.eup %4129  ;;  %2349 = vadd.xlane.f32.xlu1 %v5811_v48  ;;  %2351 = vadd.xlane.f32.xlu2 %v5809_v44 }
 0x558   : > { %v4132_v60 = vpop.eup %4131  ;;  %2862 = vadd.xlane.f32.xlu0 %v5813_v34 }
 0x559   : > { %v2381_v2 = vmul.f32 %v4132_v60, %v5670_v18 }
 0x55a   : > { %v4134_v58 = vpop.eup %4133 }
 0x55b   : > { %v2276_v35 = vpop.xlane.xlu0 %2275  ;;  %v2382_v46 = vmul.f32 %v4134_v58, %v5698_v7 }
 0x55c   : > { %v2294_v17 = vsub.f32 %v5705_v29, %v2276_v35 }
 0x55d   : > { %v2395_v30 = vpack.c.bf16 %v2382_v46, %v2381_v2 }
 0x55e   : > { %v2323_v57 = vmul.f32 1.442695, %v2294_v17 }
 0x55f   : > { %2467 = vmatmul.bf16.gmra.mxu1 %v2395_v30 }
 0x560   : > { %4135 = vpow2.f32 %v2323_v57 }
 0x566   : > { %v5821_v36 = vpop.eup %4135 }
 0x567   : > { %2355 = vadd.xlane.f32.xlu0 %v5821_v36 }
 0x592   : > { %v2849_v25 = vpop.xlane.xlu2 %2848 }
 0x593   : > { %4137 = vrcp.f32 %v2849_v25 }
 0x594   : > { %v2458_v18 = vpop.f32.mrf.mxu1 }
 0x595   : > { %2498 = vst.msk [vmem:[%s5829_s3] sm:$0xff] %vm2135_vm1, %v2458_v18 }
 0x599   : > { %v4138_v49 = vpop.eup %4137 }
 0x59a   : > { %v2785_v7 = vpop.xlane.xlu2 %2784  ;;  %v2847_v29 = vpop.xlane.xlu1 %2846  ;;  %v2891_v42 = vmul.f32 %v4138_v49, %v5717_v11 }
 0x59b   : > { %v2803_v63 = vsub.f32 %v5725_v1, %v2785_v7  ;;  %4139 = vrcp.f32 %v2847_v29  ;;  %v2851_v32 = vpop.xlane.xlu0 %2850 }
 0x59c   : > { %v2460_v54 = vpop.f32.mrf.mxu1 }
 0x59d   : > { %v2832_v41 = vmul.f32 1.442695, %v2803_v63  ;;  %2499 = vst.msk [vmem:[%s5829_s3 + $0x8] sm:$0xff] %vm2135_vm1, %v2460_v54 }
 0x59f   : > { %4141 = vpow2.f32 %v2832_v41 }
 0x5a1   : > { %v4140_v24 = vpop.eup %4139 }
 0x5a2   : > { %v2342_v12 = vpop.xlane.xlu1 %2341  ;;  %v2274_v10 = vpop.xlane.xlu2 %2273  ;;  %v2890_v6 = vmul.f32 %v4140_v24, %v5721_v37 }
 0x5a3   : > { %v2293_v13 = vsub.f32 %v5580_v28, %v2274_v10  ;;  %v2787_v39 = vpop.xlane.xlu0 %2786 }
 0x5a4   : > { %v2804_v1 = vsub.f32 %v5748_v5, %v2787_v39  ;;  %v2904_v16 = vpack.c.bf16 %v2891_v42, %v2890_v6 }
 0x5a5   : > { %v5840_v9 = vpop.eup %4141  ;;  %v2321_v47 = vmul.f32 1.442695, %v2293_v13 }
 0x5a6   : > { %v2834_v33 = vmul.f32 1.442695, %v2804_v1  ;;  %2976 = vmatmul.bf16.gmra.mxu3 %v2904_v16  ;;  %2864 = vadd.xlane.f32.xlu1 %v5840_v9 }
 0x5a7   : > { %4143 = vpow2.f32 %v2321_v47 }
 0x5a8   : > { %4145 = vpow2.f32 %v2834_v33 }
 0x5a9   : > { %4147 = vrcp.f32 %v2851_v32 }
 0x5aa   : > { %4149 = vrcp.f32 %v2342_v12  ;;  %v2853_v37 = vpop.xlane.xlu1 %2852  ;;  %v2344_v20 = vpop.xlane.xlu2 %2343 }
 0x5ab   : > { %4151 = vrcp.f32 %v2853_v37  ;;  %v2857_v50 = vpop.xlane.xlu0 %2856 }
 0x5ac   : > { %4153 = vrcp.f32 %v2344_v20 }
 0x5ad   : > { %v5843_v28 = vpop.eup %4143 }
 0x5ae   : > { %v5845_v11 = vpop.eup %4145  ;;  %2353 = vadd.xlane.f32.xlu2 %v5843_v28 }
 0x5af   : > { %v4148_v5 = vpop.eup %4147  ;;  %2866 = vadd.xlane.f32.xlu1 %v5845_v11 }
 0x5b0   : > { %v4150_v8 = vpop.eup %4149  ;;  %v2892_v21 = vmul.f32 %v4148_v5, %v5727_v19 }
 0x5b1   : > { %v4152_v23 = vpop.eup %4151  ;;  %v2383_v38 = vmul.f32 %v4150_v8, %v5741_v62 }
 0x5b2   : > { %v4154_v45 = vpop.eup %4153  ;;  %v2789_v14 = vpop.xlane.xlu1 %2788  ;;  %v2893_v59 = vmul.f32 %v4152_v23, %v5755_v22 }
 0x5b3   : > { %v2855_v55 = vpop.xlane.xlu2 %2854  ;;  %v2805_v56 = vsub.f32 %v5772_v52, %v2789_v14  ;;  %v2384_v27 = vmul.f32 %v4154_v45, %v5753_v53  ;;  %v2346_v52 = vpop.xlane.xlu0 %2345 }
 0x5b4   : > { %v2905_v3 = vpack.c.bf16 %v2893_v59, %v2892_v21  ;;  %4155 = vrcp.f32 %v2855_v55 }
 0x5b5   : > { %v2836_v4 = vmul.f32 1.442695, %v2805_v56  ;;  %v2396_v60 = vpack.c.bf16 %v2384_v27, %v2383_v38 }
 0x5b6   : > { %2981 = vmatmul.bf16.gmra.mxu3 %v2905_v3 }
 0x5b7   : > { %4157 = vpow2.f32 %v2836_v4  ;;  %2472 = vmatmul.bf16.gmra.mxu1 %v2396_v60 }
 0x5b8   : > { %4159 = vrcp.f32 %v2857_v50 }
 0x5ba   : > { %v2278_v58 = vpop.xlane.xlu1 %2277  ;;  %v4156_v2 = vpop.eup %4155 }
 0x5bb   : > { %v2280_v35 = vpop.xlane.xlu2 %2279  ;;  %v2295_v19 = vsub.f32 %v5787_v61, %v2278_v58  ;;  %v2894_v30 = vmul.f32 %v4156_v2, %v5768_v26  ;;  %v2861_v32 = vpop.xlane.xlu0 %2860 }
 0x5bc   : > { %v2296_v22 = vsub.f32 %v5791_v15, %v2280_v35 }
 0x5bd   : > { %v5856_v62 = vpop.eup %4157  ;;  %v2325_v53 = vmul.f32 1.442695, %v2295_v19 }
 0x5be   : > { %v2327_v46 = vmul.f32 1.442695, %v2296_v22  ;;  %2868 = vadd.xlane.f32.xlu2 %v5856_v62  ;;  %v4160_v17 = vpop.eup %4159 }
 0x5bf   : > { %4161 = vpow2.f32 %v2325_v53  ;;  %v2895_v15 = vmul.f32 %v4160_v17, %v5757_v43 }
 0x5c0   : > { %4163 = vpow2.f32 %v2327_v46 }
 0x5c1   : > { %4165 = vrcp.f32 %v2346_v52  ;;  %v2906_v18 = vpack.c.bf16 %v2895_v15, %v2894_v30 }
 0x5c2   : > { %v2348_v57 = vpop.xlane.xlu1 %2347 }
 0x5c3   : > { %v2859_v61 = vpop.xlane.xlu2 %2858  ;;  %v2967_v25 = vpop.f32.mrf.mxu3  ;;  %4167 = vrcp.f32 %v2348_v57 }
 0x5c4   : > { %3826 = vst.msk [vmem:[%s5829_s3 + $0x80] sm:$0xff] %vm2135_vm1, %v2967_v25  ;;  %4169 = vrcp.f32 %v2859_v61 }
 0x5c5   : > { %v5863_v7 = vpop.eup %4161  ;;  %v2463_v29 = vpop.f32.mrf.mxu1  ;;  %4171 = vrcp.f32 %v2861_v32 }
 0x5c6   : > { %v5865_v63 = vpop.eup %4163  ;;  %2500 = vst.msk [vmem:[%s5829_s3 + $0x10] sm:$0xff] %vm2135_vm1, %v2463_v29  ;;  %2986 = vmatmul.bf16.gmra.mxu3 %v2906_v18  ;;  %2357 = vadd.xlane.f32.xlu0 %v5863_v7 }
 0x5c7   : > { %v4166_v26 = vpop.eup %4165  ;;  %2359 = vadd.xlane.f32.xlu1 %v5865_v63 }
 0x5c8   : > { %v2385_v54 = vmul.f32 %v4166_v26, %v5774_v0 }
 0x5c9   : > { %v4168_v43 = vpop.eup %4167 }
 0x5ca   : > { %v2386_v41 = vmul.f32 %v4168_v43, %v5802_v31  ;;  %v2350_v24 = vpop.xlane.xlu1 %2349  ;;  %v4170_v6 = vpop.eup %4169 }
 0x5cb   : > { %v2969_v49 = vpop.f32.mrf.mxu3  ;;  %v2352_v12 = vpop.xlane.xlu2 %2351  ;;  %4173 = vrcp.f32 %v2350_v24  ;;  %v2896_v0 = vmul.f32 %v4170_v6, %v5805_v40 }
 0x5cc   : > { %3827 = vst.msk [vmem:[%s5829_s3 + $0x88] sm:$0xff] %vm2135_vm1, %v2969_v49  ;;  %v2397_v10 = vpack.c.bf16 %v2386_v41, %v2385_v54  ;;  %v4172_v13 = vpop.eup %4171  ;;  %4175 = vrcp.f32 %v2352_v12  ;;  %v2863_v40 = vpop.xlane.xlu0 %2862 }
 0x5cd   : > { %v2465_v42 = vpop.f32.mrf.mxu1  ;;  %v2897_v31 = vmul.f32 %v4172_v13, %v5793_v51  ;;  %4177 = vrcp.f32 %v2863_v40 }
 0x5ce   : > { %2501 = vst.msk [vmem:[%s5829_s3 + $0x18] sm:$0xff] %vm2135_vm1, %v2465_v42  ;;  %2477 = vmatmul.bf16.gmra.mxu1 %v2397_v10 }
 0x5cf   : > { %v2907_v16 = vpack.c.bf16 %v2897_v31, %v2896_v0 }
 0x5d1   : > { %v4174_v1 = vpop.eup %4173 }
 0x5d2   : > { %v4176_v47 = vpop.eup %4175  ;;  %v2387_v33 = vmul.f32 %v4174_v1, %v5811_v48 }
 0x5d3   : > { %v2972_v39 = vpop.f32.mrf.mxu3  ;;  %v2388_v37 = vmul.f32 %v4176_v47, %v5809_v44  ;;  %v4178_v48 = vpop.eup %4177 }
 0x5d4   : > { %3828 = vst.msk [vmem:[%s5829_s3 + $0x90] sm:$0xff] %vm2135_vm1, %v2972_v39  ;;  %v2898_v14 = vmul.f32 %v4178_v48, %v5813_v34 }
 0x5d5   : > { %v2398_v8 = vpack.c.bf16 %v2388_v37, %v2387_v33 }
 0x5d6   : > { %2991 = vmatmul.bf16.gmra.mxu3 %v2907_v16 }
 0x5da   : > { %v2356_v50 = vpop.xlane.xlu0 %2355 }
 0x5db   : > { %v2974_v20 = vpop.f32.mrf.mxu3 }
 0x5dc   : > { %3829 = vst.msk [vmem:[%s5829_s3 + $0x98] sm:$0xff] %vm2135_vm1, %v2974_v20  ;;  %v2468_v5 = vpop.f32.mrf.mxu1 }
 0x5dd   : > { %2502 = vst.msk [vmem:[%s5829_s3 + $0x20] sm:$0xff] %vm2135_vm1, %v2468_v5 }
 0x5de   : > { %2482 = vmatmul.bf16.gmra.mxu1 %v2398_v8 }
 0x5e4   : > { %v2470_v51 = vpop.f32.mrf.mxu1 }
 0x5e5   : > { %2503 = vst.msk [vmem:[%s5829_s3 + $0x28] sm:$0xff] %vm2135_vm1, %v2470_v51 }
 0x619   : > { %v2865_v23 = vpop.xlane.xlu1 %2864 }
 0x61a   : > { %4179 = vrcp.f32 %v2865_v23 }
 0x61b   : > { %4181 = vrcp.f32 %v2356_v50 }
 0x620   : > { %v4180_v45 = vpop.eup %4179 }
 0x621   : > { %v2354_v44 = vpop.xlane.xlu2 %2353  ;;  %v2899_v55 = vmul.f32 %v4180_v45, %v5840_v9  ;;  %v4182_v59 = vpop.eup %4181 }
 0x622   : > { %4183 = vrcp.f32 %v2354_v44  ;;  %v2390_v3 = vmul.f32 %v4182_v59, %v5821_v36  ;;  %v2867_v60 = vpop.xlane.xlu1 %2866 }
 0x623   : > { %v2908_v21 = vpack.c.bf16 %v2899_v55, %v2898_v14  ;;  %4185 = vrcp.f32 %v2867_v60 }
 0x625   : > { %2996 = vmatmul.bf16.gmra.mxu3 %v2908_v21 }
 0x628   : > { %v4184_v56 = vpop.eup %4183 }
 0x629   : > { %v2977_v38 = vpop.f32.mrf.mxu3  ;;  %v2389_v27 = vmul.f32 %v4184_v56, %v5843_v28  ;;  %v4186_v35 = vpop.eup %4185 }
 0x62a   : > { %3830 = vst.msk [vmem:[%s5829_s3 + $0xa0] sm:$0xff] %vm2135_vm1, %v2977_v38  ;;  %v2900_v22 = vmul.f32 %v4186_v35, %v5845_v11 }
 0x62b   : > { %v2399_v4 = vpack.c.bf16 %v2390_v3, %v2389_v27 }
 0x62d   : > { %2487 = vmatmul.bf16.gmra.mxu1 %v2399_v4 }
 0x631   : > { %v2979_v34 = vpop.f32.mrf.mxu3  ;;  %v2869_v9 = vpop.xlane.xlu2 %2868 }
 0x632   : > { %3831 = vst.msk [vmem:[%s5829_s3 + $0xa8] sm:$0xff] %vm2135_vm1, %v2979_v34  ;;  %4187 = vrcp.f32 %v2869_v9 }
 0x634   : > { %v2473_v58 = vpop.f32.mrf.mxu1 }
 0x635   : > { %2504 = vst.msk [vmem:[%s5829_s3 + $0x30] sm:$0xff] %vm2135_vm1, %v2473_v58 }
 0x638   : > { %v4188_v28 = vpop.eup %4187 }
 0x639   : > { %v2982_v19 = vpop.f32.mrf.mxu3  ;;  %v2358_v36 = vpop.xlane.xlu0 %2357  ;;  %v2901_v2 = vmul.f32 %v4188_v28, %v5856_v62 }
 0x63a   : > { %3832 = vst.msk [vmem:[%s5829_s3 + $0xb0] sm:$0xff] %vm2135_vm1, %v2982_v19  ;;  %4189 = vrcp.f32 %v2358_v36  ;;  %v2360_v52 = vpop.xlane.xlu1 %2359 }
 0x63b   : > { %4191 = vrcp.f32 %v2360_v52  ;;  %v2909_v53 = vpack.c.bf16 %v2901_v2, %v2900_v22 }
 0x63c   : > { %v2475_v46 = vpop.f32.mrf.mxu1 }
 0x63d   : > { %2505 = vst.msk [vmem:[%s5829_s3 + $0x38] sm:$0xff] %vm2135_vm1, %v2475_v46  ;;  %3001 = vmatmul.bf16.gmra.mxu3 %v2909_v53 }
 0x640   : > { %v4190_v17 = vpop.eup %4189 }
 0x641   : > { %v4192_v30 = vpop.eup %4191  ;;  %v2984_v57 = vpop.f32.mrf.mxu3  ;;  %v2391_v11 = vmul.f32 %v4190_v17, %v5863_v7 }
 0x642   : > { %3833 = vst.msk [vmem:[%s5829_s3 + $0xb8] sm:$0xff] %vm2135_vm1, %v2984_v57  ;;  %v2392_v62 = vmul.f32 %v4192_v30, %v5865_v63 }
 0x644   : > { %v2400_v61 = vpack.c.bf16 %v2392_v62, %v2391_v11 }
 0x646   : > { %2492 = vmatmul.bf16.gmra.mxu1 %v2400_v61 }
 0x649   : > { %v2987_v15 = vpop.f32.mrf.mxu3 }
 0x64a   : > { %3834 = vst.msk [vmem:[%s5829_s3 + $0xc0] sm:$0xff] %vm2135_vm1, %v2987_v15 }
 0x64b   : > { %v2478_v25 = vpop.f32.mrf.mxu1 }
 0x64c   : > { %2506 = vst.msk [vmem:[%s5829_s3 + $0x40] sm:$0xff] %vm2135_vm1, %v2478_v25 }
 0x651   : > { %v2989_v18 = vpop.f32.mrf.mxu3 }
 0x652   : > { %3835 = vst.msk [vmem:[%s5829_s3 + $0xc8] sm:$0xff] %vm2135_vm1, %v2989_v18 }
 0x653   : > { %v2480_v29 = vpop.f32.mrf.mxu1 }
 0x654   : > { %2507 = vst.msk [vmem:[%s5829_s3 + $0x48] sm:$0xff] %vm2135_vm1, %v2480_v29 }
 0x659   : > { %v2992_v7 = vpop.f32.mrf.mxu3 }
 0x65a   : > { %3836 = vst.msk [vmem:[%s5829_s3 + $0xd0] sm:$0xff] %vm2135_vm1, %v2992_v7 }
 0x65b   : > { %v2483_v63 = vpop.f32.mrf.mxu1 }
 0x65c   : > { %2508 = vst.msk [vmem:[%s5829_s3 + $0x50] sm:$0xff] %vm2135_vm1, %v2483_v63 }
 0x661   : > { %v2994_v26 = vpop.f32.mrf.mxu3 }
 0x662   : > { %3837 = vst.msk [vmem:[%s5829_s3 + $0xd8] sm:$0xff] %vm2135_vm1, %v2994_v26 }
 0x663   : > { %v2485_v32 = vpop.f32.mrf.mxu1 }
 0x664   : > { %2509 = vst.msk [vmem:[%s5829_s3 + $0x58] sm:$0xff] %vm2135_vm1, %v2485_v32 }
 0x6a8   : > { %v2997_v43 = vpop.f32.mrf.mxu3 }
 0x6a9   : > { %3838 = vst.msk [vmem:[%s5829_s3 + $0xe0] sm:$0xff] %vm2135_vm1, %v2997_v43 }
 0x6aa   : > { %v2488_v54 = vpop.f32.mrf.mxu1 }
 0x6ab   : > { %2510 = vst.msk [vmem:[%s5829_s3 + $0x60] sm:$0xff] %vm2135_vm1, %v2488_v54 }
 0x6b0   : > { %v2999_v49 = vpop.f32.mrf.mxu3 }
 0x6b1   : > { %3839 = vst.msk [vmem:[%s5829_s3 + $0xe8] sm:$0xff] %vm2135_vm1, %v2999_v49 }
 0x6b2   : > { %v2490_v41 = vpop.f32.mrf.mxu1 }
 0x6b3   : > { %2511 = vst.msk [vmem:[%s5829_s3 + $0x68] sm:$0xff] %vm2135_vm1, %v2490_v41 }
 0x6c0   : > { %v3002_v24 = vpop.f32.mrf.mxu3 }
 0x6c1   : > { %3840 = vst.msk [vmem:[%s5829_s3 + $0xf0] sm:$0xff] %vm2135_vm1, %v3002_v24 }
 0x6c3   : > { %v2493_v12 = vpop.f32.mrf.mxu1 }
 0x6c4   : > { %2512 = vst.msk [vmem:[%s5829_s3 + $0x70] sm:$0xff] %vm2135_vm1, %v2493_v12 }
 0x6c8   : > { %v3004_v6 = vpop.f32.mrf.mxu3 }
 0x6c9   : > { %3841 = vst.msk [vmem:[%s5829_s3 + $0xf8] sm:$0xff] %vm2135_vm1, %v3004_v6 }
 0x6cb   : > { %v2495_v10 = vpop.f32.mrf.mxu1 }
 0x6cc   : > { %2513 = vst.msk [vmem:[%s5829_s3 + $0x78] sm:$0xff] %vm2135_vm1, %v2495_v10 }
 0x6cd PF: > { %p12_p7 = scmp.ge.s32.totalorder %s4297_s14, 6   ;;  %s6038_s9 = smov %s4249_s10 }
 0x6ce   : > { %s6039_s10 = smov %s4253_s11  ;;  %s6040_s11 = smov %s4307_s17 }
 0x6cf   : > { %s6041_s12 = smov %s4297_s14  ;;  %14 = sbr.rel (!%p12_p7) target bundleno = 3 (0x3), region = 72 }
 0x6d4   :  { %3048 = vsyncpa [#allocation6], 1 }
 0x6d5   :  { %3050 = vsyncpa [#allocation6 + $0x1], 1 }

</bundles_post_ra>
